<compile_context>
chip_gen: v5e
topology: v5e:2x2
jax: 0.10.0
libtpu: 0.0.40
codegen_flags: <defaults>
</compile_context>

<pallas_src>
import jax
import jax.numpy as jnp
from jax.experimental import pallas as pl
from jax.experimental.pallas import tpu as pltpu


def _round_up(x, m):
    return (x + m - 1) // m * m


def mil_attention_kernel(h_ref, w1_ref, b1_ref, w2_ref, wc_ref, bc_ref,
                         ylogit_ref, a_ref):
    bt, n, l_pad = h_ref.shape
    n_pad = a_ref.shape[-1]

    h_tile = h_ref[...]                                   # (BT, N, Lp) bf16
    h_flat = h_tile.reshape(bt * n, l_pad)                # (BT*N, Lp)

    # Attention MLP: Linear(L, D) -> Tanh.  One row-filled MXU matmul.
    hid = jnp.tanh(
        jnp.dot(h_flat, w1_ref[...], preferred_element_type=jnp.float32)
        + b1_ref[...])                                    # (BT*N, D) f32

    # Second Linear(D, 1): VPU multiply + lane reduce against the W2 row.
    hid3 = hid.reshape(bt, n, -1)                         # (BT, N, D)
    scores = jnp.sum(hid3 * w2_ref[...], axis=-1)         # (BT, N) f32
    # (b2 bias omitted: a constant shift cancels under the per-bag softmax)

    # Per-bag softmax over instances; EXACT f32 normalization (A is returned).
    m = jnp.max(scores, axis=-1, keepdims=True)           # (BT, 1)
    e = jnp.exp(scores - m)                               # (BT, N)
    a = e / jnp.sum(e, axis=-1, keepdims=True)            # (BT, N)

    # Lane-dense store of A: pad the instance axis up to N_pad inside VMEM so
    # the store is a full-width (multiple-of-128 lanes) slab.
    if n_pad != n:
        a_out = jnp.concatenate(
            [a, jnp.zeros((bt, n_pad - n), dtype=a.dtype)], axis=-1)
    else:
        a_out = a
    a_ref[...] = a_out                                    # (BT, N_pad)

    # Pooling Z = A @ H: batched (1, N) @ (N, Lp) MXU contraction per bag —
    # no (BT, N, Lp) broadcast temporary.
    z = jnp.einsum(
        "bqn,bnl->bql",
        a[:, None, :].astype(h_tile.dtype), h_tile,
        preferred_element_type=jnp.float32)[:, 0, :]      # (BT, Lp) f32

    # Classifier: Linear(L, C_pad) -> lane-dense logits slab.
    ylogit_ref[...] = (
        jnp.dot(z.astype(wc_ref.dtype), wc_ref[...],
                preferred_element_type=jnp.float32)
        + bc_ref[...])                                    # (BT, C_pad)


def _vmem_budget_and_min_steps():
    """Generation-aware (VMEM budget bytes, minimum grid-step count)."""
    try:
        kind = jax.devices()[0].device_kind.lower()
    except Exception:
        kind = ""
    if "v7" in kind or "7x" in kind:
        # v7x: 64 MiB VMEM per TensorCore, 2 TCs -> want >= 2 steps per core.
        return 48 * 1024 * 1024, 4
    if "v5" in kind or "v6" in kind:
        # v5e / v6e: single TensorCore, 128 MiB physical VMEM; raise the
        # scoped default so big bag tiles still double-buffer.
        return 96 * 1024 * 1024, 1
    # Unknown backend (e.g. interpret mode): conservative, works everywhere.
    return 48 * 1024 * 1024, 1


def _pick_b_tile(B, N, L_pad, N_pad, C_pad, D, mxu_bytes, budget, min_steps):
    """Largest divisor of B that (a) keeps output blocks tile-aligned
    (multiple of 8 or == B), (b) fits the double-buffered VMEM budget and
    (c) leaves at least `min_steps` grid steps (relaxed progressively)."""
    divs = [d for d in range(1, B + 1)
            if B % d == 0 and (d == B or d % 8 == 0)]

    def vmem_need(d):
        h_tile = d * N * L_pad * mxu_bytes
        outs = d * (N_pad + C_pad) * 4
        weights = (L_pad * D + L_pad * C_pad) * mxu_bytes + (2 * D + C_pad) * 4
        return 2 * (h_tile + outs) + 2 * weights          # double-buffered

    steps = min_steps
    while steps >= 1:
        cands = [d for d in divs if B // d >= steps and vmem_need(d) <= budget]
        if cands:
            return max(cands)
        steps //= 2
    return min(divs)                                      # smallest legal tile


def mil_attention_forward(H, params, b_tile=None, use_bf16=True):
    """H: (B, N, L) float32. Returns (Y_logit (B, C), Y_hat (B,), A (B, 1, N))."""
    B, N, L = H.shape
    W1, b1, W2, Wc, bc = (params["W1"], params["b1"], params["W2"],
                          params["Wc"], params["bc"])
    D = W1.shape[1]
    K = W2.shape[1]
    assert K == 1, "kernel assumes K == 1 (as in the reference module)"
    C = Wc.shape[1]

    # Lane / contraction-depth padding (zero padding => numerically exact).
    L_pad = _round_up(L, 128)
    C_pad = _round_up(max(C, 128), 128)
    N_pad = _round_up(max(N, 128), 128)

    mxu_dtype = jnp.bfloat16 if use_bf16 else jnp.float32
    mxu_bytes = 2 if use_bf16 else 4

    # MXU operands in bf16; biases / VPU operand (W2) and accumulation in f32.
    H_p = jnp.pad(H, ((0, 0), (0, 0), (0, L_pad - L))).astype(mxu_dtype)
    W1_p = jnp.pad(W1, ((0, L_pad - L), (0, 0))).astype(mxu_dtype)
    Wc_p = jnp.pad(Wc, ((0, L_pad - L), (0, C_pad - C))).astype(mxu_dtype)
    bc_p = jnp.pad(bc, ((0, 0), (0, C_pad - C)))               # (1, C_pad) f32
    w2_row = W2.reshape(1, D)                                  # (1, D) f32

    budget, min_steps = _vmem_budget_and_min_steps()
    if b_tile is None:
        b_tile = _pick_b_tile(B, N, L_pad, N_pad, C_pad, D,
                              mxu_bytes, budget, min_steps)
    assert B % b_tile == 0 and (b_tile == B or b_tile % 8 == 0)
    grid = (B // b_tile,)

    grid_spec = pltpu.PrefetchScalarGridSpec(
        num_scalar_prefetch=0,
        grid=grid,
        in_specs=[
            pl.BlockSpec((b_tile, N, L_pad), lambda b: (b, 0, 0)),  # H tile
            pl.BlockSpec((L_pad, D), lambda b: (0, 0)),             # W1
            pl.BlockSpec((1, D), lambda b: (0, 0)),                 # b1
            pl.BlockSpec((1, D), lambda b: (0, 0)),                 # W2 row
            pl.BlockSpec((L_pad, C_pad), lambda b: (0, 0)),         # Wc
            pl.BlockSpec((1, C_pad), lambda b: (0, 0)),             # bc
        ],
        out_specs=[
            pl.BlockSpec((b_tile, C_pad), lambda b: (b, 0)),        # logits
            pl.BlockSpec((b_tile, N_pad), lambda b: (b, 0)),        # A slab
        ],
    )

    Y_logit_p, A_p = pl.pallas_call(
        mil_attention_kernel,
        grid_spec=grid_spec,
        out_shape=(
            jax.ShapeDtypeStruct((B, C_pad), jnp.float32),
            jax.ShapeDtypeStruct((B, N_pad), jnp.float32),
        ),
        compiler_params=pltpu.CompilerParams(
            dimension_semantics=("parallel",),
            vmem_limit_bytes=budget),
    )(H_p, W1_p, b1, w2_row, Wc_p, bc_p)

    Y_logit = Y_logit_p[:, :C]
    A = A_p[:, :N].reshape(B, 1, N)
    # Softmax is monotonic -> argmax directly on the logits.
    Y_hat = jnp.argmax(Y_logit, axis=1).astype(jnp.float32)
    return Y_logit, Y_hat, A


def init_params(key, L, D, K, num_classes):
    """Deterministic init mimicking PyTorch Linear default U(-1/sqrt(fan_in), ..)."""
    ks = jax.random.split(key, 6)

    def lin(kw, kb, fan_in, fan_out):
        bound = 1.0 / jnp.sqrt(fan_in)
        W = jax.random.uniform(kw, (fan_in, fan_out), jnp.float32, -bound, bound)
        b = jax.random.uniform(kb, (1, fan_out), jnp.float32, -bound, bound)
        return W, b

    W1, b1 = lin(ks[0], ks[1], L, D)                 # Linear(L, D)
    W2, b2 = lin(ks[2], ks[3], D, K)                 # Linear(D, K=1)
    Wc, bc = lin(ks[4], ks[5], L * K, num_classes)   # Linear(L*K, num_classes)
    return {"W1": W1, "b1": b1, "W2": W2, "b2": b2, "Wc": Wc, "bc": bc}


def reference_forward(H, params):
    """Pure-JAX f32 reference matching the PyTorch module exactly."""
    scores = jnp.tanh(H @ params["W1"] + params["b1"]) @ params["W2"] + params["b2"]
    A = jax.nn.softmax(jnp.swapaxes(scores, 1, 2), axis=2)      # (B, 1, N)
    Z = A @ H                                                   # (B, 1, L)
    Y_logit = (Z @ params["Wc"] + params["bc"])[:, 0, :]        # (B, C)
    Y_hat = jnp.argmax(jax.nn.softmax(Y_logit, axis=1), axis=1).astype(jnp.float32)
    return Y_logit, Y_hat, A


if __name__ == "__main__":
    # Small shapes consistent with the module: bags of N instances of dim L.
    B, N, L = 16, 32, 64
    D, K, num_classes = 128, 1, 4

    key = jax.random.PRNGKey(0)
    k_h, k_p = jax.random.split(key)
    H = jax.random.normal(k_h, (B, N, L), dtype=jnp.float32)
    params = init_params(k_p, L, D, K, num_classes)

    Y_logit, Y_hat, A = mil_attention_forward(H, params)
    jax.block_until_ready((Y_logit, Y_hat, A))

    # Sanity checks against the pure-f32 reference.  The kernel feeds the MXU
    # bf16 operands, so logits/attention differ from the f32 reference at the
    # ~1e-3 level; tolerances below cover that while still catching real bugs.
    Y_ref, Yh_ref, A_ref = reference_forward(H, params)
    assert Y_logit.shape == (B, num_classes)
    assert Y_hat.shape == (B,)
    assert A.shape == (B, 1, N)
    # Exact f32 softmax normalization in-kernel -> rows sum to 1 tightly.
    assert jnp.allclose(jnp.sum(A, axis=2), 1.0, atol=1e-4)
    assert jnp.allclose(A, A_ref, atol=1e-2, rtol=1e-1)
    assert jnp.allclose(Y_logit, Y_ref, atol=2e-2, rtol=2e-2)

    print("KERNEL_OK")
</pallas_src>

<mosaic_0001>
module attributes {stable_mosaic.version = 11 : i64} {
  func.func @mil_attention_kernel(%arg0: i32, %arg1: memref<16x32x128xbf16, #tpu.memory_space<vmem>>, %arg2: memref<128x128xbf16, #tpu.memory_space<vmem>>, %arg3: memref<1x128xf32, #tpu.memory_space<vmem>>, %arg4: memref<1x128xf32, #tpu.memory_space<vmem>>, %arg5: memref<128x128xbf16, #tpu.memory_space<vmem>>, %arg6: memref<1x128xf32, #tpu.memory_space<vmem>>, %arg7: memref<16x128xf32, #tpu.memory_space<vmem>>, %arg8: memref<16x128xf32, #tpu.memory_space<vmem>>) attributes {dimension_semantics = [#tpu.dimension_semantics<parallel>], iteration_bounds = array<i64: 1>, scalar_prefetch = 0 : i64, scratch_operands = 0 : i64, tpu.core_type = #tpu.core_type<tc>, window_params = [{transform_indices = @transform_0, window_bounds = array<i64: 16, 32, 128>}, {pipeline_mode = #tpu.pipeline_mode<synchronous>, transform_indices = @transform_1, window_bounds = array<i64: 128, 128>}, {pipeline_mode = #tpu.pipeline_mode<synchronous>, transform_indices = @transform_2, window_bounds = array<i64: 1, 128>}, {pipeline_mode = #tpu.pipeline_mode<synchronous>, transform_indices = @transform_3, window_bounds = array<i64: 1, 128>}, {pipeline_mode = #tpu.pipeline_mode<synchronous>, transform_indices = @transform_4, window_bounds = array<i64: 128, 128>}, {pipeline_mode = #tpu.pipeline_mode<synchronous>, transform_indices = @transform_5, window_bounds = array<i64: 1, 128>}, {transform_indices = @transform_6, window_bounds = array<i64: 16, 128>}, {transform_indices = @transform_7, window_bounds = array<i64: 16, 128>}]} {
    %c0 = arith.constant 0 : index
    %c0_0 = arith.constant 0 : index
    %c0_1 = arith.constant 0 : index
    %0 = vector.load %arg1[%c0, %c0_0, %c0_1] : memref<16x32x128xbf16, #tpu.memory_space<vmem>>, vector<16x32x128xbf16>
    %1 = vector.shape_cast %0 : vector<16x32x128xbf16> to vector<512x128xbf16>
    %c0_2 = arith.constant 0 : index
    %c0_3 = arith.constant 0 : index
    %2 = vector.load %arg2[%c0_2, %c0_3] : memref<128x128xbf16, #tpu.memory_space<vmem>>, vector<128x128xbf16>
    %cst = arith.constant dense<0.000000e+00> : vector<512x128xf32>
    %3 = tpu.matmul %1, %2, %cst {dimension_numbers = #tpu.dot_dimension_numbers<[1], [0], [0], [1], [0, 0, 1, 1], [], []>} : vector<512x128xbf16>, vector<128x128xbf16>, vector<512x128xf32> -> vector<512x128xf32>
    %c0_4 = arith.constant 0 : index
    %c0_5 = arith.constant 0 : index
    %4 = vector.load %arg3[%c0_4, %c0_5] : memref<1x128xf32, #tpu.memory_space<vmem>>, vector<1x128xf32>
    %5 = vector.broadcast %4 : vector<1x128xf32> to vector<512x128xf32>
    %6 = arith.addf %3, %5 : vector<512x128xf32>
    %7 = math.tanh %6 : vector<512x128xf32>
    %8 = vector.shape_cast %7 : vector<512x128xf32> to vector<16x32x128xf32>
    %c0_6 = arith.constant 0 : index
    %c0_7 = arith.constant 0 : index
    %9 = vector.load %arg4[%c0_6, %c0_7] : memref<1x128xf32, #tpu.memory_space<vmem>>, vector<1x128xf32>
    %10 = vector.shape_cast %9 : vector<1x128xf32> to vector<1x1x128xf32>
    %11 = vector.broadcast %10 : vector<1x1x128xf32> to vector<16x32x128xf32>
    %12 = arith.mulf %8, %11 : vector<16x32x128xf32>
    %cst_8 = arith.constant dense<0.000000e+00> : vector<16x32xf32>
    %13 = vector.multi_reduction <add>, %12, %cst_8 [2] : vector<16x32x128xf32> to vector<16x32xf32>
    %cst_9 = arith.constant dense<0xFF800000> : vector<16xf32>
    %14 = vector.multi_reduction <maximumf>, %13, %cst_9 [1] : vector<16x32xf32> to vector<16xf32>
    %15 = vector.shape_cast %14 : vector<16xf32> to vector<16x1xf32>
    %16 = vector.broadcast %15 : vector<16x1xf32> to vector<16x32xf32>
    %17 = arith.subf %13, %16 : vector<16x32xf32>
    %18 = math.exp %17 : vector<16x32xf32>
    %cst_10 = arith.constant dense<0.000000e+00> : vector<16xf32>
    %19 = vector.multi_reduction <add>, %18, %cst_10 [1] : vector<16x32xf32> to vector<16xf32>
    %20 = vector.shape_cast %19 : vector<16xf32> to vector<16x1xf32>
    %21 = vector.broadcast %20 : vector<16x1xf32> to vector<16x32xf32>
    %22 = arith.divf %18, %21 : vector<16x32xf32>
    %cst_11 = arith.constant 0.000000e+00 : f32
    %23 = vector.broadcast %cst_11 : f32 to vector<16x96xf32>
    %24 = tpu.concatenate %22, %23 in 1 : vector<16x32xf32>, vector<16x96xf32> -> vector<16x128xf32>
    %c0_12 = arith.constant 0 : index
    %c0_13 = arith.constant 0 : index
    %25 = vector.load %arg8[%c0_12, %c0_13] : memref<16x128xf32, #tpu.memory_space<vmem>>, vector<16x128xf32>
    tpu.vector_store %arg8[%c0_12, %c0_13], %24 {strides = array<i32>} : memref<16x128xf32, #tpu.memory_space<vmem>>, vector<16x128xf32>,
    %26 = vector.shape_cast %22 : vector<16x32xf32> to vector<16x1x32xf32>
    %27 = arith.truncf %26 : vector<16x1x32xf32> to vector<16x1x32xbf16>
    "tpu.trace_start"() <{level = 10 : i32, message = "bqn,bnl->bql"}> : () -> ()
    %cst_14 = arith.constant dense<0.000000e+00> : vector<16x1x128xf32>
    %28 = tpu.matmul %27, %0, %cst_14 {dimension_numbers = #tpu.dot_dimension_numbers<[2], [1], [1], [2], [0, 0, 0, 1, 1, 2], [0], [0]>} : vector<16x1x32xbf16>, vector<16x32x128xbf16>, vector<16x1x128xf32> -> vector<16x1x128xf32>
    "tpu.trace_stop"() : () -> ()
    %29 = vector.shape_cast %28 : vector<16x1x128xf32> to vector<16x128xf32>
    %30 = arith.truncf %29 : vector<16x128xf32> to vector<16x128xbf16>
    %c0_15 = arith.constant 0 : index
    %c0_16 = arith.constant 0 : index
    %31 = vector.load %arg5[%c0_15, %c0_16] : memref<128x128xbf16, #tpu.memory_space<vmem>>, vector<128x128xbf16>
    %cst_17 = arith.constant dense<0.000000e+00> : vector<16x128xf32>
    %32 = tpu.matmul %30, %31, %cst_17 {dimension_numbers = #tpu.dot_dimension_numbers<[1], [0], [0], [1], [0, 0, 1, 1], [], []>} : vector<16x128xbf16>, vector<128x128xbf16>, vector<16x128xf32> -> vector<16x128xf32>
    %c0_18 = arith.constant 0 : index
    %c0_19 = arith.constant 0 : index
    %33 = vector.load %arg6[%c0_18, %c0_19] : memref<1x128xf32, #tpu.memory_space<vmem>>, vector<1x128xf32>
    %34 = vector.broadcast %33 : vector<1x128xf32> to vector<16x128xf32>
    %35 = arith.addf %32, %34 : vector<16x128xf32>
    %c0_20 = arith.constant 0 : index
    %c0_21 = arith.constant 0 : index
    %36 = vector.load %arg7[%c0_20, %c0_21] : memref<16x128xf32, #tpu.memory_space<vmem>>, vector<16x128xf32>
    tpu.vector_store %arg7[%c0_20, %c0_21], %35 {strides = array<i32>} : memref<16x128xf32, #tpu.memory_space<vmem>>, vector<16x128xf32>,
    return
  }
  func.func @transform_0(%arg0: i32) -> (i32, i32, i32) {
    %c0_i32 = arith.constant 0 : i32
    %c0_i32_0 = arith.constant 0 : i32
    %c0_i32_1 = arith.constant 0 : i32
    return %arg0, %c0_i32, %c0_i32_0 : i32, i32, i32
  }
  func.func @transform_1(%arg0: i32) -> (i32, i32) {
    %c0_i32 = arith.constant 0 : i32
    %c0_i32_0 = arith.constant 0 : i32
    %c0_i32_1 = arith.constant 0 : i32
    return %c0_i32, %c0_i32_0 : i32, i32
  }
  func.func @transform_2(%arg0: i32) -> (i32, i32) {
    %c0_i32 = arith.constant 0 : i32
    %c0_i32_0 = arith.constant 0 : i32
    %c0_i32_1 = arith.constant 0 : i32
    return %c0_i32, %c0_i32_0 : i32, i32
  }
  func.func @transform_3(%arg0: i32) -> (i32, i32) {
    %c0_i32 = arith.constant 0 : i32
    %c0_i32_0 = arith.constant 0 : i32
    %c0_i32_1 = arith.constant 0 : i32
    return %c0_i32, %c0_i32_0 : i32, i32
  }
  func.func @transform_4(%arg0: i32) -> (i32, i32) {
    %c0_i32 = arith.constant 0 : i32
    %c0_i32_0 = arith.constant 0 : i32
    %c0_i32_1 = arith.constant 0 : i32
    return %c0_i32, %c0_i32_0 : i32, i32
  }
  func.func @transform_5(%arg0: i32) -> (i32, i32) {
    %c0_i32 = arith.constant 0 : i32
    %c0_i32_0 = arith.constant 0 : i32
    %c0_i32_1 = arith.constant 0 : i32
    return %c0_i32, %c0_i32_0 : i32, i32
  }
  func.func @transform_6(%arg0: i32) -> (i32, i32) {
    %c0_i32 = arith.constant 0 : i32
    %c0_i32_0 = arith.constant 0 : i32
    return %arg0, %c0_i32 : i32, i32
  }
  func.func @transform_7(%arg0: i32) -> (i32, i32) {
    %c0_i32 = arith.constant 0 : i32
    %c0_i32_0 = arith.constant 0 : i32
    return %arg0, %c0_i32 : i32, i32
  }
}

</mosaic_0001>

<bundles_post_ra>
// kernel: tpu_custom_call.1
= control target key start
LH: loop header
LB: loop body
LE: loop exit
PB: predicated region body
PF: predicated region fallthrough
CT: control target
= control target key end

     0   :  { %13 = vsyncpa [#allocation3], 0  ;;  %s6277_s0 = inlined_call_operand.hbm [shape: bf16[16,32,128], index: 0, kind: input, shape index: {}]   ;;  %s6278_s1 = inlined_call_operand.hbm [shape: bf16[128,128], index: 1, kind: input, shape index: {}]   ;;  %s6279_s2 = inlined_call_operand.vmem [shape: f32[1,128], index: 2, kind: input, shape index: {}]   ;;  %s6280_s3 = inlined_call_operand.vmem [shape: f32[1,128], index: 3, kind: input, shape index: {}]   ;;  %s6281_s4 = inlined_call_operand.hbm [shape: bf16[128,128], index: 4, kind: input, shape index: {}]   ;;  %s6282_s5 = inlined_call_operand.vmem [shape: f32[1,128], index: 5, kind: input, shape index: {}]   ;;  %s6283_s6 = inlined_call_operand.hbm [shape: f32[16,128], index: 6, kind: output, shape index: {0}]   ;;  %s6284_s7 = inlined_call_operand.hbm [shape: f32[16,128], index: 7, kind: output, shape index: {1}]  }
   0x1   :  { %14 = vsyncpa [#allocation6], 0 }
   0x2   :  { %15 = vsyncpa [#allocation4], 0 }
   0x3   :  { %16 = vsyncpa [#allocation10], 0  ;;  %s34_s26 = sshll.u32 %s6278_s1, 4  ;;  %s4228_s27 = smov [#allocation5]   ;;  %s35_s26 = int_to_ptr.hbm [resolvable:$true] %s34_s26 }
   0x4   :  { %s36_s28 = sshll.u32 %s4228_s27, 4  ;;  %s21_s8 = sshll.u32 %s6277_s0, 4  ;;  %s37_s28 = int_to_ptr.vmem [resolvable:$true] %s36_s28  ;;  %s22_s8 = int_to_ptr.hbm [resolvable:$true] %s21_s8 }
   0x5   :  { %s4229_s9 = smov 64   ;;  %s4230_s10 = smov 4  }
   0x6   :  { %42 = dma.hbm_to_vmem [thread:$0]  %s35_s26, 1024, %s37_s28, [#allocation6], %s4229_s9, %s4229_s9, %s4230_s10  }
   0x7   :  { %s4231_s11 = smov [#allocation2]   ;;  %s51_s15 = sshll.u32 %s6281_s4, 4  ;;  %s52_s15 = int_to_ptr.hbm [resolvable:$true] %s51_s15 }
   0x8   :  { %s23_s12 = sshll.u32 %s4231_s11, 4  ;;  %s4232_s1 = smov [#allocation7]   ;;  %s24_s12 = int_to_ptr.vmem [resolvable:$true] %s23_s12 }
   0x9   :  { %29 = dma.hbm_to_vmem [thread:$0]  %s22_s8, 4096, %s24_s12, [#allocation3], %s4229_s9, %s4229_s9, %s4230_s10  }
   0xa   :  { %s53_s16 = sshll.u32 %s4232_s1, 4  ;;  %s54_s16 = int_to_ptr.vmem [resolvable:$true] %s53_s16 }
   0xb   :  { %59 = dma.hbm_to_vmem [thread:$0]  %s52_s15, 1024, %s54_s16, [#allocation6], %s4229_s9, %s4229_s9, %s4230_s10  }
   0xc   :  { %4220 = dma.done.wait [#allocation3], 4096  }
   0xd   :  { %4221 = vsyncadd [#allocation3], 4294963200 }
   0xe   :  { %4222 = dma.done.wait [#allocation6], 2048  }
   0xf   :  { %4223 = vsyncadd [#allocation6], 4294965248  ;;  %v3743_v0 = vld [vmem:[#allocation5 + $0x38] sm:$0xff]  ;;  %v3742_v1 = vld [vmem:[#allocation5 + $0x30] sm:$0xff]  ;;  %vm897_vm0 = vcmask 130112   ;;  %vm901_vm1 = vcmask 195712  }
  0x10   :  { %399 = vmatpush.bf16.msra.mxu0 %v3743_v0  ;;  %3752 = vmatpush.bf16.msra.mxu1 %v3743_v0  ;;  %v3741_v2 = vld [vmem:[#allocation5 + $0x28] sm:$0xff]  ;;  %v3740_v3 = vld [vmem:[#allocation5 + $0x20] sm:$0xff]  ;;  %v3739_v4 = vld [vmem:[#allocation5 + $0x18] sm:$0xff]  ;;  %vm905_vm2 = vcmask 261312   ;;  %vm1012_vm3 = vcmask 1041409   ;;  %vm1016_vm4 = vcmask 1043459  }
  0x11   :  { %3754 = vmatpush.bf16.msra.mxu3 %v3743_v0  ;;  %3753 = vmatpush.bf16.msra.mxu2 %v3743_v0  ;;  %v3738_v5 = vld [vmem:[#allocation5 + $0x10] sm:$0xff]  ;;  %v3737_v6 = vld [vmem:[#allocation5 + $0x8] sm:$0xff]  ;;  %v3736_v7 = vld [vmem:[#allocation5] sm:$0xff]  ;;  %vm1014_vm5 = vcmask 1042434   ;;  %vm1018_vm6 = vcmask 1044484   ;;  %vm1020_vm7 = vcmask 1045509  }
  0x12   :  { %v3704_v8 = vld [vmem:[#allocation2] sm:$0xff]  ;;  %v3723_v11 = vld [vmem:[#allocation2 + $0x98] sm:$0xff]  ;;  %v3705_v12 = vld [vmem:[#allocation2 + $0x8] sm:$0xff]  ;;  %vm1022_vm8 = vcmask 1046534   ;;  %vm6360_vm9 = vcmask 1047559   ;;  %vm1035_vm10 = vcmask 261120  }
  0x13   :  { %v3716_v9 = vld [vmem:[#allocation2 + $0x60] sm:$0xff]  ;;  %v3707_v13 = vld [vmem:[#allocation2 + $0x18] sm:$0xff]  ;;  %v3706_v14 = vld [vmem:[#allocation2 + $0x10] sm:$0xff]  ;;  %s3413_s21 = sshll.u32 %s6284_s7, 4  ;;  %s4235_s22 = smov 128   ;;  %s3414_s21 = int_to_ptr.hbm [resolvable:$true] %s3413_s21 }
  0x14   :  { %400 = vmatpush.bf16.msra.mxu0 %v3742_v1  ;;  %3755 = vmatpush.bf16.msra.mxu1 %v3742_v1  ;;  %v3728_v10 = vld [vmem:[#allocation2 + $0xc0] sm:$0xff]  ;;  %v3717_v15 = vld [vmem:[#allocation2 + $0x68] sm:$0xff]  ;;  %v3718_v18 = vld [vmem:[#allocation2 + $0x70] sm:$0xff]  ;;  %s4236_s23 = smov 8   ;;  %s4237_s26 = smov [#allocation8]  }
  0x15   :  { %3757 = vmatpush.bf16.msra.mxu3 %v3742_v1  ;;  %3756 = vmatpush.bf16.msra.mxu2 %v3742_v1  ;;  %v3724_v16 = vld [vmem:[#allocation2 + $0xa0] sm:$0xff]  ;;  %v3729_v17 = vld [vmem:[#allocation2 + $0xc8] sm:$0xff]  ;;  %v3730_v20 = vld [vmem:[#allocation2 + $0xd0] sm:$0xff]  ;;  %s3398_s27 = sshll.u32 %s4237_s26, 4  ;;  %s3400_s30 = sshll.u32 %s6283_s6, 4  ;;  %s3399_s27 = int_to_ptr.vmem [resolvable:$true] %s3398_s27  ;;  %s3401_s30 = int_to_ptr.hbm [resolvable:$true] %s3400_s30 }
  0x16   :  { %v3725_v19 = vld [vmem:[#allocation2 + $0xa8] sm:$0xff]  ;;  %v3708_v22 = vld [vmem:[#allocation2 + $0x20] sm:$0xff]  ;;  %v3719_v23 = vld [vmem:[#allocation2 + $0x78] sm:$0xff] }
  0x17   :  { %v3709_v21 = vld [vmem:[#allocation2 + $0x28] sm:$0xff]  ;;  %v3726_v24 = vld [vmem:[#allocation2 + $0xb0] sm:$0xff]  ;;  %v3731_v25 = vld [vmem:[#allocation2 + $0xd8] sm:$0xff] }
  0x18   :  { %401 = vmatpush.bf16.msra.mxu0 %v3741_v2  ;;  %3758 = vmatpush.bf16.msra.mxu1 %v3741_v2  ;;  %v3720_v26 = vld [vmem:[#allocation2 + $0x80] sm:$0xff]  ;;  %v3727_v28 = vld [vmem:[#allocation2 + $0xb8] sm:$0xff]  ;;  %v3710_v30 = vld [vmem:[#allocation2 + $0x30] sm:$0xff] }
  0x19   :  { %3760 = vmatpush.bf16.msra.mxu3 %v3741_v2  ;;  %3759 = vmatpush.bf16.msra.mxu2 %v3741_v2  ;;  %v3732_v27 = vld [vmem:[#allocation2 + $0xe0] sm:$0xff]  ;;  %v3711_v29 = vld [vmem:[#allocation2 + $0x38] sm:$0xff]  ;;  %v3721_v31 = vld [vmem:[#allocation2 + $0x88] sm:$0xff] }
  0x1a   :  { %v3733_v32 = vld [vmem:[#allocation2 + $0xe8] sm:$0xff]  ;;  %v3722_v33 = vld [vmem:[#allocation2 + $0x90] sm:$0xff]  ;;  %v3735_v35 = vld [vmem:[#allocation2 + $0xf8] sm:$0xff] }
  0x1b   :  { %v3734_v34 = vld [vmem:[#allocation2 + $0xf0] sm:$0xff]  ;;  %v3713_v36 = vld [vmem:[#allocation2 + $0x48] sm:$0xff]  ;;  %v3712_v37 = vld [vmem:[#allocation2 + $0x40] sm:$0xff] }
  0x1c   :  { %402 = vmatpush.bf16.msra.mxu0 %v3740_v3  ;;  %3761 = vmatpush.bf16.msra.mxu1 %v3740_v3  ;;  %v4290_v38 = vld [vmem:[%s6279_s2] ss:$0 sm:$0xff]  ;;  %v4307_v0 = vld [vmem:[#allocation2 + $0x58] sm:$0xff]  ;;  %s4234_s2 = smov [#allocation9]  }
  0x1d   :  { %3763 = vmatpush.bf16.msra.mxu3 %v3740_v3  ;;  %3762 = vmatpush.bf16.msra.mxu2 %v3740_v3  ;;  %v4297_v43 = vld [vmem:[%s6280_s3] ss:$0 sm:$0xff]  ;;  %s3411_s3 = sshll.u32 %s4234_s2, 4  ;;  %s3412_s3 = int_to_ptr.vmem [resolvable:$true] %s3411_s3 }
  0x20   :  { %403 = vmatpush.bf16.msra.mxu0 %v3739_v4  ;;  %3764 = vmatpush.bf16.msra.mxu1 %v3739_v4 }
  0x21   :  { %3766 = vmatpush.bf16.msra.mxu3 %v3739_v4  ;;  %3765 = vmatpush.bf16.msra.mxu2 %v3739_v4 }
  0x24   :  { %404 = vmatpush.bf16.msra.mxu0 %v3738_v5  ;;  %3767 = vmatpush.bf16.msra.mxu1 %v3738_v5 }
  0x25   :  { %3769 = vmatpush.bf16.msra.mxu3 %v3738_v5  ;;  %3768 = vmatpush.bf16.msra.mxu2 %v3738_v5 }
  0x28   :  { %405 = vmatpush.bf16.msra.mxu0 %v3737_v6  ;;  %3770 = vmatpush.bf16.msra.mxu1 %v3737_v6 }
  0x29   :  { %3772 = vmatpush.bf16.msra.mxu3 %v3737_v6  ;;  %3771 = vmatpush.bf16.msra.mxu2 %v3737_v6 }
  0x2c   :  { %406 = vmatpush.bf16.msra.mxu0 %v3736_v7  ;;  %3773 = vmatpush.bf16.msra.mxu1 %v3736_v7 }
  0x2d   :  { %3775 = vmatpush.bf16.msra.mxu3 %v3736_v7  ;;  %3774 = vmatpush.bf16.msra.mxu2 %v3736_v7  ;;  %v3714_v7 = vld [vmem:[#allocation2 + $0x50] sm:$0xff] }
  0x2f   :  { %407 = vmatmul.bf16.vlgmr.msra.gmra.mxu0 %v3704_v8  ;;  %467 = vmatmul.bf16.vlgmr.msra.gmra.mxu1 %v3716_v9 }
  0x30   :  { %2475 = vmatpush.bf16.msrb.mxu1 %v3705_v12  ;;  %527 = vmatmul.bf16.vlgmr.msra.gmra.mxu3 %v3728_v10 }
  0x31   :  { %502 = vmatmul.bf16.vlgmr.msra.gmra.mxu2 %v3723_v11  ;;  %2575 = vmatpush.bf16.msrb.mxu3 %v3709_v21 }
  0x32   :  { %2525 = vmatpush.bf16.msrb.mxu2 %v3707_v13 }
  0x34   :  { %2476 = vmatpush.bf16.msrb.mxu1 %v3704_v8 }
  0x35   :  { %2576 = vmatpush.bf16.msrb.mxu3 %v3708_v22 }
  0x36   :  { %2526 = vmatpush.bf16.msrb.mxu2 %v3706_v14 }
  0x38   :  { %2625 = vmatpush.bf16.msra.mxu1 %v3711_v29 }
  0x39   :  { %2725 = vmatpush.bf16.msra.mxu3 %v4307_v0 }
  0x3a   :  { %2675 = vmatpush.bf16.msra.mxu2 %v3713_v36 }
  0x3c   :  { %2626 = vmatpush.bf16.msra.mxu1 %v3710_v30 }
  0x3d   :  { %2726 = vmatpush.bf16.msra.mxu3 %v3714_v7 }
  0x3e   :  { %2676 = vmatpush.bf16.msra.mxu2 %v3712_v37 }
  0x3f   :  { %412 = vmatmul.bf16.gmra.mxu0 %v3705_v12  ;;  %472 = vmatmul.bf16.gmra.mxu1 %v3717_v15 }
  0x40   :  { %532 = vmatmul.bf16.gmra.mxu3 %v3729_v17 }
  0x41   :  { %507 = vmatmul.bf16.gmra.mxu2 %v3724_v16 }
  0x4f   :  { %417 = vmatmul.bf16.gmra.mxu0 %v3706_v14  ;;  %477 = vmatmul.bf16.gmra.mxu1 %v3718_v18 }
  0x50   :  { %537 = vmatmul.bf16.gmra.mxu3 %v3730_v20 }
  0x51   :  { %512 = vmatmul.bf16.gmra.mxu2 %v3725_v19 }
  0x5f   :  { %422 = vmatmul.bf16.gmra.mxu0 %v3707_v13  ;;  %482 = vmatmul.bf16.gmra.mxu1 %v3719_v23 }
  0x60   :  { %542 = vmatmul.bf16.gmra.mxu3 %v3731_v25 }
  0x61   :  { %517 = vmatmul.bf16.gmra.mxu2 %v3726_v24 }
  0x6f   :  { %427 = vmatmul.bf16.gmra.mxu0 %v3708_v22  ;;  %487 = vmatmul.bf16.gmra.mxu1 %v3720_v26 }
  0x70   :  { %547 = vmatmul.bf16.gmra.mxu3 %v3732_v27 }
  0x71   :  { %522 = vmatmul.bf16.gmra.mxu2 %v3727_v28 }
  0x7f   :  { %432 = vmatmul.bf16.gmra.mxu0 %v3709_v21  ;;  %492 = vmatmul.bf16.gmra.mxu1 %v3721_v31 }
  0x80   :  { %552 = vmatmul.bf16.gmra.mxu3 %v3733_v32 }
  0x8f   :  { %437 = vmatmul.bf16.gmra.mxu0 %v3710_v30  ;;  %497 = vmatmul.bf16.gmra.mxu1 %v3722_v33 }
  0x90   :  { %557 = vmatmul.bf16.gmra.mxu3 %v3734_v34 }
  0x9f   :  { %442 = vmatmul.bf16.gmra.mxu0 %v3711_v29 }
  0xa0   :  { %562 = vmatmul.bf16.gmra.mxu3 %v3735_v35 }
  0xac   :  { %v408_v39 = vpop.f32.mrf.mxu0  ;;  %v468_v40 = vpop.f32.mrf.mxu1 }
  0xad   :  { %v409_v41 = vadd.f32 %v4290_v38, %v408_v39  ;;  %v469_v42 = vadd.f32 %v4290_v38, %v468_v40 }
  0xaf   :  { %3792 = vtanh.f32 %v409_v41  ;;  %447 = vmatmul.bf16.gmra.mxu0 %v3712_v37 }
  0xb0   :  { %3794 = vtanh.f32 %v469_v42 }
  0xb3   :  { %v528_v44 = vpop.f32.mrf.mxu3 }
  0xb4   :  { %v503_v45 = vpop.f32.mrf.mxu2  ;;  %v410_v47 = vpop.f32.mrf.mxu0  ;;  %v529_v52 = vadd.f32 %v4290_v38, %v528_v44 }
  0xb5   :  { %v504_v46 = vadd.f32 %v4290_v38, %v503_v45  ;;  %v470_v48 = vpop.f32.mrf.mxu1  ;;  %v3793_v49 = vpop.eup %3792  ;;  %v411_v1 = vadd.f32 %v4290_v38, %v410_v47 }
  0xb6   :  { %v471_v50 = vadd.f32 %v4290_v38, %v470_v48  ;;  %v636_v51 = vmul.f32 %v3793_v49, %v4297_v43  ;;  %v3795_v53 = vpop.eup %3794 }
  0xb7   :  { %3796 = vtanh.f32 %v504_v46  ;;  %v660_v62 = vmul.f32 %v3795_v53, %v4297_v43 }
  0xb8   :  { %700 = vadd.xlane.f32.xlu0 %v636_v51  ;;  %3798 = vtanh.f32 %v471_v50 }
  0xb9   :  { %3800 = vtanh.f32 %v529_v52 }
  0xbb   :  { %v530_v54 = vpop.f32.mrf.mxu3 }
  0xbc   :  { %v505_v55 = vpop.f32.mrf.mxu2  ;;  %v531_v56 = vadd.f32 %v4290_v38, %v530_v54  ;;  %v413_v57 = vpop.f32.mrf.mxu0 }
  0xbd   :  { %v473_v58 = vpop.f32.mrf.mxu1  ;;  %v3797_v59 = vpop.eup %3796  ;;  %v414_v3 = vadd.f32 %v4290_v38, %v413_v57  ;;  %v506_v13 = vadd.f32 %v4290_v38, %v505_v55 }
  0xbe   :  { %v474_v60 = vadd.f32 %v4290_v38, %v473_v58  ;;  %v674_v61 = vmul.f32 %v3797_v59, %v4297_v43  ;;  %v3799_v63 = vpop.eup %3798  ;;  %3802 = vtanh.f32 %v531_v56 }
  0xbf   :  { %452 = vmatmul.bf16.gmra.mxu0 %v3713_v36  ;;  %v661_v2 = vmul.f32 %v3799_v63, %v4297_v43  ;;  %v3801_v4 = vpop.eup %3800 }
  0xc0   :  { %776 = vadd.xlane.f32.xlu2 %v674_v61  ;;  %748 = vadd.xlane.f32.xlu0 %v660_v62  ;;  %3804 = vtanh.f32 %v474_v60  ;;  %v684_v11 = vmul.f32 %v3801_v4, %v4297_v43 }
  0xc1   :  { %750 = vadd.xlane.f32.xlu1 %v661_v2  ;;  %3806 = vtanh.f32 %v411_v1 }
  0xc2   :  { %3808 = vtanh.f32 %v414_v3 }
  0xc3   :  { %v533_v6 = vpop.f32.mrf.mxu3 }
  0xc4   :  { %v508_v5 = vpop.f32.mrf.mxu2  ;;  %v534_v8 = vadd.f32 %v4290_v38, %v533_v6  ;;  %v415_v9 = vpop.f32.mrf.mxu0 }
  0xc5   :  { %v3803_v10 = vpop.eup %3802  ;;  %v509_v16 = vadd.f32 %v4290_v38, %v508_v5  ;;  %v475_v24 = vpop.f32.mrf.mxu1  ;;  %v416_v32 = vadd.f32 %v4290_v38, %v415_v9 }
  0xc6   :  { %v3805_v12 = vpop.eup %3804  ;;  %3810 = vtanh.f32 %v534_v8  ;;  %v685_v15 = vmul.f32 %v3803_v10, %v4297_v43  ;;  %v476_v28 = vadd.f32 %v4290_v38, %v475_v24 }
  0xc7   :  { %v662_v14 = vmul.f32 %v3805_v12, %v4297_v43  ;;  %v3807_v17 = vpop.eup %3806  ;;  %3812 = vtanh.f32 %v506_v13 }
  0xc8   :  { %796 = vadd.xlane.f32.xlu0 %v684_v11  ;;  %v3809_v18 = vpop.eup %3808  ;;  %3814 = vtanh.f32 %v509_v16  ;;  %v637_v27 = vmul.f32 %v3807_v17, %v4297_v43 }
  0xc9   :  { %752 = vadd.xlane.f32.xlu2 %v662_v14  ;;  %798 = vadd.xlane.f32.xlu1 %v685_v15  ;;  %v638_v26 = vmul.f32 %v3809_v18, %v4297_v43 }
  0xcb   :  { %v535_v20 = vpop.f32.mrf.mxu3 }
  0xcc   :  { %v510_v19 = vpop.f32.mrf.mxu2  ;;  %v418_v22 = vpop.f32.mrf.mxu0  ;;  %v536_v41 = vadd.f32 %v4290_v38, %v535_v20 }
  0xcd   :  { %v511_v21 = vadd.f32 %v4290_v38, %v510_v19  ;;  %v3811_v23 = vpop.eup %3810  ;;  %v419_v29 = vadd.f32 %v4290_v38, %v418_v22  ;;  %v478_v40 = vpop.f32.mrf.mxu1 }
  0xce   :  { %v686_v25 = vmul.f32 %v3811_v23, %v4297_v43  ;;  %v3813_v30 = vpop.eup %3812  ;;  %v479_v42 = vadd.f32 %v4290_v38, %v478_v40 }
  0xcf   :  { %3816 = vtanh.f32 %v511_v21  ;;  %457 = vmatmul.bf16.gmra.mxu0 %v3714_v7  ;;  %v3815_v31 = vpop.eup %3814  ;;  %v675_v39 = vmul.f32 %v3813_v30, %v4297_v43 }
  0xd0   :  { %702 = vadd.xlane.f32.xlu0 %v637_v27  ;;  %3818 = vtanh.f32 %v476_v28  ;;  %v676_v37 = vmul.f32 %v3815_v31, %v4297_v43 }
  0xd1   :  { %800 = vadd.xlane.f32.xlu2 %v686_v25  ;;  %704 = vadd.xlane.f32.xlu1 %v638_v26  ;;  %3820 = vtanh.f32 %v419_v29 }
  0xd2   :  { %3822 = vtanh.f32 %v416_v32 }
  0xd3   :  { %v538_v33 = vpop.f32.mrf.mxu3  ;;  %3824 = vtanh.f32 %v536_v41 }
  0xd4   :  { %v420_v35 = vpop.f32.mrf.mxu0  ;;  %3826 = vtanh.f32 %v479_v42  ;;  %v513_v49 = vpop.f32.mrf.mxu2  ;;  %v539_v57 = vadd.f32 %v4290_v38, %v538_v33 }
  0xd5   :  { %v3817_v34 = vpop.eup %3816  ;;  %v421_v44 = vadd.f32 %v4290_v38, %v420_v35  ;;  %v514_v53 = vadd.f32 %v4290_v38, %v513_v49  ;;  %v480_v55 = vpop.f32.mrf.mxu1 }
  0xd6   :  { %v677_v36 = vmul.f32 %v3817_v34, %v4297_v43  ;;  %v3819_v45 = vpop.eup %3818  ;;  %v481_v60 = vadd.f32 %v4290_v38, %v480_v55 }
  0xd7   :  { %v3821_v46 = vpop.eup %3820  ;;  %3828 = vtanh.f32 %v421_v44  ;;  %v663_v52 = vmul.f32 %v3819_v45, %v4297_v43 }
  0xd8   :  { %778 = vadd.xlane.f32.xlu0 %v675_v39  ;;  %v3823_v50 = vpop.eup %3822  ;;  %v640_v51 = vmul.f32 %v3821_v46, %v4297_v43  ;;  %3830 = vtanh.f32 %v514_v53 }
  0xd9   :  { %782 = vadd.xlane.f32.xlu2 %v677_v36  ;;  %780 = vadd.xlane.f32.xlu1 %v676_v37  ;;  %v639_v54 = vmul.f32 %v3823_v50, %v4297_v43  ;;  %v3825_v56 = vpop.eup %3824  ;;  %3832 = vtanh.f32 %v539_v57 }
  0xda   :  { %v3827_v58 = vpop.eup %3826  ;;  %v687_v2 = vmul.f32 %v3825_v56, %v4297_v43  ;;  %3834 = vtanh.f32 %v481_v60 }
  0xdb   :  { %v540_v47 = vpop.f32.mrf.mxu3  ;;  %v664_v1 = vmul.f32 %v3827_v58, %v4297_v43 }
  0xdc   :  { %v423_v48 = vpop.f32.mrf.mxu0  ;;  %v515_v63 = vpop.f32.mrf.mxu2  ;;  %v541_v7 = vadd.f32 %v4290_v38, %v540_v47 }
  0xdd   :  { %v3829_v59 = vpop.eup %3828  ;;  %v424_v3 = vadd.f32 %v4290_v38, %v423_v48  ;;  %v516_v5 = vadd.f32 %v4290_v38, %v515_v63  ;;  %v483_v8 = vpop.f32.mrf.mxu1 }
  0xde   :  { %v3831_v4 = vpop.eup %3830  ;;  %v484_v15 = vadd.f32 %v4290_v38, %v483_v8 }
  0xdf   :  { %462 = vmatmul.bf16.gmra.mxu0 %v4307_v0  ;;  %v641_v0 = vmul.f32 %v3829_v59, %v4297_v43  ;;  %v3833_v6 = vpop.eup %3832  ;;  %3836 = vtanh.f32 %v424_v3  ;;  %v678_v10 = vmul.f32 %v3831_v4, %v4297_v43 }
  0xe0   :  { %754 = vadd.xlane.f32.xlu0 %v663_v52  ;;  %v3835_v12 = vpop.eup %3834  ;;  %3838 = vtanh.f32 %v516_v5  ;;  %v688_v13 = vmul.f32 %v3833_v6, %v4297_v43 }
  0xe1   :  { %708 = vadd.xlane.f32.xlu2 %v640_v51  ;;  %706 = vadd.xlane.f32.xlu1 %v639_v54  ;;  %3840 = vtanh.f32 %v541_v7  ;;  %v665_v16 = vmul.f32 %v3835_v12, %v4297_v43 }
  0xe2   :  { %3842 = vtanh.f32 %v484_v15 }
  0xe3   :  { %v543_v61 = vpop.f32.mrf.mxu3 }
  0xe4   :  { %v425_v62 = vpop.f32.mrf.mxu0  ;;  %v518_v14 = vpop.f32.mrf.mxu2  ;;  %v544_v26 = vadd.f32 %v4290_v38, %v543_v61 }
  0xe5   :  { %v3837_v17 = vpop.eup %3836  ;;  %v519_v18 = vadd.f32 %v4290_v38, %v518_v14  ;;  %v426_v19 = vadd.f32 %v4290_v38, %v425_v62  ;;  %v485_v24 = vpop.f32.mrf.mxu1 }
  0xe6   :  { %v3839_v20 = vpop.eup %3838  ;;  %v642_v22 = vmul.f32 %v3837_v17, %v4297_v43  ;;  %v486_v32 = vadd.f32 %v4290_v38, %v485_v24 }
  0xe7   :  { %v3841_v23 = vpop.eup %3840  ;;  %3844 = vtanh.f32 %v519_v18  ;;  %v679_v28 = vmul.f32 %v3839_v20, %v4297_v43 }
  0xe8   :  { %802 = vadd.xlane.f32.xlu0 %v687_v2  ;;  %3846 = vtanh.f32 %v426_v19  ;;  %v689_v27 = vmul.f32 %v3841_v23, %v4297_v43  ;;  %v3843_v29 = vpop.eup %3842 }
  0xe9   :  { %710 = vadd.xlane.f32.xlu2 %v641_v0  ;;  %756 = vadd.xlane.f32.xlu1 %v664_v1  ;;  %3848 = vtanh.f32 %v544_v26  ;;  %v666_v34 = vmul.f32 %v3843_v29, %v4297_v43 }
  0xeb   :  { %v545_v11 = vpop.f32.mrf.mxu3 }
  0xec   :  { %v428_v9 = vpop.f32.mrf.mxu0  ;;  %v520_v36 = vpop.f32.mrf.mxu2  ;;  %v546_v47 = vadd.f32 %v4290_v38, %v545_v11 }
  0xed   :  { %v429_v30 = vadd.f32 %v4290_v38, %v428_v9  ;;  %v3845_v31 = vpop.eup %3844  ;;  %v488_v39 = vpop.f32.mrf.mxu1  ;;  %v521_v40 = vadd.f32 %v4290_v38, %v520_v36 }
  0xee   :  { %v3847_v35 = vpop.eup %3846  ;;  %v680_v37 = vmul.f32 %v3845_v31, %v4297_v43  ;;  %v489_v45 = vadd.f32 %v4290_v38, %v488_v39 }
  0xef   :  { %3850 = vtanh.f32 %v429_v30  ;;  %v643_v41 = vmul.f32 %v3847_v35, %v4297_v43  ;;  %v3849_v44 = vpop.eup %3848 }
  0xf0   :  { %784 = vadd.xlane.f32.xlu0 %v678_v10  ;;  %3852 = vtanh.f32 %v486_v32  ;;  %v690_v49 = vmul.f32 %v3849_v44, %v4297_v43 }
  0xf1   :  { %758 = vadd.xlane.f32.xlu2 %v665_v16  ;;  %804 = vadd.xlane.f32.xlu1 %v688_v13  ;;  %3854 = vtanh.f32 %v521_v40 }
  0xf2   :  { %3856 = vtanh.f32 %v489_v45 }
  0xf3   :  { %v548_v25 = vpop.f32.mrf.mxu3  ;;  %3858 = vtanh.f32 %v546_v47 }
  0xf4   :  { %v430_v21 = vpop.f32.mrf.mxu0  ;;  %v523_v52 = vpop.f32.mrf.mxu2  ;;  %v549_v53 = vadd.f32 %v4290_v38, %v548_v25 }
  0xf5   :  { %v3851_v46 = vpop.eup %3850  ;;  %v431_v54 = vadd.f32 %v4290_v38, %v430_v21  ;;  %v490_v56 = vpop.f32.mrf.mxu1  ;;  %v524_v57 = vadd.f32 %v4290_v38, %v523_v52 }
  0xf6   :  { %v3853_v50 = vpop.eup %3852  ;;  %v644_v51 = vmul.f32 %v3851_v46, %v4297_v43  ;;  %3860 = vtanh.f32 %v549_v53  ;;  %v491_v1 = vadd.f32 %v4290_v38, %v490_v56 }
  0xf7   :  { %v667_v55 = vmul.f32 %v3853_v50, %v4297_v43  ;;  %v3855_v58 = vpop.eup %3854  ;;  %3862 = vtanh.f32 %v431_v54 }
  0xf8   :  { %712 = vadd.xlane.f32.xlu0 %v642_v22  ;;  %v3857_v60 = vpop.eup %3856  ;;  %3864 = vtanh.f32 %v524_v57  ;;  %v681_v0 = vmul.f32 %v3855_v58, %v4297_v43 }
  0xf9   :  { %806 = vadd.xlane.f32.xlu2 %v689_v27  ;;  %786 = vadd.xlane.f32.xlu1 %v679_v28  ;;  %v3859_v62 = vpop.eup %3858  ;;  %v668_v63 = vmul.f32 %v3857_v60, %v4297_v43  ;;  %3866 = vtanh.f32 %v491_v1 }
  0xfa   :  { %v691_v2 = vmul.f32 %v3859_v62, %v4297_v43 }
  0xfb   :  { %v550_v42 = vpop.f32.mrf.mxu3 }
  0xfc   :  { %v433_v33 = vpop.f32.mrf.mxu0  ;;  %v525_v3 = vpop.f32.mrf.mxu2  ;;  %v551_v15 = vadd.f32 %v4290_v38, %v550_v42 }
  0xfd   :  { %v3861_v4 = vpop.eup %3860  ;;  %v434_v5 = vadd.f32 %v4290_v38, %v433_v33  ;;  %v493_v7 = vpop.f32.mrf.mxu1  ;;  %v526_v9 = vadd.f32 %v4290_v38, %v525_v3 }
  0xfe   :  { %v3863_v6 = vpop.eup %3862  ;;  %v692_v12 = vmul.f32 %v3861_v4, %v4297_v43  ;;  %v494_v16 = vadd.f32 %v4290_v38, %v493_v7 }
  0xff   :  { %v3865_v8 = vpop.eup %3864  ;;  %3868 = vtanh.f32 %v434_v5  ;;  %v645_v14 = vmul.f32 %v3863_v6, %v4297_v43 }
 0x100   :  { %760 = vadd.xlane.f32.xlu0 %v666_v34  ;;  %v682_v13 = vmul.f32 %v3865_v8, %v4297_v43  ;;  %3870 = vtanh.f32 %v526_v9  ;;  %v3867_v17 = vpop.eup %3866 }
 0x101   :  { %788 = vadd.xlane.f32.xlu2 %v680_v37  ;;  %714 = vadd.xlane.f32.xlu1 %v643_v41  ;;  %3872 = vtanh.f32 %v551_v15  ;;  %v669_v24 = vmul.f32 %v3867_v17, %v4297_v43 }
 0x102   :  { %3874 = vtanh.f32 %v494_v16 }
 0x103   :  { %v553_v59 = vpop.f32.mrf.mxu3 }
 0x104   :  { %v435_v48 = vpop.f32.mrf.mxu0  ;;  %v554_v29 = vadd.f32 %v4290_v38, %v553_v59 }
 0x105   :  { %v3869_v18 = vpop.eup %3868  ;;  %v436_v19 = vadd.f32 %v4290_v38, %v435_v48  ;;  %v495_v21 = vpop.f32.mrf.mxu1 }
 0x106   :  { %v3871_v22 = vpop.eup %3870  ;;  %v646_v23 = vmul.f32 %v3869_v18, %v4297_v43  ;;  %v496_v31 = vadd.f32 %v4290_v38, %v495_v21 }
 0x107   :  { %3876 = vtanh.f32 %v436_v19  ;;  %v683_v27 = vmul.f32 %v3871_v22, %v4297_v43  ;;  %v3873_v28 = vpop.eup %3872 }
 0x108   :  { %808 = vadd.xlane.f32.xlu0 %v690_v49  ;;  %v3875_v30 = vpop.eup %3874  ;;  %v693_v36 = vmul.f32 %v3873_v28, %v4297_v43 }
 0x109   :  { %716 = vadd.xlane.f32.xlu2 %v644_v51  ;;  %762 = vadd.xlane.f32.xlu1 %v667_v55  ;;  %v670_v35 = vmul.f32 %v3875_v30, %v4297_v43 }
 0x10b   :  { %v555_v11 = vpop.f32.mrf.mxu3 }
 0x10c   :  { %v438_v61 = vpop.f32.mrf.mxu0  ;;  %v556_v42 = vadd.f32 %v4290_v38, %v555_v11 }
 0x10d   :  { %v439_v26 = vadd.f32 %v4290_v38, %v438_v61  ;;  %v3877_v33 = vpop.eup %3876  ;;  %v498_v34 = vpop.f32.mrf.mxu1 }
 0x10e   :  { %v499_v37 = vadd.f32 %v4290_v38, %v498_v34  ;;  %v647_v39 = vmul.f32 %v3877_v33, %v4297_v43 }
 0x10f   :  { %3878 = vtanh.f32 %v439_v26 }
 0x110   :  { %790 = vadd.xlane.f32.xlu0 %v681_v0  ;;  %3880 = vtanh.f32 %v554_v29 }
 0x111   :  { %764 = vadd.xlane.f32.xlu2 %v668_v63  ;;  %810 = vadd.xlane.f32.xlu1 %v691_v2  ;;  %3882 = vtanh.f32 %v496_v31 }
 0x112   :  { %3884 = vtanh.f32 %v499_v37 }
 0x113   :  { %v558_v25 = vpop.f32.mrf.mxu3  ;;  %3886 = vtanh.f32 %v556_v42 }
 0x114   :  { %v440_v10 = vpop.f32.mrf.mxu0  ;;  %v559_v50 = vadd.f32 %v4290_v38, %v558_v25 }
 0x115   :  { %v3879_v41 = vpop.eup %3878  ;;  %v441_v44 = vadd.f32 %v4290_v38, %v440_v10  ;;  %v500_v51 = vpop.f32.mrf.mxu1 }
 0x116   :  { %v3881_v46 = vpop.eup %3880  ;;  %v648_v48 = vmul.f32 %v3879_v41, %v4297_v43  ;;  %v501_v57 = vadd.f32 %v4290_v38, %v500_v51 }
 0x117   :  { %v3883_v49 = vpop.eup %3882  ;;  %3888 = vtanh.f32 %v441_v44  ;;  %v694_v53 = vmul.f32 %v3881_v46, %v4297_v43 }
 0x118   :  { %718 = vadd.xlane.f32.xlu0 %v645_v14  ;;  %v671_v52 = vmul.f32 %v3883_v49, %v4297_v43  ;;  %v3885_v54 = vpop.eup %3884  ;;  %3890 = vtanh.f32 %v559_v50 }
 0x119   :  { %812 = vadd.xlane.f32.xlu2 %v692_v12  ;;  %792 = vadd.xlane.f32.xlu1 %v682_v13  ;;  %v3887_v60 = vpop.eup %3886  ;;  %v672_v62 = vmul.f32 %v3885_v54, %v4297_v43 }
 0x11a   :  { %v695_v2 = vmul.f32 %v3887_v60, %v4297_v43 }
 0x11b   :  { %v560_v40 = vpop.f32.mrf.mxu3 }
 0x11c   :  { %v443_v20 = vpop.f32.mrf.mxu0  ;;  %v561_v7 = vadd.f32 %v4290_v38, %v560_v40 }
 0x11d   :  { %v444_v55 = vadd.f32 %v4290_v38, %v443_v20  ;;  %v3889_v63 = vpop.eup %3888 }
 0x11e   :  { %v649_v3 = vmul.f32 %v3889_v63, %v4297_v43  ;;  %v3891_v5 = vpop.eup %3890 }
 0x11f   :  { %3892 = vtanh.f32 %v444_v55  ;;  %v696_v15 = vmul.f32 %v3891_v5, %v4297_v43 }
 0x120   :  { %766 = vadd.xlane.f32.xlu0 %v669_v24  ;;  %3894 = vtanh.f32 %v501_v57 }
 0x121   :  { %794 = vadd.xlane.f32.xlu2 %v683_v27  ;;  %720 = vadd.xlane.f32.xlu1 %v646_v23 }
 0x123   :  { %v563_v56 = vpop.f32.mrf.mxu3 }
 0x124   :  { %v445_v32 = vpop.f32.mrf.mxu0  ;;  %v564_v1 = vadd.f32 %v4290_v38, %v563_v56 }
 0x125   :  { %v446_v4 = vadd.f32 %v4290_v38, %v445_v32  ;;  %v3893_v6 = vpop.eup %3892 }
 0x126   :  { %3896 = vtanh.f32 %v564_v1  ;;  %v3895_v11 = vpop.eup %3894  ;;  %v650_v14 = vmul.f32 %v3893_v6, %v4297_v43 }
 0x127   :  { %3898 = vtanh.f32 %v446_v4  ;;  %v673_v18 = vmul.f32 %v3895_v11, %v4297_v43 }
 0x128   :  { %814 = vadd.xlane.f32.xlu0 %v693_v36  ;;  %3900 = vtanh.f32 %v561_v7 }
 0x129   :  { %722 = vadd.xlane.f32.xlu2 %v647_v39  ;;  %768 = vadd.xlane.f32.xlu1 %v670_v35 }
 0x12b   :  { %v4393_v45 = vpop.xlane.xlu0 %700  ;;  %v565_v10 = vpop.f32.mrf.mxu3 }
 0x12c   :  { %v448_v47 = vpop.f32.mrf.mxu0  ;;  %v566_v16 = vadd.f32 %v4290_v38, %v565_v10  ;;  %v3897_v20 = vpop.eup %3896 }
 0x12d   :  { %v449_v17 = vadd.f32 %v4290_v38, %v448_v47  ;;  %v3899_v21 = vpop.eup %3898  ;;  %v698_v27 = vmul.f32 %v3897_v20, %v4297_v43 }
 0x12e   :  { %3902 = vtanh.f32 %v566_v16  ;;  %v3901_v24 = vpop.eup %3900  ;;  %v651_v28 = vmul.f32 %v3899_v21, %v4297_v43 }
 0x12f   :  { %3904 = vtanh.f32 %v449_v17  ;;  %v697_v30 = vmul.f32 %v3901_v24, %v4297_v43 }
 0x130   :  { %724 = vadd.xlane.f32.xlu0 %v648_v48 }
 0x131   :  { %770 = vadd.xlane.f32.xlu2 %v671_v52  ;;  %816 = vadd.xlane.f32.xlu1 %v694_v53 }
 0x133   :  { %v4401_v58 = vpop.xlane.xlu2 %776  ;;  %v4403_v59 = vpop.xlane.xlu0 %748 }
 0x134   :  { %6363 = vst [vmem:[#allocation15_spill] sm:$0xff] %v4401_v58  ;;  %v450_v61 = vpop.f32.mrf.mxu0  ;;  %v4406_v0 = vpop.xlane.xlu1 %750 }
 0x135   :  { %6364 = vst [vmem:[#allocation16_spill] sm:$0xff] %v4403_v59  ;;  %v451_v19 = vadd.f32 %v4290_v38, %v450_v61  ;;  %v3903_v31 = vpop.eup %3902 }
 0x136   :  { %6365 = vst [vmem:[#allocation17_spill] sm:$0xff] %v4406_v0  ;;  %v3905_v33 = vpop.eup %3904  ;;  %v699_v41 = vmul.f32 %v3903_v31, %v4297_v43 }
 0x137   :  { %3906 = vtanh.f32 %v451_v19  ;;  %v652_v42 = vmul.f32 %v3905_v33, %v4297_v43 }
 0x138   :  { %772 = vadd.xlane.f32.xlu0 %v672_v62 }
 0x139   :  { %818 = vadd.xlane.f32.xlu2 %v695_v2  ;;  %726 = vadd.xlane.f32.xlu1 %v649_v3 }
 0x13b   :  { %v4413_v8 = vpop.xlane.xlu0 %796 }
 0x13c   :  { %6366 = vst [vmem:[#allocation18_spill] sm:$0xff] %v4413_v8  ;;  %v453_v9 = vpop.f32.mrf.mxu0  ;;  %v4415_v12 = vpop.xlane.xlu2 %752 }
 0x13d   :  { %v4417_v13 = vpop.xlane.xlu1 %798  ;;  %v454_v29 = vadd.f32 %v4290_v38, %v453_v9  ;;  %v3907_v34 = vpop.eup %3906 }
 0x13e   :  { %6367 = vst [vmem:[#allocation19_spill] sm:$0xff] %v4417_v13  ;;  %v653_v44 = vmul.f32 %v3907_v34, %v4297_v43 }
 0x13f   :  { %3908 = vtanh.f32 %v454_v29 }
 0x140   :  { %820 = vadd.xlane.f32.xlu0 %v696_v15 }
 0x141   :  { %728 = vadd.xlane.f32.xlu2 %v650_v14  ;;  %774 = vadd.xlane.f32.xlu1 %v673_v18 }
 0x143   :  { %v4425_v22 = vpop.xlane.xlu0 %702 }
 0x144   :  { %v455_v23 = vpop.f32.mrf.mxu0  ;;  %v4427_v25 = vpop.xlane.xlu2 %800 }
 0x145   :  { %6368 = vst [vmem:[#allocation20_spill] sm:$0xff] %v4427_v25  ;;  %v4429_v26 = vpop.xlane.xlu1 %704  ;;  %v456_v32 = vadd.f32 %v4290_v38, %v455_v23  ;;  %v3909_v46 = vpop.eup %3908 }
 0x146   :  { %v654_v50 = vmul.f32 %v3909_v46, %v4297_v43  ;;  %v892_v46 = vlaneseq }
 0x147   :  { %3910 = vtanh.f32 %v456_v32 }
 0x148   :  { %730 = vadd.xlane.f32.xlu0 %v651_v28 }
 0x149   :  { %824 = vadd.xlane.f32.xlu2 %v698_v27  ;;  %822 = vadd.xlane.f32.xlu1 %v697_v30 }
 0x14b   :  { %v4436_v35 = vpop.xlane.xlu0 %778 }
 0x14c   :  { %6369 = vst [vmem:[#allocation21_spill] sm:$0xff] %v4436_v35  ;;  %v458_v36 = vpop.f32.mrf.mxu0  ;;  %v4438_v37 = vpop.xlane.xlu2 %782 }
 0x14d   :  { %6370 = vst [vmem:[#allocation22_spill] sm:$0xff] %v4438_v37  ;;  %v4440_v39 = vpop.xlane.xlu1 %780  ;;  %v459_v40 = vadd.f32 %v4290_v38, %v458_v36  ;;  %v3911_v47 = vpop.eup %3910 }
 0x14e   :  { %6371 = vst [vmem:[#allocation23_spill] sm:$0xff] %v4440_v39  ;;  %v655_v55 = vmul.f32 %v3911_v47, %v4297_v43 }
 0x14f   :  { %3912 = vtanh.f32 %v459_v40 }
 0x150   :  { %826 = vadd.xlane.f32.xlu0 %v699_v41 }
 0x151   :  { %732 = vadd.xlane.f32.xlu1 %v652_v42  ;;  %734 = vadd.xlane.f32.xlu2 %v653_v44 }
 0x153   :  { %v4446_v48 = vpop.xlane.xlu0 %754 }
 0x154   :  { %v460_v49 = vpop.f32.mrf.mxu0  ;;  %v4449_v52 = vpop.xlane.xlu2 %708 }
 0x155   :  { %v3913_v51 = vpop.eup %3912  ;;  %v4451_v53 = vpop.xlane.xlu1 %706  ;;  %v461_v54 = vadd.f32 %v4290_v38, %v460_v49  ;;  %v4523_v49 = vand.u32 127, %v892_v46 }
 0x156   :  { %v656_v56 = vmul.f32 %v3913_v51, %v4297_v43 }
 0x157   :  { %3914 = vtanh.f32 %v461_v54  ;;  %v4530_v54 = vadd.s32 4294967280, %v4523_v49 }
 0x158   :  { %736 = vadd.xlane.f32.xlu0 %v654_v50 }
 0x159   :  { %738 = vadd.xlane.f32.xlu1 %v655_v55  ;;  %740 = vadd.xlane.f32.xlu2 %v656_v56  ;;  %v4533_v55 = vadd.s32 4294967288, %v4523_v49  ;;  %v4536_v56 = vadd.s32 4294967272, %v4523_v49 }
 0x15b   :  { %v4456_v57 = vpop.xlane.xlu0 %802 }
 0x15c   :  { %6372 = vst [vmem:[#allocation24_spill] sm:$0xff] %v4456_v57  ;;  %v463_v60 = vpop.f32.mrf.mxu0  ;;  %v4458_v62 = vpop.xlane.xlu2 %710 }
 0x15d   :  { %v3915_v61 = vpop.eup %3914  ;;  %v4460_v63 = vpop.xlane.xlu1 %756  ;;  %v464_v1 = vadd.f32 %v4290_v38, %v463_v60  ;;  %v971_v60 = vperm.slane %v4438_v37, %v4533_v55 }
 0x15e   :  { %v657_v2 = vmul.f32 %v3915_v61, %v4297_v43  ;;  %v970_v61 = vperm.slane %v4440_v39, %v4523_v49 }
 0x15f   :  { %3916 = vtanh.f32 %v464_v1  ;;  %v966_v1 = vperm.slane %v4401_v58, %v4530_v54 }
 0x160   :  { %742 = vadd.xlane.f32.xlu0 %v657_v2  ;;  %v984_v2 = vperm.slane %v4413_v8, %v4523_v49 }
 0x163   :  { %v4464_v3 = vpop.xlane.xlu0 %784 }
 0x164   :  { %6373 = vst [vmem:[#allocation25_spill] sm:$0xff] %v4464_v3  ;;  %v465_v4 = vpop.f32.mrf.mxu0  ;;  %v4466_v6 = vpop.xlane.xlu2 %758  ;;  %v973_v46 = vperm.slane %v4464_v3, %v4530_v54 }
 0x165   :  { %v3917_v5 = vpop.eup %3916  ;;  %v4468_v7 = vpop.xlane.xlu1 %804  ;;  %v466_v9 = vadd.f32 %v4290_v38, %v465_v4 }
 0x166   :  { %v658_v10 = vmul.f32 %v3917_v5, %v4297_v43  ;;  %v985_v5 = vperm.slane %v4417_v13, %v4533_v55 }
 0x167   :  { %3918 = vtanh.f32 %v466_v9  ;;  %v987_v9 = vperm.slane %v4427_v25, %v4530_v54 }
 0x168   :  { %744 = vadd.xlane.f32.xlu1 %v658_v10  ;;  %v968_v10 = vperm.slane %v4436_v35, %v4536_v56 }
 0x16b   :  { %v4472_v11 = vpop.xlane.xlu0 %712 }
 0x16c   :  { %v4474_v15 = vpop.xlane.xlu2 %806 }
 0x16d   :  { %v3919_v14 = vpop.eup %3918  ;;  %v4476_v16 = vpop.xlane.xlu1 %786 }
 0x16e   :  { %6374 = vst [vmem:[#allocation26_spill] sm:$0xff] %v4476_v16  ;;  %v659_v17 = vmul.f32 %v3919_v14, %v4297_v43  ;;  %v975_v3 = vperm.slane %v4476_v16, %v4536_v56 }
 0x170   :  { %746 = vadd.xlane.f32.xlu2 %v659_v17  ;;  %v972_v17 = vsel %vm897_vm0, %v971_v60, %v970_v61 }
 0x173   :  { %v4479_v18 = vpop.xlane.xlu0 %760 }
 0x174   :  { %v4481_v19 = vpop.xlane.xlu2 %788 }
 0x175   :  { %6375 = vst [vmem:[#allocation27_spill] sm:$0xff] %v4481_v19  ;;  %v4483_v20 = vpop.xlane.xlu1 %714 }
 0x17b   :  { %v4485_v38 = vpop.xlane.xlu0 %808 }
 0x17c   :  { %v4487_v21 = vpop.xlane.xlu2 %716 }
 0x17d   :  { %v4489_v23 = vpop.xlane.xlu1 %762 }
 0x17e   :  { %6376 = vst [vmem:[#allocation28_spill] sm:$0xff] %v4489_v23 }
 0x183   :  { %v4491_v24 = vpop.xlane.xlu0 %790 }
 0x184   :  { %6377 = vst [vmem:[#allocation29_spill] sm:$0xff] %v4491_v24  ;;  %v4493_v27 = vpop.xlane.xlu2 %764  ;;  %v978_v8 = vperm.slane %v4491_v24, %v4533_v55  ;;  %v989_v24 = vperm.slane %v4456_v57, %v4536_v56  ;;  %v992_v57 = vperm.slane %v4474_v15, %v4533_v55 }
 0x185   :  { %6378 = vst [vmem:[#allocation30_spill] sm:$0xff] %v4493_v27  ;;  %v4495_v28 = vpop.xlane.xlu1 %810  ;;  %v956_v35 = vperm.slane %v4493_v27, %v4523_v49  ;;  %v974_v27 = vsel %vm901_vm1, %v973_v46, %v972_v17 }
 0x18b   :  { %v4497_v43 = vpop.xlane.xlu0 %718 }
 0x18c   :  { %6379 = vst [vmem:[#allocation31_spill] sm:$0xff] %v4497_v43  ;;  %v4499_v29 = vpop.xlane.xlu2 %812 }
 0x18d   :  { %v4501_v30 = vpop.xlane.xlu1 %792 }
 0x18e   :  { %6380 = vst [vmem:[#allocation32_spill] sm:$0xff] %v4501_v30  ;;  %v980_v39 = vperm.slane %v4501_v30, %v4530_v54 }
 0x193   :  { %v4503_v31 = vpop.xlane.xlu0 %766 }
 0x194   :  { %6381 = vst [vmem:[#allocation33_spill] sm:$0xff] %v4503_v31  ;;  %v4505_v32 = vpop.xlane.xlu2 %794  ;;  %v957_v14 = vperm.slane %v4503_v31, %v4533_v55  ;;  %v977_v31 = vperm.slane %v4481_v19, %v4523_v49 }
 0x195   :  { %v4507_v33 = vpop.xlane.xlu1 %720 }
 0x196   :  { %v979_v30 = vsel %vm897_vm0, %v978_v8, %v977_v31 }
 0x19b   :  { %v4509_v34 = vpop.xlane.xlu0 %814 }
 0x19c   :  { %v4511_v36 = vpop.xlane.xlu2 %722 }
 0x19d   :  { %6382 = vst [vmem:[#allocation34_spill] sm:$0xff] %v4511_v36  ;;  %v4513_v40 = vpop.xlane.xlu1 %768 }
 0x19e   :  { %6383 = vst [vmem:[#allocation35_spill] sm:$0xff] %v4513_v40  ;;  %v959_v13 = vperm.slane %v4513_v40, %v4530_v54 }
 0x1a3   :  { %v4515_v41 = vpop.xlane.xlu0 %724 }
 0x1a4   :  { %6384 = vst [vmem:[#allocation36_spill] sm:$0xff] %v4515_v41  ;;  %v4517_v42 = vpop.xlane.xlu2 %770 }
 0x1a5   :  { %6385 = vst [vmem:[#allocation37_spill] sm:$0xff] %v4517_v42  ;;  %v4519_v44 = vpop.xlane.xlu1 %816  ;;  %v961_v58 = vperm.slane %v4517_v42, %v4536_v56  ;;  %v982_v42 = vperm.slane %v4505_v32, %v4536_v56 }
 0x1ab   :  { %v4521_v47 = vpop.xlane.xlu0 %772 }
 0x1ac   :  { %6386 = vst [vmem:[#allocation38_spill] sm:$0xff] %v4521_v47  ;;  %v4525_v50 = vpop.xlane.xlu2 %818  ;;  %v963_v60 = vperm.slane %v4521_v47, %v4523_v49  ;;  %v958_v47 = vsel %vm897_vm0, %v957_v14, %v956_v35  ;;  %v976_v35 = vsel %vm905_vm2, %v975_v3, %v974_v27  ;;  %v981_v14 = vsel %vm901_vm1, %v980_v39, %v979_v30 }
 0x1ad   :  { %v4527_v51 = vpop.xlane.xlu1 %726  ;;  %v960_v16 = vsel %vm901_vm1, %v959_v13, %v958_v47  ;;  %v986_v13 = vsel %vm897_vm0, %v985_v5, %v984_v2  ;;  %v1001_v47 = vperm.slane %v4519_v44, %v4530_v54 }
 0x1ae   :  { %v962_v19 = vsel %vm905_vm2, %v961_v58, %v960_v16  ;;  %v991_v58 = vperm.slane %v4468_v7, %v4523_v49  ;;  %v994_v16 = vperm.slane %v4485_v38, %v4530_v54 }
 0x1b3   :  { %v4546_v4 = vpop.xlane.xlu0 %820 }
 0x1b4   :  { %v4563_v37 = vpop.xlane.xlu2 %728 }
 0x1b5   :  { %6387 = vst [vmem:[#allocation39_spill] sm:$0xff] %v4563_v37  ;;  %v4565_v25 = vpop.xlane.xlu1 %774 }
 0x1b6   :  { %6388 = vst [vmem:[#allocation40_spill] sm:$0xff] %v4565_v25  ;;  %v964_v61 = vperm.slane %v4565_v25, %v4533_v55 }
 0x1b8   :  { %v965_v25 = vsel %vm897_vm0, %v964_v61, %v963_v60 }
 0x1b9   :  { %v967_v40 = vsel %vm901_vm1, %v966_v1, %v965_v25  ;;  %v983_v25 = vsel %vm905_vm2, %v982_v42, %v981_v14  ;;  %v999_v42 = vperm.slane %v4509_v34, %v4533_v55  ;;  %v1005_v1 = vperm.slane %v4546_v4, %v4523_v49 }
 0x1ba   :  { %v969_v23 = vsel %vm905_vm2, %v968_v10, %v967_v40  ;;  %v993_v40 = vsel %vm897_vm0, %v992_v57, %v991_v58  ;;  %v1003_v57 = vperm.slane %v4525_v50, %v4536_v56 }
 0x1bb   :  { %v1026_v17 = vsel %vm1012_vm3, %v969_v23, %v962_v19  ;;  %v4598_v46 = vpop.xlane.xlu0 %730  ;;  %v988_v19 = vsel %vm901_vm1, %v987_v9, %v986_v13  ;;  %v996_v23 = vperm.slane %v4495_v28, %v4536_v56  ;;  %v995_v5 = vsel %vm901_vm1, %v994_v16, %v993_v40 }
 0x1bc   :  { %6389 = vst [vmem:[#allocation41_spill] sm:$0xff] %v4598_v46  ;;  %v1027_v8 = vsel %vm1014_vm5, %v976_v35, %v1026_v17  ;;  %v4613_v27 = vpop.xlane.xlu2 %824  ;;  %v990_v31 = vsel %vm905_vm2, %v989_v24, %v988_v19  ;;  %v998_v9 = vperm.slane %v4499_v29, %v4523_v49 }
 0x1bd   :  { %v4607_v3 = vpop.xlane.xlu1 %822  ;;  %v1028_v39 = vsel %vm1016_vm4, %v983_v25, %v1027_v8  ;;  %v1008_v24 = vperm.slane %v4613_v27, %v4530_v54  ;;  %v997_v10 = vsel %vm905_vm2, %v996_v23, %v995_v5  ;;  %v942_v5 = vperm.slane %v4403_v59, %v4523_v49 }
 0x1be   :  { %v1006_v30 = vperm.slane %v4607_v3, %v4533_v55  ;;  %v1029_v2 = vsel %vm1018_vm6, %v990_v31, %v1028_v39  ;;  %v1000_v61 = vsel %vm897_vm0, %v999_v42, %v998_v9  ;;  %v896_v42 = vperm.slane %v4425_v22, %v4533_v55 }
 0x1bf   :  { %v1030_v14 = vsel %vm1020_vm7, %v997_v10, %v1029_v2  ;;  %v1002_v17 = vsel %vm901_vm1, %v1001_v47, %v1000_v61  ;;  %v907_v47 = vperm.slane %v4449_v52, %v4523_v49  ;;  %v894_v2 = vperm.slane %v4393_v45, %v4523_v49 }
 0x1c0   :  { %v1007_v60 = vsel %vm897_vm0, %v1006_v30, %v1005_v1  ;;  %v1004_v25 = vsel %vm905_vm2, %v1003_v57, %v1002_v17  ;;  %v908_v1 = vperm.slane %v4458_v62, %v4533_v55  ;;  %v900_v61 = vperm.slane %v4429_v26, %v4530_v54 }
 0x1c1   :  { %v1009_v8 = vsel %vm901_vm1, %v1008_v24, %v1007_v60  ;;  %v1031_v16 = vsel %vm1022_vm8, %v1004_v25, %v1030_v14  ;;  %v943_v60 = vperm.slane %v4406_v0, %v4533_v55  ;;  %v898_v14 = vsel %vm897_vm0, %v896_v42, %v894_v2 }
 0x1c2   :  { %v910_v17 = vperm.slane %v4472_v11, %v4530_v54  ;;  %v912_v25 = vperm.slane %v4483_v20, %v4536_v56  ;;  %v919_v2 = vperm.slane %v4511_v36, %v4536_v56  ;;  %v924_v59 = vperm.slane %v4563_v37, %v4530_v54 }
 0x1c3   :  { %v4636_v35 = vpop.xlane.xlu0 %826  ;;  %v926_v0 = vperm.slane %v4598_v46, %v4536_v56  ;;  %v945_v46 = vperm.slane %v4415_v12, %v4530_v54 }
 0x1c4   :  { %v1010_v13 = vperm.slane %v4636_v35, %v4536_v56  ;;  %v4650_v30 = vpop.xlane.xlu2 %734 }
 0x1c5   :  { %v4648_v23 = vpop.xlane.xlu1 %732  ;;  %6390 = vst [vmem:[#allocation42_spill] sm:$0xff] %v4650_v30  ;;  %v929_v57 = vperm.slane %v4650_v30, %v4533_v55 }
 0x1c6   :  { %v1011_v58 = vsel %vm905_vm2, %v1010_v13, %v1009_v8  ;;  %v928_v9 = vperm.slane %v4648_v23, %v4523_v49  ;;  %v909_v13 = vsel %vm897_vm0, %v908_v1, %v907_v47  ;;  %v915_v8 = vperm.slane %v4497_v43, %v4533_v55 }
 0x1c7   :  { %v1032_v39 = vsel %vm6360_vm9, %v1011_v58, %v1031_v16  ;;  %v917_v58 = vperm.slane %v4507_v33, %v4530_v54  ;;  %v922_v16 = vperm.slane %v4527_v51, %v4533_v55  ;;  %v914_v1 = vperm.slane %v4487_v21, %v4523_v49 }
 0x1c8   :  { %v1039_v19 = vsel %vm1035_vm10, %v1032_v39, -inf  ;;  %v930_v30 = vsel %vm897_vm0, %v929_v57, %v928_v9 }
 0x1c9   :  { %1040 = vmax.xlane.f32.xlu2 %v1039_v19  ;;  %v916_v36 = vsel %vm897_vm0, %v915_v8, %v914_v1 }
 0x1ca   :  { %v918_v57 = vsel %vm901_vm1, %v917_v58, %v916_v36  ;;  %v947_v36 = vperm.slane %v4446_v48, %v4536_v56 }
 0x1cb   :  { %v4652_v31 = vpop.xlane.xlu0 %736 }
 0x1cc   :  { %6391 = vst [vmem:[#allocation43_spill] sm:$0xff] %v4652_v31  ;;  %v4670_v24 = vpop.xlane.xlu2 %740  ;;  %v931_v39 = vperm.slane %v4652_v31, %v4530_v54  ;;  %v904_v31 = vperm.slane %v4451_v53, %v4536_v56 }
 0x1cd   :  { %v4654_v40 = vpop.xlane.xlu1 %738  ;;  %6392 = vst [vmem:[#allocation44_spill] sm:$0xff] %v4670_v24  ;;  %v935_v19 = vperm.slane %v4670_v24, %v4523_v49  ;;  %v911_v24 = vsel %vm901_vm1, %v910_v17, %v909_v13 }
 0x1ce   :  { %v913_v43 = vsel %vm905_vm2, %v912_v25, %v911_v24  ;;  %v933_v37 = vperm.slane %v4654_v40, %v4536_v56  ;;  %v932_v13 = vsel %vm901_vm1, %v931_v39, %v930_v30  ;;  %v902_v24 = vsel %vm901_vm1, %v900_v61, %v898_v14  ;;  %v6394_v39 = vld [vmem:[#allocation28_spill] sm:$0xff] }
 0x1cf   :  { %v920_v25 = vsel %vm905_vm2, %v919_v2, %v918_v57  ;;  %v906_v1 = vsel %vm905_vm2, %v904_v31, %v902_v24  ;;  %v949_v31 = vperm.slane %v4460_v63, %v4523_v49 }
 0x1d0   :  { %v1013_v58 = vsel %vm1012_vm3, %v913_v43, %v906_v1  ;;  %v934_v61 = vsel %vm905_vm2, %v933_v37, %v932_v13  ;;  %v944_v43 = vsel %vm897_vm0, %v943_v60, %v942_v5 }
 0x1d1   :  { %v946_v37 = vsel %vm901_vm1, %v945_v46, %v944_v43  ;;  %v6398_v43 = vld [vmem:[#allocation40_spill] sm:$0xff] }
 0x1d3   :  { %v4672_v10 = vpop.xlane.xlu0 %742 }
 0x1d4   :  { %6393 = vst [vmem:[#allocation45_spill] sm:$0xff] %v4672_v10  ;;  %v936_v42 = vperm.slane %v4672_v10, %v4533_v55  ;;  %v921_v10 = vperm.slane %v4515_v41, %v4523_v49 }
 0x1d6   :  { %v923_v17 = vsel %vm897_vm0, %v922_v16, %v921_v10  ;;  %v937_v41 = vsel %vm897_vm0, %v936_v42, %v935_v19  ;;  %v950_v10 = vperm.slane %v4466_v6, %v4533_v55  ;;  %v952_v16 = vperm.slane %v4479_v18, %v4530_v54 }
 0x1d7   :  { %v925_v8 = vsel %vm901_vm1, %v924_v59, %v923_v17  ;;  %v954_v19 = vperm.slane %v6394_v39, %v4536_v56  ;;  %v1015_v42 = vsel %vm1014_vm5, %v920_v25, %v1013_v58  ;;  %v948_v17 = vsel %vm905_vm2, %v947_v36, %v946_v37  ;;  %v6396_v58 = vld [vmem:[#allocation30_spill] sm:$0xff]  ;;  %v6399_v37 = vld [vmem:[#allocation37_spill] sm:$0xff] }
 0x1d8   :  { %v927_v30 = vsel %vm905_vm2, %v926_v0, %v925_v8  ;;  %v4233_v8 = vmov 0  }
 0x1d9   :  { %v1017_v2 = vsel %vm1016_vm4, %v927_v30, %v1015_v42  ;;  %3788 = vset.pattern.permute.xlu0 %v4233_v8  ;;  %3787 = vset.pattern.permute.xlu1 %v4233_v8 }
 0x1da   :  { %v1019_v57 = vsel %vm1018_vm6, %v934_v61, %v1017_v2  ;;  %3786 = vset.pattern.permute.xlu2 %v4233_v8  ;;  %v6397_v61 = vld [vmem:[#allocation33_spill] sm:$0xff]  ;;  %v6401_v8 = vld [vmem:[#allocation23_spill] sm:$0xff] }
 0x1db   :  { %v4696_v47 = vpop.xlane.xlu1 %744 }
 0x1dc   :  { %v938_v9 = vperm.slane %v4696_v47, %v4530_v54 }
 0x1de   :  { %v939_v14 = vsel %vm901_vm1, %v938_v9, %v937_v41  ;;  %v951_v41 = vsel %vm897_vm0, %v950_v10, %v949_v31  ;;  %v6395_v10 = vld [vmem:[#allocation35_spill] sm:$0xff] }
 0x1df   :  { %v953_v13 = vsel %vm901_vm1, %v952_v16, %v951_v41 }
 0x1e0   :  { %v955_v25 = vsel %vm905_vm2, %v954_v19, %v953_v13 }
 0x1e3   :  { %v4738_v59 = vpop.xlane.xlu2 %746 }
 0x1e4   :  { %v940_v0 = vperm.slane %v4738_v59, %v4536_v56 }
 0x1e6   :  { %v941_v9 = vsel %vm905_vm2, %v940_v0, %v939_v14 }
 0x1e7   :  { %v1021_v24 = vsel %vm1020_vm7, %v941_v9, %v1019_v57  ;;  %v6400_v9 = vld [vmem:[#allocation38_spill] sm:$0xff] }
 0x1e8   :  { %v1023_v5 = vsel %vm1022_vm8, %v948_v17, %v1021_v24 }
 0x1e9   :  { %v1025_v60 = vsel %vm6360_vm9, %v955_v25, %v1023_v5 }
 0x1ea   :  { %v1036_v46 = vsel %vm1035_vm10, %v1025_v60, -inf }
 0x1eb   :  { %1037 = vmax.xlane.f32.xlu1 %v1036_v46 }
 0x23c   :  { %v4760_v1 = vpop.xlane.xlu2 %1040 }
 0x23d   :  { %v1052_v36 = vperm.slane %v4760_v1, 0  ;;  %v1053_v31 = vperm.slane %v4760_v1, 1  ;;  %v1054_v13 = vperm.slane %v4760_v1, 2 }
 0x23f   :  { %v1110_v30 = vsub.f32 %v6395_v10, %v1052_v36  ;;  %v1108_v16 = vsub.f32 %v6396_v58, %v1052_v36  ;;  %v1109_v14 = vsub.f32 %v6397_v61, %v1052_v36  ;;  %v1113_v2 = vsub.f32 %v6398_v43, %v1053_v31  ;;  %v6402_v10 = vld [vmem:[#allocation15_spill] sm:$0xff]  ;;  %v6403_v58 = vld [vmem:[#allocation21_spill] sm:$0xff] }
 0x240   :  { %v1111_v41 = vsub.f32 %v6399_v37, %v1052_v36  ;;  %v1112_v57 = vsub.f32 %v6400_v9, %v1053_v31  ;;  %v1116_v36 = vsub.f32 %v6401_v8, %v1054_v13  ;;  %v6406_v9 = vld [vmem:[#allocation25_spill] sm:$0xff] }
 0x241   :  { %v1208_v19 = vmul.f32 1.442695, %v1110_v30  ;;  %v1204_v42 = vmul.f32 1.442695, %v1108_v16  ;;  %v1206_v0 = vmul.f32 1.442695, %v1109_v14  ;;  %v1114_v30 = vsub.f32 %v6402_v10, %v1053_v31 }
 0x242   :  { %v1214_v17 = vmul.f32 1.442695, %v1113_v2  ;;  %v1210_v24 = vmul.f32 1.442695, %v1111_v41  ;;  %v1212_v5 = vmul.f32 1.442695, %v1112_v57  ;;  %v1115_v16 = vsub.f32 %v6403_v58, %v1053_v31 }
 0x243   :  { %3920 = vpow2.f32 %v1208_v19  ;;  %v1220_v61 = vmul.f32 1.442695, %v1116_v36  ;;  %v1216_v14 = vmul.f32 1.442695, %v1114_v30  ;;  %v6404_v2 = vld [vmem:[#allocation26_spill] sm:$0xff]  ;;  %v1118_v57 = vsub.f32 %v6406_v9, %v1054_v13  ;;  %v6409_v58 = vld [vmem:[#allocation32_spill] sm:$0xff] }
 0x244   :  { %3922 = vpow2.f32 %v1204_v42  ;;  %v1218_v42 = vmul.f32 1.442695, %v1115_v16  ;;  %v1119_v37 = vsub.f32 %v6404_v2, %v1054_v13  ;;  %v6405_v31 = vld [vmem:[#allocation22_spill] sm:$0xff] }
 0x245   :  { %3924 = vpow2.f32 %v1206_v0  ;;  %v1117_v41 = vsub.f32 %v6405_v31, %v1054_v13  ;;  %v1224_v36 = vmul.f32 1.442695, %v1118_v57  ;;  %v6410_v13 = vld [vmem:[#allocation27_spill] sm:$0xff] }
 0x246   :  { %3926 = vpow2.f32 %v1214_v17  ;;  %v1226_v17 = vmul.f32 1.442695, %v1119_v37  ;;  %v1056_v37 = vperm.slane %v4760_v1, 4 }
 0x247   :  { %3928 = vpow2.f32 %v1210_v24  ;;  %v1055_v24 = vperm.slane %v4760_v1, 3 }
 0x248   :  { %3930 = vpow2.f32 %v1212_v5  ;;  %v1222_v5 = vmul.f32 1.442695, %v1117_v41 }
 0x249   :  { %v4771_v25 = vpop.eup %3920  ;;  %3932 = vpow2.f32 %v1220_v61  ;;  %v1122_v16 = vsub.f32 %v6409_v58, %v1055_v24  ;;  %v1120_v61 = vsub.f32 %v6410_v13, %v1055_v24  ;;  %v1123_v58 = vsub.f32 %v4505_v32, %v1055_v24 }
 0x24a   :  { %v4773_v60 = vpop.eup %3922  ;;  %1435 = vperm.xlu0 %3788, %v4771_v25   ;;  %3934 = vpow2.f32 %v1216_v14  ;;  %v6411_v14 = vld [vmem:[#allocation29_spill] sm:$0xff] }
 0x24b   :  { %v4776_v46 = vpop.eup %3924  ;;  %1429 = vperm.xlu2 %3786, %v4773_v60   ;;  %3936 = vpow2.f32 %v1218_v42  ;;  %v1121_v42 = vsub.f32 %v6411_v14, %v1055_v24  ;;  %v1232_v2 = vmul.f32 1.442695, %v1122_v16  ;;  %v1228_v31 = vmul.f32 1.442695, %v1120_v61  ;;  %v6414_v16 = vld [vmem:[#allocation18_spill] sm:$0xff]  ;;  %v6416_v24 = vld [vmem:[#allocation20_spill] sm:$0xff] }
 0x24c   :  { %1432 = vperm.xlu1 %3787, %v4776_v46   ;;  %v4783_v19 = vpop.eup %3926  ;;  %3938 = vpow2.f32 %v1226_v17  ;;  %v1124_v13 = vsub.f32 %v6414_v16, %v1056_v37  ;;  %v1057_v14 = vperm.slane %v4760_v1, 5 }
 0x24d   :  { %v4785_v0 = vpop.eup %3928  ;;  %3940 = vpow2.f32 %v1222_v5  ;;  %v1230_v9 = vmul.f32 1.442695, %v1121_v42  ;;  %v6413_v5 = vld [vmem:[#allocation19_spill] sm:$0xff]  ;;  %v1234_v42 = vmul.f32 1.442695, %v1123_v58 }
 0x24e   :  { %v4788_v43 = vpop.eup %3930  ;;  %3942 = vpow2.f32 %v1224_v36  ;;  %v1125_v36 = vsub.f32 %v6413_v5, %v1056_v37  ;;  %v1128_v32 = vsub.f32 %v4468_v7, %v1057_v14  ;;  %v1131_v7 = vsub.f32 %v4495_v28, %v1057_v14 }
 0x24f   :  { %v4796_v8 = vpop.eup %3932  ;;  %3944 = vpow2.f32 %v1232_v2 }
 0x250   :  { %6407 = vst [vmem:[#allocation28_spill] sm:$0xff] %v4796_v8  ;;  %v4798_v10 = vpop.eup %3934  ;;  %3946 = vpow2.f32 %v1228_v31  ;;  %v1238_v61 = vmul.f32 1.442695, %v1125_v36  ;;  %v1126_v31 = vsub.f32 %v6416_v24, %v1056_v37  ;;  %v1244_v36 = vmul.f32 1.442695, %v1128_v32 }
 0x251   :  { %6408 = vst [vmem:[#allocation35_spill] sm:$0xff] %v4798_v10  ;;  %v4801_v30 = vpop.eup %3936  ;;  %3948 = vpow2.f32 %v1230_v9  ;;  %v6417_v9 = vld [vmem:[#allocation24_spill] sm:$0xff]  ;;  %v1058_v32 = vperm.slane %v4760_v1, 6 }
 0x252   :  { %1444 = vperm.xlu0 %3788, %v4783_v19   ;;  %v4809_v41 = vpop.eup %3938  ;;  %3950 = vpow2.f32 %v1238_v61  ;;  %v1127_v5 = vsub.f32 %v6417_v9, %v1056_v37  ;;  %v1240_v58 = vmul.f32 1.442695, %v1126_v31  ;;  %v1130_v37 = vsub.f32 %v4485_v38, %v1057_v14 }
 0x253   :  { %1438 = vperm.xlu2 %3786, %v4785_v0   ;;  %6412 = vst [vmem:[#allocation30_spill] sm:$0xff] %v4809_v41  ;;  %v4811_v57 = vpop.eup %3940  ;;  %3952 = vpow2.f32 %v1234_v42  ;;  %v1250_v42 = vmul.f32 1.442695, %v1131_v7  ;;  %v1132_v38 = vsub.f32 %v4499_v29, %v1058_v32 }
 0x254   :  { %1441 = vperm.xlu1 %3787, %v4788_v43   ;;  %v4814_v17 = vpop.eup %3942  ;;  %v1248_v9 = vmul.f32 1.442695, %v1130_v37 }
 0x25a   :  { %1453 = vperm.xlu0 %3788, %v4796_v8   ;;  %v1236_v8 = vmul.f32 1.442695, %v1124_v13  ;;  %v1242_v13 = vmul.f32 1.442695, %v1127_v5 }
 0x25b   :  { %1447 = vperm.xlu2 %3786, %v4798_v10  }
 0x25c   :  { %1450 = vperm.xlu1 %3787, %v4801_v30   ;;  %3954 = vpow2.f32 %v1236_v8  ;;  %v1129_v8 = vsub.f32 %v4474_v15, %v1057_v14  ;;  %v1134_v15 = vsub.f32 %v4519_v44, %v1058_v32  ;;  %v1133_v14 = vsub.f32 %v4509_v34, %v1058_v32 }
 0x25d   :  { %3956 = vpow2.f32 %v1244_v36  ;;  %v1135_v34 = vsub.f32 %v4525_v50, %v1058_v32 }
 0x25e   :  { %3958 = vpow2.f32 %v1240_v58  ;;  %v1246_v24 = vmul.f32 1.442695, %v1129_v8  ;;  %v1256_v36 = vmul.f32 1.442695, %v1134_v15  ;;  %v1059_v58 = vperm.slane %v4760_v1, 7 }
 0x25f   :  { %3960 = vpow2.f32 %v1242_v13  ;;  %v1252_v13 = vmul.f32 1.442695, %v1132_v38  ;;  %v1254_v8 = vmul.f32 1.442695, %v1133_v14  ;;  %v1258_v15 = vmul.f32 1.442695, %v1135_v34 }
 0x260   :  { %3962 = vpow2.f32 %v1250_v42  ;;  %v1137_v29 = vsub.f32 %v4607_v3, %v1059_v58  ;;  %v4869_v42 = vpop.xlane.xlu1 %1037  ;;  %v1136_v1 = vsub.f32 %v4546_v4, %v1059_v58  ;;  %v1138_v4 = vsub.f32 %v4613_v27, %v1059_v58 }
 0x261   :  { %3964 = vpow2.f32 %v1246_v24  ;;  %v1139_v32 = vsub.f32 %v4636_v35, %v1059_v58 }
 0x262   :  { %1462 = vperm.xlu0 %3788, %v4809_v41   ;;  %v4822_v41 = vpop.eup %3944  ;;  %3966 = vpow2.f32 %v1248_v9  ;;  %v1262_v24 = vmul.f32 1.442695, %v1137_v29  ;;  %v1044_v9 = vperm.slane %v4869_v42, 0  ;;  %v1260_v14 = vmul.f32 1.442695, %v1136_v1 }
 0x263   :  { %1456 = vperm.xlu2 %3786, %v4811_v57   ;;  %6415 = vst [vmem:[#allocation33_spill] sm:$0xff] %v4822_v41  ;;  %v4824_v10 = vpop.eup %3946  ;;  %3968 = vpow2.f32 %v1256_v36  ;;  %v1264_v29 = vmul.f32 1.442695, %v1138_v4  ;;  %v1266_v1 = vmul.f32 1.442695, %v1139_v32 }
 0x264   :  { %1459 = vperm.xlu1 %3787, %v4814_v17   ;;  %v4827_v2 = vpop.eup %3948  ;;  %3970 = vpow2.f32 %v1252_v13  ;;  %v1076_v50 = vsub.f32 %v4393_v45, %v1044_v9  ;;  %v1078_v35 = vsub.f32 %v4429_v26, %v1044_v9  ;;  %v1077_v58 = vsub.f32 %v4425_v22, %v1044_v9 }
 0x265   :  { %v4834_v16 = vpop.eup %3950  ;;  %3972 = vpow2.f32 %v1254_v8  ;;  %v1045_v8 = vperm.slane %v4869_v42, 1  ;;  %v1079_v26 = vsub.f32 %v4451_v53, %v1044_v9 }
 0x266   :  { %3974 = vpow2.f32 %v1262_v24  ;;  %v1140_v13 = vmul.f32 1.442695, %v1076_v50  ;;  %v1142_v4 = vmul.f32 1.442695, %v1077_v58 }
 0x267   :  { %3976 = vpow2.f32 %v1258_v15  ;;  %v1083_v27 = vsub.f32 %v4483_v20, %v1045_v8  ;;  %v4901_v15 = vperm.slane %v4869_v42, 2  ;;  %v1081_v53 = vsub.f32 %v4458_v62, %v1045_v8 }
 0x268   :  { %3978 = vpow2.f32 %v1260_v14  ;;  %v1144_v14 = vmul.f32 1.442695, %v1078_v35 }
 0x269   :  { %3980 = vpow2.f32 %v1140_v13  ;;  %v1154_v24 = vmul.f32 1.442695, %v1083_v27  ;;  %v1086_v22 = vsub.f32 %v4507_v33, %v4901_v15  ;;  %v1080_v13 = vsub.f32 %v4449_v52, %v1045_v8 }
 0x26a   :  { %1471 = vperm.xlu0 %3788, %v4822_v41   ;;  %v4836_v41 = vpop.eup %3952  ;;  %3982 = vpow2.f32 %v1264_v29  ;;  %v1146_v27 = vmul.f32 1.442695, %v1079_v26  ;;  %v1150_v26 = vmul.f32 1.442695, %v1081_v53 }
 0x26b   :  { %1465 = vperm.xlu2 %3786, %v4824_v10   ;;  %v4839_v61 = vpop.eup %3954  ;;  %3984 = vpow2.f32 %v1266_v1  ;;  %v1160_v29 = vmul.f32 1.442695, %v1086_v22  ;;  %v4917_v1 = vperm.slane %v4869_v42, 3  ;;  %v1148_v58 = vmul.f32 1.442695, %v1080_v13 }
 0x26c   :  { %1468 = vperm.xlu1 %3787, %v4827_v2   ;;  %v4847_v31 = vpop.eup %3956  ;;  %3986 = vpow2.f32 %v1154_v24  ;;  %v4935_v22 = vperm.slane %v4869_v42, 4 }
 0x26d   :  { %v4849_v5 = vpop.eup %3958  ;;  %3988 = vpow2.f32 %v1144_v14  ;;  %v1089_v52 = vsub.f32 %v4527_v51, %v4917_v1  ;;  %v1082_v14 = vsub.f32 %v4472_v11, %v1045_v8  ;;  %v1084_v11 = vsub.f32 %v4487_v21, %v4901_v15 }
 0x26e   :  { %v4852_v28 = vpop.eup %3960  ;;  %3990 = vpow2.f32 %v1142_v4  ;;  %v1092_v62 = vsub.f32 %v4648_v23, %v4935_v22  ;;  %v1095_v21 = vsub.f32 %v4654_v40, %v4935_v22 }
 0x26f   :  { %v4860_v7 = vpop.eup %3962  ;;  %3992 = vpow2.f32 %v1160_v29  ;;  %v1166_v4 = vmul.f32 1.442695, %v1089_v52  ;;  %v1152_v29 = vmul.f32 1.442695, %v1082_v14  ;;  %v1156_v53 = vmul.f32 1.442695, %v1084_v11 }
 0x270   :  { %v4862_v37 = vpop.eup %3964  ;;  %3994 = vpow2.f32 %v1146_v27  ;;  %v6433_v27 = vld [vmem:[#allocation31_spill] sm:$0xff]  ;;  %v1172_v52 = vmul.f32 1.442695, %v1092_v62  ;;  %v6438_v11 = vld [vmem:[#allocation36_spill] sm:$0xff] }
 0x271   :  { %v4865_v44 = vpop.eup %3966  ;;  %3996 = vpow2.f32 %v1148_v58  ;;  %v1085_v58 = vsub.f32 %v6433_v27, %v4901_v15  ;;  %v1088_v27 = vsub.f32 %v6438_v11, %v4917_v1  ;;  %v6443_v11 = vld [vmem:[#allocation41_spill] sm:$0xff] }
 0x272   :  { %1480 = vperm.xlu0 %3788, %v4834_v16   ;;  %v4875_v38 = vpop.eup %3968  ;;  %3998 = vpow2.f32 %v1166_v4 }
 0x273   :  { %1474 = vperm.xlu2 %3786, %v4836_v41   ;;  %6418 = vst [vmem:[#allocation40_spill] sm:$0xff] %v4875_v38  ;;  %v4877_v36 = vpop.eup %3970  ;;  %4000 = vpow2.f32 %v1150_v26  ;;  %v1158_v4 = vmul.f32 1.442695, %v1085_v58  ;;  %v6437_v26 = vld [vmem:[#allocation34_spill] sm:$0xff]  ;;  %v1178_v58 = vmul.f32 1.442695, %v1095_v21 }
 0x274   :  { %1477 = vperm.xlu1 %3787, %v4839_v61   ;;  %6419 = vst [vmem:[#allocation37_spill] sm:$0xff] %v4877_v36  ;;  %v4880_v3 = vpop.eup %3972  ;;  %4002 = vpow2.f32 %v1152_v29  ;;  %v1087_v29 = vsub.f32 %v6437_v26, %v4901_v15  ;;  %v1164_v40 = vmul.f32 1.442695, %v1088_v27  ;;  %v6442_v21 = vld [vmem:[#allocation39_spill] sm:$0xff]  ;;  %v1091_v27 = vsub.f32 %v6443_v11, %v4917_v1 }
 0x275   :  { %6420 = vst [vmem:[#allocation38_spill] sm:$0xff] %v4880_v3  ;;  %v4888_v34 = vpop.eup %3974  ;;  %4004 = vpow2.f32 %v1172_v52  ;;  %v1090_v26 = vsub.f32 %v6442_v21, %v4917_v1  ;;  %v6447_v1 = vld [vmem:[#allocation17_spill] sm:$0xff] }
 0x276   :  { %6421 = vst [vmem:[#allocation23_spill] sm:$0xff] %v4888_v34  ;;  %4006 = vpow2.f32 %v1156_v53  ;;  %v1162_v52 = vmul.f32 1.442695, %v1087_v29 }
 0x27a   :  { %1489 = vperm.xlu0 %3788, %v4847_v31  }
 0x27b   :  { %1483 = vperm.xlu2 %3786, %v4849_v5  }
 0x27c   :  { %1486 = vperm.xlu1 %3787, %v4852_v28  }
 0x282   :  { %1498 = vperm.xlu0 %3788, %v4860_v7  }
 0x283   :  { %1492 = vperm.xlu2 %3786, %v4862_v37  }
 0x284   :  { %1495 = vperm.xlu1 %3787, %v4865_v44  }
 0x28a   :  { %1507 = vperm.xlu0 %3788, %v4875_v38   ;;  %v4890_v38 = vpop.eup %3976  ;;  %4008 = vpow2.f32 %v1158_v4 }
 0x28b   :  { %1501 = vperm.xlu2 %3786, %v4877_v36   ;;  %6422 = vst [vmem:[#allocation15_spill] sm:$0xff] %v4890_v38  ;;  %v4893_v45 = vpop.eup %3978  ;;  %4010 = vpow2.f32 %v1178_v58 }
 0x28c   :  { %1504 = vperm.xlu1 %3787, %v4880_v3   ;;  %6423 = vst [vmem:[#allocation21_spill] sm:$0xff] %v4893_v45  ;;  %v4903_v50 = vpop.eup %3980  ;;  %4012 = vpow2.f32 %v1162_v52 }
 0x28d   :  { %6424 = vst [vmem:[#allocation26_spill] sm:$0xff] %v4903_v50  ;;  %v4905_v32 = vpop.eup %3982  ;;  %4014 = vpow2.f32 %v1164_v40 }
 0x28e   :  { %6425 = vst [vmem:[#allocation22_spill] sm:$0xff] %v4905_v32  ;;  %v4908_v20 = vpop.eup %3984 }
 0x28f   :  { %6426 = vst [vmem:[#allocation25_spill] sm:$0xff] %v4908_v20  ;;  %v4919_v35 = vpop.eup %3986 }
 0x290   :  { %6427 = vst [vmem:[#allocation32_spill] sm:$0xff] %v4919_v35  ;;  %v4921_v24 = vpop.eup %3988 }
 0x291   :  { %6428 = vst [vmem:[#allocation27_spill] sm:$0xff] %v4921_v24  ;;  %v4924_v33 = vpop.eup %3990 }
 0x292   :  { %1516 = vperm.xlu0 %3788, %v4888_v34   ;;  %6429 = vst [vmem:[#allocation29_spill] sm:$0xff] %v4924_v33  ;;  %v4937_v13 = vpop.eup %3992 }
 0x293   :  { %1510 = vperm.xlu2 %3786, %v4890_v38   ;;  %6430 = vst [vmem:[#allocation19_spill] sm:$0xff] %v4937_v13  ;;  %v4939_v34 = vpop.eup %3994 }
 0x294   :  { %1513 = vperm.xlu1 %3787, %v4893_v45   ;;  %6431 = vst [vmem:[#allocation18_spill] sm:$0xff] %v4939_v34  ;;  %v4942_v51 = vpop.eup %3996 }
 0x295   :  { %6432 = vst [vmem:[#allocation20_spill] sm:$0xff] %v4942_v51  ;;  %v4954_v14 = vpop.eup %3998 }
 0x296   :  { %6434 = vst [vmem:[#allocation24_spill] sm:$0xff] %v4954_v14 }
 0x29a   :  { %1333 = vperm.xlu0 %3788, %v4903_v50  }
 0x29b   :  { %1519 = vperm.xlu2 %3786, %v4905_v32   ;;  %v4972_v32 = vperm.slane %v4869_v42, 5 }
 0x29c   :  { %1522 = vperm.xlu1 %3787, %v4908_v20   ;;  %v4956_v20 = vpop.eup %4000 }
 0x29d   :  { %6435 = vst [vmem:[#allocation31_spill] sm:$0xff] %v4956_v20  ;;  %v4959_v23 = vpop.eup %4002  ;;  %v1098_v15 = vsub.f32 %v4696_v47, %v4972_v32  ;;  %v1168_v47 = vmul.f32 1.442695, %v1090_v26  ;;  %v6448_v26 = vld [vmem:[#allocation42_spill] sm:$0xff] }
 0x29e   :  { %6436 = vst [vmem:[#allocation46_spill] sm:$0xff] %v4959_v23  ;;  %v1093_v11 = vsub.f32 %v6448_v26, %v4935_v22 }
 0x29f   :  { %v1184_v58 = vmul.f32 1.442695, %v1098_v15 }
 0x2a1   :  { %4016 = vpow2.f32 %v1184_v58 }
 0x2a2   :  { %1354 = vperm.xlu0 %3788, %v4919_v35   ;;  %4018 = vpow2.f32 %v1168_v47 }
 0x2a3   :  { %1339 = vperm.xlu2 %3786, %v4921_v24   ;;  %v1170_v24 = vmul.f32 1.442695, %v1091_v27 }
 0x2a4   :  { %1336 = vperm.xlu1 %3787, %v4924_v33  }
 0x2a5   :  { %v4931_v9 = vpop.permute.xlu2 %1429  ;;  %4020 = vpow2.f32 %v1170_v24 }
 0x2aa   :  { %1363 = vperm.xlu0 %3788, %v4937_v13  }
 0x2ab   :  { %1342 = vperm.xlu2 %3786, %v4939_v34  }
 0x2ac   :  { %1345 = vperm.xlu1 %3787, %v4942_v51  }
 0x2ad   :  { %v4950_v8 = vpop.permute.xlu2 %1438 }
 0x2b2   :  { %1372 = vperm.xlu0 %3788, %v4954_v14  }
 0x2b3   :  { %1348 = vperm.xlu2 %3786, %v4956_v20   ;;  %v4974_v20 = vpop.eup %4004 }
 0x2b4   :  { %1351 = vperm.xlu1 %3787, %v4959_v23   ;;  %6439 = vst [vmem:[#allocation34_spill] sm:$0xff] %v4974_v20  ;;  %v4976_v51 = vpop.eup %4006 }
 0x2b5   :  { %v4967_v62 = vpop.permute.xlu2 %1447  ;;  %6440 = vst [vmem:[#allocation36_spill] sm:$0xff] %v4976_v51  ;;  %v4979_v53 = vpop.eup %4008 }
 0x2b6   :  { %6441 = vst [vmem:[#allocation47_spill] sm:$0xff] %v4979_v53 }
 0x2ba   :  { %1381 = vperm.xlu0 %3788, %v4974_v20  }
 0x2bb   :  { %1357 = vperm.xlu2 %3786, %v4976_v51   ;;  %v4996_v51 = vperm.slane %v4869_v42, 6 }
 0x2bc   :  { %1360 = vperm.xlu1 %3787, %v4979_v53   ;;  %v4985_v4 = vpop.permute.xlu0 %1435  ;;  %v4998_v53 = vpop.eup %4010 }
 0x2bd   :  { %v4989_v29 = vpop.permute.xlu2 %1456  ;;  %6444 = vst [vmem:[#allocation39_spill] sm:$0xff] %v4998_v53  ;;  %v5000_v52 = vpop.eup %4012  ;;  %v1101_v40 = vsub.f32 %v6447_v1, %v4996_v51  ;;  %v1174_v1 = vmul.f32 1.442695, %v1093_v11  ;;  %v1583_v35 = vperm.slane %v4985_v4, %v4530_v54 }
 0x2be   :  { %v4993_v34 = vpop.permute.xlu1 %1432  ;;  %6445 = vst [vmem:[#allocation41_spill] sm:$0xff] %v5000_v52  ;;  %v5003_v21 = vpop.eup %4014 }
 0x2bf   :  { %6446 = vst [vmem:[#allocation48_spill] sm:$0xff] %v5003_v21  ;;  %v1190_v58 = vmul.f32 1.442695, %v1101_v40  ;;  %v5022_v50 = vpop.eup %4016  ;;  %v6454_v40 = vld [vmem:[#allocation45_spill] sm:$0xff] }
 0x2c0   :  { %6450 = vst [vmem:[#allocation17_spill] sm:$0xff] %v5022_v50  ;;  %v5024_v47 = vpop.eup %4018  ;;  %v1097_v11 = vsub.f32 %v6454_v40, %v4972_v32  ;;  %v6458_v40 = vld [vmem:[#allocation16_spill] sm:$0xff] }
 0x2c1   :  { %6451 = vst [vmem:[#allocation42_spill] sm:$0xff] %v5024_v47  ;;  %v5027_v26 = vpop.eup %4020  ;;  %4022 = vpow2.f32 %v1190_v58 }
 0x2c2   :  { %1390 = vperm.xlu0 %3788, %v4998_v53   ;;  %v6449_v53 = vld [vmem:[#allocation43_spill] sm:$0xff]  ;;  %4024 = vpow2.f32 %v1174_v1 }
 0x2c3   :  { %1366 = vperm.xlu2 %3786, %v5000_v52   ;;  %v1094_v33 = vsub.f32 %v6449_v53, %v4935_v22  ;;  %v5020_v52 = vperm.slane %v4869_v42, 7  ;;  %6452 = vst [vmem:[#allocation43_spill] sm:$0xff] %v5027_v26  ;;  %v6453_v22 = vld [vmem:[#allocation44_spill] sm:$0xff] }
 0x2c4   :  { %1369 = vperm.xlu1 %3787, %v5003_v21   ;;  %v5009_v15 = vpop.permute.xlu0 %1444 }
 0x2c5   :  { %v5013_v27 = vpop.permute.xlu2 %1465  ;;  %v1176_v21 = vmul.f32 1.442695, %v1094_v33  ;;  %v1104_v24 = vsub.f32 %v4460_v63, %v5020_v52  ;;  %v1096_v33 = vsub.f32 %v6453_v22, %v4972_v32  ;;  %v1182_v63 = vmul.f32 1.442695, %v1097_v11 }
 0x2c6   :  { %v5017_v20 = vpop.permute.xlu1 %1441  ;;  %v1100_v11 = vsub.f32 %v6458_v40, %v4996_v51  ;;  %v1601_v4 = vperm.slane %v5013_v27, %v4523_v49 }
 0x2c7   :  { %4026 = vpow2.f32 %v1176_v21  ;;  %v1196_v58 = vmul.f32 1.442695, %v1104_v24  ;;  %v5043_v14 = vpop.eup %4022  ;;  %v1107_v21 = vsub.f32 %v6394_v39, %v5020_v52  ;;  %v1099_v24 = vsub.f32 %v4738_v59, %v4972_v32 }
 0x2c8   :  { %6455 = vst [vmem:[#allocation44_spill] sm:$0xff] %v5043_v14  ;;  %v1188_v39 = vmul.f32 1.442695, %v1100_v11  ;;  %v1102_v32 = vsub.f32 %v4415_v12, %v4996_v51 }
 0x2c9   :  { %4028 = vpow2.f32 %v1196_v58  ;;  %v1202_v58 = vmul.f32 1.442695, %v1107_v21  ;;  %v1103_v21 = vsub.f32 %v4446_v48, %v4996_v51  ;;  %v1105_v48 = vsub.f32 %v4466_v6, %v5020_v52 }
 0x2ca   :  { %1399 = vperm.xlu0 %3788, %v5022_v50   ;;  %v1192_v40 = vmul.f32 1.442695, %v1102_v32 }
 0x2cb   :  { %1375 = vperm.xlu2 %3786, %v5024_v47   ;;  %v1180_v47 = vmul.f32 1.442695, %v1096_v33  ;;  %v1198_v32 = vmul.f32 1.442695, %v1105_v48 }
 0x2cc   :  { %1378 = vperm.xlu1 %3787, %v5027_v26   ;;  %v5033_v42 = vpop.permute.xlu0 %1453  ;;  %v5045_v26 = vpop.eup %4024 }
 0x2cd   :  { %v5037_v53 = vpop.permute.xlu2 %1474  ;;  %6456 = vst [vmem:[#allocation45_spill] sm:$0xff] %v5045_v26  ;;  %v5048_v1 = vpop.eup %4026  ;;  %4030 = vpow2.f32 %v1180_v47 }
 0x2ce   :  { %v5041_v50 = vpop.permute.xlu1 %1450  ;;  %6457 = vst [vmem:[#allocation49_spill] sm:$0xff] %v5048_v1  ;;  %4032 = vpow2.f32 %v1182_v63 }
 0x2cf   :  { %v5064_v23 = vpop.eup %4028  ;;  %4034 = vpow2.f32 %v1202_v58 }
 0x2d0   :  { %6459 = vst [vmem:[#allocation16_spill] sm:$0xff] %v5064_v23 }
 0x2d2   :  { %1408 = vperm.xlu0 %3788, %v5043_v14  }
 0x2d3   :  { %1384 = vperm.xlu2 %3786, %v5045_v26   ;;  %v1186_v26 = vmul.f32 1.442695, %v1099_v24 }
 0x2d4   :  { %1387 = vperm.xlu1 %3787, %v5048_v1   ;;  %v5054_v22 = vpop.permute.xlu0 %1462  ;;  %v5066_v1 = vpop.eup %4030 }
 0x2d5   :  { %v5058_v33 = vpop.permute.xlu2 %1483  ;;  %6460 = vst [vmem:[#allocation50_spill] sm:$0xff] %v5066_v1  ;;  %v5069_v47 = vpop.eup %4032  ;;  %4036 = vpow2.f32 %v1186_v26  ;;  %v1106_v26 = vsub.f32 %v4479_v18, %v5020_v52 }
 0x2d6   :  { %v5062_v14 = vpop.permute.xlu1 %1459  ;;  %6461 = vst [vmem:[#allocation51_spill] sm:$0xff] %v5069_v47  ;;  %4038 = vpow2.f32 %v1188_v39  ;;  %v5081_v11 = vpop.eup %4034 }
 0x2d7   :  { %6462 = vst [vmem:[#allocation52_spill] sm:$0xff] %v5081_v11  ;;  %4040 = vpow2.f32 %v1192_v40 }
 0x2da   :  { %1417 = vperm.xlu0 %3788, %v5064_v23  }
 0x2db   :  { %1393 = vperm.xlu2 %3786, %v5066_v1   ;;  %v1194_v1 = vmul.f32 1.442695, %v1103_v21  ;;  %v5083_v58 = vpop.eup %4036  ;;  %v1200_v21 = vmul.f32 1.442695, %v1106_v26 }
 0x2dc   :  { %1396 = vperm.xlu1 %3787, %v5069_v47   ;;  %v5073_v59 = vpop.permute.xlu0 %1471  ;;  %6463 = vst [vmem:[#allocation53_spill] sm:$0xff] %v5083_v58  ;;  %v5086_v23 = vpop.eup %4038  ;;  %v1587_v47 = vperm.slane %v5017_v20, %v4523_v49  ;;  %v1590_v20 = vperm.slane %v4967_v62, %v4530_v54 }
 0x2dd   :  { %v5077_v63 = vpop.permute.xlu2 %1492  ;;  %6464 = vst [vmem:[#allocation54_spill] sm:$0xff] %v5086_v23  ;;  %4042 = vpow2.f32 %v1194_v1 }
 0x2de   :  { %v1469_v24 = vpop.permute.xlu1 %1468  ;;  %4044 = vpow2.f32 %v1198_v32 }
 0x2df   :  { %4046 = vpow2.f32 %v1200_v21  ;;  %v1581_v21 = vperm.slane %v4993_v34, %v4533_v55  ;;  %v1602_v36 = vperm.slane %v1469_v24, %v4533_v55 }
 0x2e2   :  { %1426 = vperm.xlu0 %3788, %v5081_v11   ;;  %v5098_v11 = vpop.eup %4040 }
 0x2e3   :  { %1402 = vperm.xlu2 %3786, %v5083_v58   ;;  %6465 = vst [vmem:[#allocation55_spill] sm:$0xff] %v5098_v11  ;;  %v5100_v58 = vpop.eup %4042 }
 0x2e4   :  { %1405 = vperm.xlu1 %3787, %v5086_v23   ;;  %v5090_v12 = vpop.permute.xlu0 %1480  ;;  %6466 = vst [vmem:[#allocation56_spill] sm:$0xff] %v5100_v58  ;;  %v5108_v23 = vpop.eup %4044 }
 0x2e5   :  { %v5094_v51 = vpop.permute.xlu2 %1501  ;;  %6467 = vst [vmem:[#allocation57_spill] sm:$0xff] %v5108_v23  ;;  %v5110_v18 = vpop.eup %4046  ;;  %v1609_v27 = vperm.slane %v5090_v12, %v4533_v55 }
 0x2e6   :  { %v1478_v39 = vpop.permute.xlu1 %1477  ;;  %6468 = vst [vmem:[#allocation58_spill] sm:$0xff] %v5110_v18 }
 0x2eb   :  { %1411 = vperm.xlu2 %3786, %v5098_v11  }
 0x2ec   :  { %1414 = vperm.xlu1 %3787, %v5100_v58   ;;  %v1490_v40 = vpop.permute.xlu0 %1489 }
 0x2ed   :  { %v5104_v6 = vpop.permute.xlu2 %1510 }
 0x2ee   :  { %v5106_v1 = vpop.permute.xlu1 %1486 }
 0x2f3   :  { %1420 = vperm.xlu2 %3786, %v5108_v23   ;;  %v1588_v23 = vperm.slane %v5009_v15, %v4533_v55  ;;  %v1594_v15 = vperm.slane %v5033_v42, %v4523_v49  ;;  %v1604_v42 = vperm.slane %v5073_v59, %v4530_v54  ;;  %v1622_v59 = vperm.slane %v5094_v51, %v4523_v49 }
 0x2f4   :  { %1423 = vperm.xlu1 %3787, %v5110_v18   ;;  %v5114_v52 = vpop.permute.xlu0 %1498  ;;  %v1580_v18 = vperm.slane %v4931_v9, %v4523_v49  ;;  %v1585_v9 = vperm.slane %v4950_v8, %v4536_v56  ;;  %v1608_v8 = vperm.slane %v1478_v39, %v4523_v49  ;;  %v1613_v51 = vperm.slane %v5106_v1, %v4536_v56 }
 0x2f5   :  { %v5116_v48 = vpop.permute.xlu2 %1519  ;;  %v1589_v45 = vsel %vm897_vm0, %v1588_v23, %v1587_v47  ;;  %v1597_v23 = vperm.slane %v5062_v14, %v4530_v54  ;;  %v1595_v47 = vperm.slane %v4989_v29, %v4533_v55  ;;  %v1592_v14 = vperm.slane %v5041_v50, %v4536_v56 }
 0x2f6   :  { %v1496_v26 = vpop.permute.xlu1 %1495  ;;  %v1582_v38 = vsel %vm897_vm0, %v1581_v21, %v1580_v18  ;;  %v1591_v62 = vsel %vm901_vm1, %v1590_v20, %v1589_v45  ;;  %v1603_v18 = vsel %vm897_vm0, %v1602_v36, %v1601_v4  ;;  %v1615_v45 = vperm.slane %v1490_v40, %v4523_v49 }
 0x2f7   :  { %v1584_v24 = vsel %vm901_vm1, %v1583_v35, %v1582_v38  ;;  %v1596_v29 = vsel %vm897_vm0, %v1595_v47, %v1594_v15  ;;  %v1599_v38 = vperm.slane %v5054_v22, %v4536_v56  ;;  %v1616_v36 = vperm.slane %v5077_v63, %v4533_v55 }
 0x2f8   :  { %v1598_v35 = vsel %vm901_vm1, %v1597_v23, %v1596_v29  ;;  %v1605_v50 = vsel %vm901_vm1, %v1604_v42, %v1603_v18  ;;  %v1606_v20 = vperm.slane %v5037_v53, %v4536_v56  ;;  %v1610_v63 = vsel %vm897_vm0, %v1609_v27, %v1608_v8 }
 0x2f9   :  { %v1593_v4 = vsel %vm905_vm2, %v1592_v14, %v1591_v62  ;;  %v1586_v53 = vsel %vm905_vm2, %v1585_v9, %v1584_v24  ;;  %v1600_v23 = vsel %vm905_vm2, %v1599_v38, %v1598_v35  ;;  %v1632_v24 = vperm.slane %v5116_v48, %v4530_v54 }
 0x2fa   :  { %v1607_v47 = vsel %vm905_vm2, %v1606_v20, %v1605_v50  ;;  %v1643_v27 = vsel %vm1012_vm3, %v1593_v4, %v1586_v53 }
 0x2fc   :  { %v1508_v11 = vpop.permute.xlu0 %1507 }
 0x2fd   :  { %v5118_v32 = vpop.permute.xlu2 %1339  ;;  %v1625_v39 = vperm.slane %v1508_v11, %v4530_v54  ;;  %v1611_v11 = vperm.slane %v5058_v33, %v4530_v54 }
 0x2fe   :  { %v1505_v58 = vpop.permute.xlu1 %1504 }
 0x2ff   :  { %v1623_v21 = vperm.slane %v1505_v58, %v4533_v55  ;;  %v1618_v58 = vperm.slane %v1496_v26, %v4530_v54  ;;  %v1612_v42 = vsel %vm901_vm1, %v1611_v11, %v1610_v63 }
 0x300   :  { %v1614_v9 = vsel %vm905_vm2, %v1613_v51, %v1612_v42 }
 0x301   :  { %v1624_v26 = vsel %vm897_vm0, %v1623_v21, %v1622_v59  ;;  %v1644_v21 = vsel %vm1014_vm5, %v1600_v23, %v1643_v27 }
 0x302   :  { %v1626_v62 = vsel %vm901_vm1, %v1625_v39, %v1624_v26 }
 0x304   :  { %v1517_v13 = vpop.permute.xlu0 %1516 }
 0x305   :  { %v5137_v3 = vpop.permute.xlu2 %1342  ;;  %v1630_v40 = vperm.slane %v1517_v13, %v4533_v55  ;;  %v1620_v13 = vperm.slane %v5114_v52, %v4536_v56  ;;  %v1627_v52 = vperm.slane %v5104_v6, %v4536_v56 }
 0x306   :  { %v1514_v34 = vpop.permute.xlu1 %1513 }
 0x307   :  { %v1629_v22 = vperm.slane %v1514_v34, %v4523_v49  ;;  %v1617_v34 = vsel %vm897_vm0, %v1616_v36, %v1615_v45  ;;  %v1628_v29 = vsel %vm905_vm2, %v1627_v52, %v1626_v62  ;;  %v1645_v45 = vsel %vm1016_vm4, %v1607_v47, %v1644_v21 }
 0x308   :  { %v1619_v1 = vsel %vm901_vm1, %v1618_v58, %v1617_v34  ;;  %v1646_v6 = vsel %vm1018_vm6, %v1614_v9, %v1645_v45 }
 0x309   :  { %v1631_v18 = vsel %vm897_vm0, %v1630_v40, %v1629_v22  ;;  %v1621_v14 = vsel %vm905_vm2, %v1620_v13, %v1619_v1 }
 0x30a   :  { %v1633_v38 = vsel %vm901_vm1, %v1632_v24, %v1631_v18  ;;  %v1647_v58 = vsel %vm1020_vm7, %v1621_v14, %v1646_v6  ;;  %v1529_v6 = vperm.slane %v5137_v3, %v4536_v56 }
 0x30b   :  { %v1648_v48 = vsel %vm1022_vm8, %v1628_v29, %v1647_v58 }
 0x30c   :  { %v5168_v12 = vpop.permute.xlu0 %1333 }
 0x30d   :  { %v1349_v33 = vpop.permute.xlu2 %1348  ;;  %v1524_v9 = vperm.slane %v5168_v12, %v4523_v49 }
 0x30e   :  { %v1523_v15 = vpop.permute.xlu1 %1522 }
 0x30f   :  { %v1634_v8 = vperm.slane %v1523_v15, %v4536_v56 }
 0x311   :  { %v1635_v36 = vsel %vm905_vm2, %v1634_v8, %v1633_v38  ;;  %v1527_v38 = vperm.slane %v5118_v32, %v4530_v54 }
 0x312   :  { %v1649_v50 = vsel %vm6360_vm9, %v1635_v36, %v1648_v48 }
 0x313   :  { %v1655_v22 = vsel %vm1035_vm10, %v1649_v50, 0.0 }
 0x314   :  { %v5205_v35 = vpop.permute.xlu0 %1354 }
 0x315   :  { %v1358_v39 = vpop.permute.xlu2 %1357 }
 0x316   :  { %v1337_v59 = vpop.permute.xlu1 %1336  ;;  %v1538_v45 = vperm.slane %v1358_v39, %v4523_v49 }
 0x317   :  { %v1525_v27 = vperm.slane %v1337_v59, %v4533_v55  ;;  %v1532_v59 = vperm.slane %v1349_v33, %v4533_v55  ;;  %v1536_v33 = vperm.slane %v5205_v35, %v4536_v56 }
 0x319   :  { %v1526_v14 = vsel %vm897_vm0, %v1525_v27, %v1524_v9 }
 0x31a   :  { %v1528_v48 = vsel %vm901_vm1, %v1527_v38, %v1526_v14 }
 0x31c   :  { %1656 = vadd.xlane.f32.xlu2 %v1655_v22  ;;  %v1364_v20 = vpop.permute.xlu0 %1363 }
 0x31d   :  { %v1367_v63 = vpop.permute.xlu2 %1366  ;;  %v1541_v50 = vperm.slane %v1364_v20, %v4530_v54 }
 0x31e   :  { %v1346_v40 = vpop.permute.xlu1 %1345 }
 0x31f   :  { %v1531_v29 = vperm.slane %v1346_v40, %v4523_v49 }
 0x321   :  { %v1533_v39 = vsel %vm897_vm0, %v1532_v59, %v1531_v29 }
 0x324   :  { %v1373_v26 = vpop.permute.xlu0 %1372 }
 0x325   :  { %v1376_v4 = vpop.permute.xlu2 %1375  ;;  %v1546_v40 = vperm.slane %v1373_v26, %v4533_v55 }
 0x326   :  { %v1352_v51 = vpop.permute.xlu1 %1351 }
 0x327   :  { %v1534_v36 = vperm.slane %v1352_v51, %v4530_v54 }
 0x32c   :  { %v1382_v11 = vpop.permute.xlu0 %1381 }
 0x32d   :  { %v1385_v13 = vpop.permute.xlu2 %1384  ;;  %v1552_v3 = vperm.slane %v1382_v11, %v4523_v49  ;;  %v1543_v11 = vperm.slane %v1367_v63, %v4536_v56 }
 0x32e   :  { %v1361_v15 = vpop.permute.xlu1 %1360  ;;  %v1553_v51 = vperm.slane %v1385_v13, %v4533_v55 }
 0x32f   :  { %v1539_v21 = vperm.slane %v1361_v15, %v4533_v55  ;;  %v1535_v15 = vsel %vm901_vm1, %v1534_v36, %v1533_v39 }
 0x331   :  { %v1540_v22 = vsel %vm897_vm0, %v1539_v21, %v1538_v45  ;;  %v1548_v21 = vperm.slane %v1376_v4, %v4530_v54 }
 0x332   :  { %v1542_v9 = vsel %vm901_vm1, %v1541_v50, %v1540_v22 }
 0x333   :  { %v1544_v36 = vsel %vm905_vm2, %v1543_v11, %v1542_v9 }
 0x334   :  { %v5213_v53 = vpop.permute.xlu0 %1390 }
 0x335   :  { %v1394_v47 = vpop.permute.xlu2 %1393  ;;  %v1557_v63 = vperm.slane %v5213_v53, %v4536_v56 }
 0x336   :  { %v1370_v34 = vpop.permute.xlu1 %1369 }
 0x337   :  { %v1545_v12 = vperm.slane %v1370_v34, %v4523_v49  ;;  %v1559_v34 = vperm.slane %v1394_v47, %v4523_v49  ;;  %v1537_v47 = vsel %vm905_vm2, %v1536_v33, %v1535_v15 }
 0x339   :  { %v1547_v26 = vsel %vm897_vm0, %v1546_v40, %v1545_v12 }
 0x33a   :  { %v1549_v4 = vsel %vm901_vm1, %v1548_v21, %v1547_v26 }
 0x33c   :  { %v1400_v42 = vpop.permute.xlu0 %1399 }
 0x33d   :  { %v5215_v62 = vpop.permute.xlu2 %1402  ;;  %v1562_v29 = vperm.slane %v1400_v42, %v4530_v54 }
 0x33e   :  { %v1379_v23 = vpop.permute.xlu1 %1378 }
 0x33f   :  { %v1550_v35 = vperm.slane %v1379_v23, %v4536_v56 }
 0x344   :  { %v1409_v8 = vpop.permute.xlu0 %1408 }
 0x345   :  { %v1412_v24 = vpop.permute.xlu2 %1411  ;;  %v1567_v38 = vperm.slane %v1409_v8, %v4533_v55  ;;  %v1551_v8 = vsel %vm905_vm2, %v1550_v35, %v1549_v4 }
 0x346   :  { %v1388_v1 = vpop.permute.xlu1 %1387  ;;  %v1569_v12 = vperm.slane %v1412_v24, %v4530_v54 }
 0x347   :  { %v1555_v20 = vperm.slane %v1388_v1, %v4530_v54  ;;  %v1554_v1 = vsel %vm897_vm0, %v1553_v51, %v1552_v3 }
 0x349   :  { %v1556_v23 = vsel %vm901_vm1, %v1555_v20, %v1554_v1 }
 0x34a   :  { %v1558_v22 = vsel %vm905_vm2, %v1557_v63, %v1556_v23 }
 0x34c   :  { %v1418_v58 = vpop.permute.xlu0 %1417 }
 0x34d   :  { %v1421_v45 = vpop.permute.xlu2 %1420  ;;  %v1573_v53 = vperm.slane %v1418_v58, %v4523_v49 }
 0x34e   :  { %v1397_v18 = vpop.permute.xlu1 %1396 }
 0x34f   :  { %v1560_v32 = vperm.slane %v1397_v18, %v4533_v55  ;;  %v1530_v18 = vsel %vm905_vm2, %v1529_v6, %v1528_v48  ;;  %v1574_v48 = vperm.slane %v1421_v45, %v4533_v55 }
 0x350   :  { %v1636_v50 = vsel %vm1012_vm3, %v1537_v47, %v1530_v18 }
 0x351   :  { %v1561_v14 = vsel %vm897_vm0, %v1560_v32, %v1559_v34  ;;  %v1575_v58 = vsel %vm897_vm0, %v1574_v48, %v1573_v53 }
 0x352   :  { %v1563_v6 = vsel %vm901_vm1, %v1562_v29, %v1561_v14 }
 0x354   :  { %v1427_v32 = vpop.permute.xlu0 %1426 }
 0x355   :  { %v1578_v15 = vperm.slane %v1427_v32, %v4536_v56 }
 0x356   :  { %v1406_v52 = vpop.permute.xlu1 %1405 }
 0x357   :  { %v1566_v13 = vperm.slane %v1406_v52, %v4523_v49  ;;  %v1564_v52 = vperm.slane %v5215_v62, %v4536_v56  ;;  %v1637_v62 = vsel %vm1014_vm5, %v1544_v36, %v1636_v50 }
 0x358   :  { %v1638_v3 = vsel %vm1016_vm4, %v1551_v8, %v1637_v62 }
 0x359   :  { %v1568_v59 = vsel %vm897_vm0, %v1567_v38, %v1566_v13  ;;  %v1565_v51 = vsel %vm905_vm2, %v1564_v52, %v1563_v6  ;;  %v1639_v34 = vsel %vm1018_vm6, %v1558_v22, %v1638_v3 }
 0x35a   :  { %v1570_v39 = vsel %vm901_vm1, %v1569_v12, %v1568_v59 }
 0x35e   :  { %v1415_v27 = vpop.permute.xlu1 %1414 }
 0x35f   :  { %v1571_v42 = vperm.slane %v1415_v27, %v4536_v56  ;;  %v1640_v27 = vsel %vm1020_vm7, %v1565_v51, %v1639_v34 }
 0x361   :  { %v1572_v24 = vsel %vm905_vm2, %v1571_v42, %v1570_v39 }
 0x362   :  { %v1641_v9 = vsel %vm1022_vm8, %v1572_v24, %v1640_v27 }
 0x366   :  { %v1424_v40 = vpop.permute.xlu1 %1423 }
 0x367   :  { %v1576_v33 = vperm.slane %v1424_v40, %v4530_v54 }
 0x369   :  { %v1577_v20 = vsel %vm901_vm1, %v1576_v33, %v1575_v58 }
 0x36a   :  { %v1579_v18 = vsel %vm905_vm2, %v1578_v15, %v1577_v20 }
 0x36b   :  { %v1642_v26 = vsel %vm6360_vm9, %v1579_v18, %v1641_v9 }
 0x36c   :  { %v1652_v13 = vsel %vm1035_vm10, %v1642_v26, 0.0 }
 0x36d   :  { %1653 = vadd.xlane.f32.xlu0 %v1652_v13 }
 0x38f   :  { %v5287_v11 = vpop.xlane.xlu2 %1656 }
 0x390   :  { %v1668_v21 = vperm.slane %v5287_v11, 0  ;;  %v1669_v35 = vperm.slane %v5287_v11, 1  ;;  %v1670_v14 = vperm.slane %v5287_v11, 2  ;;  %v5293_v8 = vperm.slane %v5287_v11, 3 }
 0x391   :  { %v5326_v26 = vperm.slane %v5287_v11, 5 }
 0x392   :  { %4048 = vrcp.f32 %v1668_v21  ;;  %v1847_v63 = vand.u32 2147483648, %v1668_v21  ;;  %v1845_v52 = vand.u32 2147483647, %v1668_v21  ;;  %vm1841_vm12 = vweird.f32 %v1668_v21 }
 0x393   :  { %4050 = vrcp.f32 %v1669_v35  ;;  %vm1859_vm9 = vweird.f32 %v1669_v35  ;;  %v1865_v22 = vand.u32 2147483648, %v1669_v35  ;;  %v1863_v51 = vand.u32 2147483647, %v1669_v35 }
 0x394   :  { %4052 = vrcp.f32 %v1670_v14  ;;  %v1848_v12 = vor.u32 1.1754944e-38, %v1847_v63  ;;  %vm1846_vm14 = vcmp.eq.f32.partialorder %v1845_v52, 8.507059e+37  ;;  %v1883_v20 = vand.u32 2147483648, %v1670_v14 }
 0x395   :  { %4054 = vrcp.f32 %v5293_v8  ;;  %v1866_v24 = vor.u32 1.1754944e-38, %v1865_v22  ;;  %v1881_v18 = vand.u32 2147483647, %v1670_v14  ;;  %v1901_v63 = vand.u32 2147483648, %v5293_v8 }
 0x398   :  { %v4049_v47 = vpop.eup %4048 }
 0x399   :  { %v4051_v1 = vpop.eup %4050  ;;  %v1837_v29 = vmul.f32 %v4049_v47, %v1668_v21  ;;  %vm1842_vm11 = vweird.f32 %v4049_v47 }
 0x39a   :  { %v1855_v38 = vmul.f32 %v4051_v1, %v1669_v35  ;;  %v4053_v45 = vpop.eup %4052  ;;  %vm1843_vm13 = vmor %vm1841_vm12, %vm1842_vm11  ;;  %vm1860_vm15 = vweird.f32 %v4051_v1  ;;  %vm1864_vm12 = vcmp.eq.f32.partialorder %v1863_v51, 8.507059e+37 }
 0x39b   :  { %v1838_v36 = vsub.f32 1.0, %v1837_v29  ;;  %v1873_v59 = vmul.f32 %v4053_v45, %v1670_v14  ;;  %vm1861_vm11 = vmor %vm1859_vm9, %vm1860_vm15  ;;  %vm1877_vm9 = vweird.f32 %v1670_v14  ;;  %vm1882_vm15 = vcmp.eq.f32.partialorder %v1881_v18, 8.507059e+37  ;;  %v6469_v14 = vld [vmem:[#allocation35_spill] sm:$0xff] }
 0x39c   :  { %v1856_v4 = vsub.f32 1.0, %v1855_v38 }
 0x39d   :  { %v1839_v23 = vmul.f32 %v4049_v47, %v1838_v36  ;;  %v1874_v32 = vsub.f32 1.0, %v1873_v59  ;;  %v6471_v59 = vld [vmem:[#allocation30_spill] sm:$0xff] }
 0x39e   :  { %v1857_v6 = vmul.f32 %v4051_v1, %v1856_v4 }
 0x39f   :  { %v1840_v42 = vadd.f32 %v4049_v47, %v1839_v23 }
 0x3a0   :  { %v1858_v53 = vadd.f32 %v4051_v1, %v1857_v6  ;;  %v1899_v6 = vand.u32 2147483647, %v5293_v8 }
 0x3a1   :  { %v1844_v48 = vsel %vm1843_vm13, %v4049_v47, %v1840_v42  ;;  %vm1878_vm13 = vweird.f32 %v4053_v45 }
 0x3a2   :  { %v1849_v50 = vsel %vm1846_vm14, %v1848_v12, %v1844_v48  ;;  %v1862_v3 = vsel %vm1861_vm11, %v4051_v1, %v1858_v53  ;;  %vm1879_vm14 = vmor %vm1877_vm9, %vm1878_vm13  ;;  %v6470_v1 = vld [vmem:[#allocation28_spill] sm:$0xff]  ;;  %vm1900_vm9 = vcmp.eq.f32.partialorder %v1899_v6, 8.507059e+37  ;;  %v5359_v53 = vperm.slane %v5287_v11, 6 }
 0x3a3   :  { %v5296_v62 = vmul.f32 %v4776_v46, %v1849_v50  ;;  %v5299_v39 = vmul.f32 %v4773_v60, %v1849_v50  ;;  %v5302_v40 = vmul.f32 %v4771_v25, %v1849_v50  ;;  %v1875_v46 = vmul.f32 %v4053_v45, %v1874_v32  ;;  %v4055_v25 = vpop.eup %4054 }
 0x3a4   :  { %v5309_v60 = vperm.slane %v5287_v11, 4  ;;  %v1867_v33 = vsel %vm1864_vm12, %v1866_v24, %v1862_v3  ;;  %v5315_v34 = vmul.f32 %v4785_v0, %v1849_v50  ;;  %v1891_v9 = vmul.f32 %v4055_v25, %v5293_v8 }
 0x3a5   :  { %2144 = vperm.xlu2 %3786, %v5296_v62   ;;  %2141 = vperm.xlu1 %3787, %v5299_v39   ;;  %v1876_v58 = vadd.f32 %v4053_v45, %v1875_v46  ;;  %v5312_v15 = vmul.f32 %v4788_v43, %v1867_v33  ;;  %v5319_v27 = vmul.f32 %v4783_v19, %v1867_v33  ;;  %v1884_v0 = vor.u32 1.1754944e-38, %v1883_v20  ;;  %v6472_v46 = vld [vmem:[#allocation33_spill] sm:$0xff] }
 0x3a6   :  { %2147 = vperm.xlu0 %3788, %v5302_v40   ;;  %4056 = vrcp.f32 %v5309_v60  ;;  %v1892_v19 = vsub.f32 1.0, %v1891_v9  ;;  %v5329_v35 = vmul.f32 %v4801_v30, %v1867_v33  ;;  %v5332_v47 = vmul.f32 %v6469_v14, %v1867_v33 }
 0x3a7   :  { %v1880_v43 = vsel %vm1879_vm14, %v4053_v45, %v1876_v58  ;;  %4058 = vrcp.f32 %v5326_v26  ;;  %vm1896_vm11 = vweird.f32 %v4055_v25  ;;  %vm1895_vm12 = vweird.f32 %v5293_v8 }
 0x3a8   :  { %v1885_v13 = vsel %vm1882_vm15, %v1884_v0, %v1880_v43  ;;  %v1893_v38 = vmul.f32 %v4055_v25, %v1892_v19  ;;  %vm1897_vm13 = vmor %vm1895_vm12, %vm1896_vm11  ;;  %v1919_v22 = vand.u32 2147483648, %v5309_v60  ;;  %vm1913_vm15 = vweird.f32 %v5309_v60 }
 0x3a9   :  { %v5335_v29 = vmul.f32 %v6470_v1, %v1885_v13  ;;  %v5344_v23 = vmul.f32 %v4814_v17, %v1885_v13  ;;  %v5347_v52 = vmul.f32 %v4811_v57, %v1885_v13  ;;  %v5352_v42 = vmul.f32 %v6471_v59, %v1885_v13 }
 0x3aa   :  { %v1894_v36 = vadd.f32 %v4055_v25, %v1893_v38  ;;  %v1902_v17 = vor.u32 1.1754944e-38, %v1901_v63  ;;  %v1917_v24 = vand.u32 2147483647, %v5309_v60  ;;  %4060 = vrcp.f32 %v5359_v53 }
 0x3ab   :  { %v5378_v58 = vperm.slane %v5287_v11, 7  ;;  %v1937_v0 = vand.u32 2147483648, %v5326_v26  ;;  %v1935_v11 = vand.u32 2147483647, %v5326_v26 }
 0x3ac   :  { %v4057_v21 = vpop.eup %4056  ;;  %v1898_v12 = vsel %vm1897_vm13, %v4055_v25, %v1894_v36  ;;  %vm1918_vm12 = vcmp.eq.f32.partialorder %v1917_v24, 8.507059e+37 }
 0x3ad   :  { %2153 = vperm.xlu2 %3786, %v5312_v15   ;;  %2150 = vperm.xlu1 %3787, %v5315_v34   ;;  %v1909_v45 = vmul.f32 %v4057_v21, %v5309_v60  ;;  %v4059_v4 = vpop.eup %4058  ;;  %v1903_v8 = vsel %vm1900_vm9, %v1902_v17, %v1898_v12  ;;  %vm1914_vm14 = vweird.f32 %v4057_v21  ;;  %4062 = vrcp.f32 %v5378_v58 }
 0x3ae   :  { %2156 = vperm.xlu0 %3788, %v5319_v27   ;;  %v1927_v57 = vmul.f32 %v4059_v4, %v5326_v26  ;;  %v5363_v51 = vmul.f32 %v4827_v2, %v1903_v8  ;;  %v5366_v3 = vmul.f32 %v4824_v10, %v1903_v8  ;;  %v5372_v33 = vmul.f32 %v6472_v46, %v1903_v8  ;;  %vm1915_vm11 = vmor %vm1913_vm15, %vm1914_vm14 }
 0x3af   :  { %v1910_v30 = vsub.f32 1.0, %v1909_v45  ;;  %v1920_v2 = vor.u32 1.1754944e-38, %v1919_v22  ;;  %vm1932_vm13 = vweird.f32 %v4059_v4  ;;  %v5384_v43 = vmul.f32 %v4836_v41, %v1903_v8 }
 0x3b0   :  { %v1928_v32 = vsub.f32 1.0, %v1927_v57  ;;  %v4061_v20 = vpop.eup %4060  ;;  %vm1931_vm9 = vweird.f32 %v5326_v26  ;;  %v1938_v19 = vor.u32 1.1754944e-38, %v1937_v0  ;;  %vm1936_vm15 = vcmp.eq.f32.partialorder %v1935_v11, 8.507059e+37  ;;  %v6473_v57 = vld [vmem:[#allocation38_spill] sm:$0xff]  ;;  %v6479_v11 = vld [vmem:[#allocation15_spill] sm:$0xff] }
 0x3b1   :  { %v1911_v48 = vmul.f32 %v4057_v21, %v1910_v30  ;;  %vm1933_vm14 = vmor %vm1931_vm9, %vm1932_vm13  ;;  %v1973_v17 = vand.u32 2147483648, %v5378_v58  ;;  %v2404_v22 = vpack.c.bf16 %v5312_v15, %v5312_v15 }
 0x3b2   :  { %v1929_v10 = vmul.f32 %v4059_v4, %v1928_v32  ;;  %v6476_v32 = vld [vmem:[#allocation40_spill] sm:$0xff] }
 0x3b3   :  { %v1912_v50 = vadd.f32 %v4057_v21, %v1911_v48 }
 0x3b4   :  { %v1930_v18 = vadd.f32 %v4059_v4, %v1929_v10  ;;  %v2886_v10 = vunpack.c.l.b16 %v2404_v22 }
 0x3b5   :  { %2162 = vperm.xlu2 %3786, %v5329_v35   ;;  %2159 = vperm.xlu1 %3787, %v5332_v47   ;;  %v1916_v25 = vsel %vm1915_vm11, %v4057_v21, %v1912_v50  ;;  %vm1950_vm11 = vweird.f32 %v4061_v20  ;;  %v1971_v50 = vand.u32 2147483647, %v5378_v58 }
 0x3b6   :  { %2165 = vperm.xlu0 %3788, %v5335_v29   ;;  %v1921_v60 = vsel %vm1918_vm12, %v1920_v2, %v1916_v25  ;;  %v1934_v41 = vsel %vm1933_vm14, %v4059_v4, %v1930_v18  ;;  %vm1949_vm12 = vweird.f32 %v5359_v53  ;;  %v1953_v4 = vand.u32 2147483647, %v5359_v53  ;;  %v6478_v18 = vld [vmem:[#allocation21_spill] sm:$0xff] }
 0x3b7   :  { %v5381_v9 = vmul.f32 %v4839_v61, %v1921_v60  ;;  %v5389_v13 = vmul.f32 %v4834_v16, %v1921_v60  ;;  %v1945_v61 = vmul.f32 %v4061_v20, %v5359_v53  ;;  %v1939_v21 = vsel %vm1936_vm15, %v1938_v19, %v1934_v41  ;;  %v4063_v16 = vpop.eup %4062  ;;  %vm1951_vm13 = vmor %vm1949_vm12, %vm1950_vm11 }
 0x3b8   :  { %v5398_v1 = vmul.f32 %v4852_v28, %v1921_v60  ;;  %v5401_v26 = vmul.f32 %v4849_v5, %v1921_v60  ;;  %v5404_v38 = vmul.f32 %v4847_v31, %v1939_v21  ;;  %v1963_v36 = vmul.f32 %v4063_v16, %v5378_v58 }
 0x3b9   :  { %v1946_v14 = vsub.f32 1.0, %v1945_v61  ;;  %v1955_v28 = vand.u32 2147483648, %v5359_v53  ;;  %v5412_v5 = vmul.f32 %v4865_v44, %v1939_v21  ;;  %v5415_v31 = vmul.f32 %v4862_v37, %v1939_v21 }
 0x3ba   :  { %v1964_v63 = vsub.f32 1.0, %v1963_v36  ;;  %v5420_v6 = vmul.f32 %v4860_v7, %v1939_v21  ;;  %vm1954_vm9 = vcmp.eq.f32.partialorder %v1953_v4, 8.507059e+37  ;;  %vm1968_vm14 = vweird.f32 %v4063_v16  ;;  %v6474_v7 = vld [vmem:[#allocation37_spill] sm:$0xff] }
 0x3bb   :  { %v1947_v45 = vmul.f32 %v4061_v20, %v1946_v14  ;;  %v1956_v44 = vor.u32 1.1754944e-38, %v1955_v28  ;;  %vm1967_vm15 = vweird.f32 %v5378_v58  ;;  %v1974_v2 = vor.u32 1.1754944e-38, %v1973_v17 }
 0x3bc   :  { %v1965_v12 = vmul.f32 %v4063_v16, %v1964_v63  ;;  %vm1969_vm11 = vmor %vm1967_vm15, %vm1968_vm14  ;;  %vm1972_vm12 = vcmp.eq.f32.partialorder %v1971_v50, 8.507059e+37  ;;  %v2401_v60 = vpack.c.bf16 %v5296_v62, %v5296_v62  ;;  %v3637_v41 = vunpack.i.l.s16 %v2886_v10 }
 0x3bd   :  { %2171 = vperm.xlu2 %3786, %v5344_v23   ;;  %2168 = vperm.xlu1 %3787, %v5347_v52   ;;  %v1948_v30 = vadd.f32 %v4061_v20, %v1947_v45  ;;  %v2407_v19 = vpack.c.bf16 %v5329_v35, %v5329_v35  ;;  %v2402_v35 = vpack.c.bf16 %v5302_v40, %v5302_v40 }
 0x3be   :  { %2174 = vperm.xlu0 %3788, %v5352_v42   ;;  %v1966_v48 = vadd.f32 %v4063_v16, %v1965_v12  ;;  %v2837_v62 = vunpack.c.l.b16 %v2401_v60  ;;  %v2410_v28 = vpack.c.bf16 %v5344_v23, %v5344_v23  ;;  %v2411_v50 = vpack.c.bf16 %v5352_v42, %v5352_v42 }
 0x3bf   :  { %v1952_v59 = vsel %vm1951_vm13, %v4061_v20, %v1948_v30  ;;  %v2400_v20 = vpack.c.bf16 %v5299_v39, %v5299_v39  ;;  %v2889_v21 = vunpack.c.l.b16 %v2407_v19  ;;  %v2403_v30 = vpack.c.bf16 %v5315_v34, %v5315_v34 }
 0x3c0   :  { %v1957_v37 = vsel %vm1954_vm9, %v1956_v44, %v1952_v59  ;;  %v1970_v46 = vsel %vm1969_vm11, %v4063_v16, %v1966_v48  ;;  %v3633_v45 = vunpack.i.l.s16 %v2837_v62  ;;  %v2838_v59 = vunpack.c.l.b16 %v2402_v35 }
 0x3c1   :  { %v5427_v53 = vmul.f32 %v6473_v57, %v1957_v37  ;;  %v5430_v8 = vmul.f32 %v6474_v7, %v1957_v37  ;;  %v5437_v24 = vmul.f32 %v6476_v32, %v1957_v37  ;;  %v5444_v58 = vsel %vm1972_vm12, %v1974_v2, %v1970_v46 }
 0x3c2   :  { %v5455_v0 = vmul.f32 %v6478_v18, %v5444_v58  ;;  %v5458_v61 = vmul.f32 %v6479_v11, %v1957_v37  ;;  %v2836_v39 = vunpack.c.l.b16 %v2400_v20  ;;  %v3640_v63 = vunpack.i.l.s16 %v2889_v21 }
 0x3c3   :  { %6475 = vst [vmem:[#allocation35_spill] sm:$0xff] %v5430_v8  ;;  %v2839_v12 = vunpack.c.l.b16 %v2403_v30  ;;  %v2938_v44 = vunpack.c.l.b16 %v2410_v28  ;;  %v2405_v34 = vpack.c.bf16 %v5319_v27, %v5319_v27  ;;  %v3634_v23 = vunpack.i.l.s16 %v2838_v59 }
 0x3c4   :  { %6477 = vst [vmem:[#allocation28_spill] sm:$0xff] %v5437_v24  ;;  %v3632_v36 = vunpack.i.l.s16 %v2836_v39  ;;  %v2406_v57 = vpack.c.bf16 %v5332_v47, %v5332_v47  ;;  %v2939_v10 = vunpack.c.l.b16 %v2411_v50  ;;  %v2408_v19 = vpack.c.bf16 %v5335_v29, %v5335_v29 }
 0x3c5   :  { %2180 = vperm.xlu2 %3786, %v5363_v51   ;;  %2177 = vperm.xlu1 %3787, %v5366_v3   ;;  %v3635_v17 = vunpack.i.l.s16 %v2839_v12  ;;  %v3644_v7 = vunpack.i.l.s16 %v2938_v44  ;;  %v2887_v22 = vunpack.c.l.b16 %v2405_v34  ;;  %v2409_v62 = vpack.c.bf16 %v5347_v52, %v5347_v52 }
 0x3c6   :  { %2183 = vperm.xlu0 %3788, %v5372_v33   ;;  %v2888_v46 = vunpack.c.l.b16 %v2406_v57  ;;  %v3645_v21 = vunpack.i.l.s16 %v2939_v10  ;;  %v2936_v35 = vunpack.c.l.b16 %v2408_v19  ;;  %v2412_v59 = vpack.c.bf16 %v5366_v3, %v5366_v3  ;;  %v6480_v57 = vld [vmem:[#allocation32_spill] sm:$0xff] }
 0x3c7   :  { %v3638_v60 = vunpack.i.l.s16 %v2887_v22  ;;  %v2937_v30 = vunpack.c.l.b16 %v2409_v62 }
 0x3c8   :  { %v3642_v34 = vunpack.i.l.s16 %v2936_v35 }
 0x3cd   :  { %2189 = vperm.xlu2 %3786, %v5381_v9   ;;  %2186 = vperm.xlu1 %3787, %v5384_v43  }
 0x3ce   :  { %2192 = vperm.xlu0 %3788, %v5389_v13  }
 0x3d5   :  { %2198 = vperm.xlu2 %3786, %v5398_v1   ;;  %2195 = vperm.xlu1 %3787, %v5401_v26  }
 0x3d6   :  { %2201 = vperm.xlu0 %3788, %v5404_v38  }
 0x3dd   :  { %2207 = vperm.xlu2 %3786, %v5412_v5   ;;  %2204 = vperm.xlu1 %3787, %v5415_v31  }
 0x3de   :  { %2210 = vperm.xlu0 %3788, %v5420_v6  }
 0x3e0   :  { %v5441_v25 = vpop.xlane.xlu0 %1653 }
 0x3e1   :  { %v5447_v15 = vperm.slane %v5441_v25, 1  ;;  %v5466_v14 = vperm.slane %v5441_v25, 2  ;;  %v5480_v40 = vperm.slane %v5441_v25, 3  ;;  %v5497_v47 = vperm.slane %v5441_v25, 0 }
 0x3e2   :  { %v5500_v42 = vperm.slane %v5441_v25, 4 }
 0x3e3   :  { %4064 = vrcp.f32 %v5447_v15  ;;  %v1721_v39 = vand.u32 2147483648, %v5447_v15  ;;  %vm1715_vm9 = vweird.f32 %v5447_v15  ;;  %vm1733_vm12 = vweird.f32 %v5466_v14 }
 0x3e4   :  { %4066 = vrcp.f32 %v5466_v14  ;;  %v1737_v3 = vand.u32 2147483647, %v5466_v14 }
 0x3e5   :  { %2216 = vperm.xlu2 %3786, %v5427_v53   ;;  %2213 = vperm.xlu1 %3787, %v5430_v8   ;;  %4068 = vrcp.f32 %v5480_v40  ;;  %v1722_v28 = vor.u32 1.1754944e-38, %v1721_v39 }
 0x3e6   :  { %2219 = vperm.xlu0 %3788, %v5437_v24   ;;  %4070 = vrcp.f32 %v5497_v47 }
 0x3e7   :  { %4072 = vrcp.f32 %v5500_v42 }
 0x3e9   :  { %v5468_v16 = vpop.eup %4064 }
 0x3ea   :  { %v1711_v4 = vmul.f32 %v5468_v16, %v5447_v15  ;;  %v5484_v48 = vpop.eup %4066  ;;  %vm1716_vm13 = vweird.f32 %v5468_v16 }
 0x3eb   :  { %v1729_v32 = vmul.f32 %v5484_v48, %v5466_v14  ;;  %v5504_v11 = vpop.eup %4068  ;;  %vm1717_vm14 = vmor %vm1715_vm9, %vm1716_vm13  ;;  %vm1734_vm11 = vweird.f32 %v5484_v48  ;;  %vm1738_vm9 = vcmp.eq.f32.partialorder %v1737_v3, 8.507059e+37 }
 0x3ec   :  { %v1712_v37 = vsub.f32 1.0, %v1711_v4  ;;  %v1747_v52 = vmul.f32 %v5504_v11, %v5480_v40  ;;  %v5523_v4 = vpop.eup %4070  ;;  %vm1735_vm13 = vmor %vm1733_vm12, %vm1734_vm11 }
 0x3ed   :  { %2225 = vperm.xlu2 %3786, %v5455_v0   ;;  %2222 = vperm.xlu1 %3787, %v5458_v61   ;;  %v1730_v18 = vsub.f32 1.0, %v1729_v32  ;;  %v5529_v44 = vpop.eup %4072  ;;  %v1693_v50 = vmul.f32 %v5523_v4, %v5497_v47  ;;  %v2986_v32 = vunpack.c.l.b16 %v2412_v59 }
 0x3ee   :  { %2897 = vperm.xlu0 %3788, %v3637_v41   ;;  %v1713_v27 = vmul.f32 %v5468_v16, %v1712_v37  ;;  %v3639_v41 = vunpack.i.l.s16 %v2888_v46  ;;  %v1748_v12 = vsub.f32 1.0, %v1747_v52  ;;  %v3643_v37 = vunpack.i.l.s16 %v2937_v30 }
 0x3ef   :  { %v2414_v46 = vpack.c.bf16 %v5372_v33, %v5372_v33  ;;  %v3647_v62 = vunpack.i.l.s16 %v2986_v32  ;;  %v1757_v33 = vand.u32 2147483648, %v5480_v40 }
 0x3f0   :  { %v1714_v20 = vadd.f32 %v5468_v16, %v1713_v27  ;;  %v1749_v22 = vmul.f32 %v5504_v11, %v1748_v12  ;;  %v1765_v27 = vmul.f32 %v5529_v44, %v5500_v42 }
 0x3f1   :  { %v2988_v39 = vunpack.c.l.b16 %v2414_v46  ;;  %v6484_v46 = vld [vmem:[#allocation46_spill] sm:$0xff] }
 0x3f2   :  { %v1718_v29 = vsel %vm1717_vm14, %v5468_v16, %v1714_v20  ;;  %v5552_v20 = vperm.slane %v5441_v25, 5  ;;  %vm1752_vm14 = vweird.f32 %v5504_v11  ;;  %v1766_v19 = vsub.f32 1.0, %v1765_v27 }
 0x3f3   :  { %v3649_v59 = vunpack.i.l.s16 %v2988_v39 }
 0x3f4   :  { %4074 = vrcp.f32 %v5552_v20 }
 0x3f5   :  { %2850 = vperm.xlu2 %3786, %v3633_v45   ;;  %2847 = vperm.xlu1 %3787, %v3632_v36   ;;  %v1719_v45 = vand.u32 2147483647, %v5447_v15  ;;  %v1731_v36 = vmul.f32 %v5484_v48, %v1730_v18 }
 0x3f6   :  { %2906 = vperm.xlu0 %3788, %v3640_v63  }
 0x3f7   :  { %vm1720_vm15 = vcmp.eq.f32.partialorder %v1719_v45, 8.507059e+37  ;;  %v1732_v16 = vadd.f32 %v5484_v48, %v1731_v36  ;;  %v6481_v45 = vld [vmem:[#allocation19_spill] sm:$0xff]  ;;  %v1755_v36 = vand.u32 2147483647, %v5480_v40 }
 0x3f8   :  { %v5521_v15 = vsel %vm1720_vm15, %v1722_v28, %v1718_v29  ;;  %vm1751_vm15 = vweird.f32 %v5480_v40  ;;  %v1767_v28 = vmul.f32 %v5529_v44, %v1766_v19  ;;  %v5577_v40 = vperm.slane %v5441_v25, 6 }
 0x3f9   :  { %vm5566_vm11 = vmor %vm1751_vm15, %vm1752_vm14  ;;  %vm1756_vm12 = vcmp.eq.f32.partialorder %v1755_v36, 8.507059e+37  ;;  %vm1697_vm14 = vweird.f32 %v5497_v47  ;;  %vm1769_vm15 = vweird.f32 %v5500_v42  ;;  %v1773_v19 = vand.u32 2147483647, %v5500_v42 }
 0x3fa   :  { %v5594_v27 = vpop.eup %4074  ;;  %4076 = vrcp.f32 %v5577_v40 }
 0x3fd   :  { %2856 = vperm.xlu2 %3786, %v3635_v17   ;;  %2853 = vperm.xlu1 %3787, %v3634_v23   ;;  %v2413_v23 = vpack.c.bf16 %v5363_v51, %v5363_v51  ;;  %v1739_v17 = vand.u32 2147483648, %v5466_v14  ;;  %v1736_v51 = vsel %vm1735_vm13, %v5484_v48, %v1732_v16  ;;  %v1694_v48 = vsub.f32 1.0, %v1693_v50 }
 0x3fe   :  { %2953 = vperm.xlu0 %3788, %v3644_v7   ;;  %v5536_v7 = vmul.f32 %v6480_v57, %v5521_v15  ;;  %v1775_v57 = vand.u32 2147483648, %v5500_v42  ;;  %vm1698_vm13 = vweird.f32 %v5523_v4 }
 0x3ff   :  { %v5494_v2 = vpop.permute.xlu2 %2144  ;;  %v2987_v10 = vunpack.c.l.b16 %v2413_v23  ;;  %v1695_v35 = vmul.f32 %v5523_v4, %v1694_v48  ;;  %v6485_v48 = vld [vmem:[#allocation24_spill] sm:$0xff] }
 0x400   :  { %v1776_v52 = vor.u32 1.1754944e-38, %v1775_v57  ;;  %v6490_v57 = vld [vmem:[#allocation48_spill] sm:$0xff] }
 0x401   :  { %v1696_v50 = vadd.f32 %v5523_v4, %v1695_v35 }
 0x405   :  { %2903 = vperm.xlu2 %3786, %v3639_v41   ;;  %2900 = vperm.xlu1 %3787, %v3638_v60   ;;  %v1740_v60 = vor.u32 1.1754944e-38, %v1739_v17  ;;  %v1750_v41 = vadd.f32 %v5504_v11, %v1749_v22  ;;  %v1768_v22 = vadd.f32 %v5529_v44, %v1767_v28  ;;  %v5634_v28 = vperm.slane %v5441_v25, 7  ;;  %v6491_v25 = vld [vmem:[#allocation26_spill] sm:$0xff] }
 0x406   :  { %2956 = vperm.xlu0 %3788, %v3645_v21   ;;  %v3648_v21 = vunpack.i.l.s16 %v2987_v10  ;;  %v5599_v10 = vmul.f32 %v6484_v46, %v5521_v15 }
 0x407   :  { %v5519_v63 = vpop.permute.xlu2 %2153  ;;  %v5554_v18 = vsel %vm1738_vm9, %v1740_v60, %v1736_v51  ;;  %v1754_v30 = vsel %vm5566_vm11, %v5504_v11, %v1750_v41  ;;  %vm1770_vm9 = vweird.f32 %v5529_v44  ;;  %v1701_v60 = vand.u32 2147483647, %v5497_v47  ;;  %vm5609_vm11 = vmor %vm1697_vm14, %vm1698_vm13 }
 0x408   :  { %v5561_v29 = vmul.f32 %v6481_v45, %v5554_v18  ;;  %4078 = vrcp.f32 %v5634_v28  ;;  %vm1788_vm14 = vweird.f32 %v5594_v27 }
 0x409   :  { %vm1702_vm13 = vcmp.eq.f32.partialorder %v1701_v60, 8.507059e+37 }
 0x40d   :  { %2950 = vperm.xlu2 %3786, %v3643_v37   ;;  %2947 = vperm.xlu1 %3787, %v3642_v34   ;;  %v1758_v34 = vor.u32 1.1754944e-38, %v1757_v33  ;;  %v2293_v37 = vperm.slane %v5494_v2, %v4533_v55  ;;  %v1703_v2 = vand.u32 2147483648, %v5497_v47  ;;  %v1700_v47 = vsel %vm5609_vm11, %v5523_v4, %v1696_v50 }
 0x40e   :  { %2066 = vperm.xlu0 %3788, %v5536_v7   ;;  %v1783_v33 = vmul.f32 %v5594_v27, %v5552_v20 }
 0x40f   :  { %v5549_v14 = vpop.permute.xlu2 %2162  ;;  %v5586_v3 = vsel %vm1756_vm12, %v1758_v34, %v1754_v30  ;;  %vm5615_vm12 = vmor %vm1769_vm15, %vm1770_vm9  ;;  %vm1774_vm9 = vcmp.eq.f32.partialorder %v1773_v19, 8.507059e+37  ;;  %vm1787_vm15 = vweird.f32 %v5552_v20 }
 0x410   :  { %v5605_v41 = vmul.f32 %v6485_v48, %v5586_v3  ;;  %v1772_v42 = vsel %vm5615_vm12, %v5529_v44, %v1768_v22  ;;  %v2299_v44 = vperm.slane %v5519_v63, %v4523_v49  ;;  %v6492_v63 = vld [vmem:[#allocation34_spill] sm:$0xff]  ;;  %v2304_v19 = vperm.slane %v5549_v14, %v4536_v56  ;;  %vm1789_vm11 = vmor %vm1787_vm15, %vm1788_vm14 }
 0x411   :  { %v1793_v14 = vand.u32 2147483648, %v5552_v20 }
 0x415   :  { %3000 = vperm.xlu2 %3786, %v3648_v21   ;;  %2997 = vperm.xlu1 %3787, %v3647_v62   ;;  %v1704_v21 = vor.u32 1.1754944e-38, %v1703_v2 }
 0x416   :  { %2075 = vperm.xlu0 %3788, %v5561_v29  }
 0x417   :  { %v5579_v16 = vpop.permute.xlu2 %2171  ;;  %v2142_v12 = vpop.permute.xlu1 %2141  ;;  %v5631_v4 = vsel %vm1702_vm13, %v1704_v21, %v1700_v47 }
 0x418   :  { %v2292_v23 = vperm.slane %v2142_v12, %v4523_v49  ;;  %v2148_v17 = vpop.permute.xlu0 %2147  ;;  %v5639_v12 = vsel %vm1774_vm9, %v1776_v52, %v1772_v42  ;;  %v5651_v50 = vmul.f32 %v6491_v25, %v5631_v4  ;;  %v6494_v52 = vld [vmem:[#allocation29_spill] sm:$0xff]  ;;  %vm1805_vm9 = vweird.f32 %v5577_v40 }
 0x419   :  { %v2295_v11 = vperm.slane %v2148_v17, %v4530_v54 }
 0x41a   :  { %v2294_v51 = vsel %vm897_vm0, %v2293_v37, %v2292_v23  ;;  %v1784_v37 = vsub.f32 1.0, %v1783_v33  ;;  %v5642_v23 = vpop.eup %4076  ;;  %v6493_v33 = vld [vmem:[#allocation43_spill] sm:$0xff] }
 0x41b   :  { %v2296_v32 = vsel %vm901_vm1, %v2295_v11, %v2294_v51  ;;  %v5647_v11 = vmul.f32 %v6490_v57, %v5586_v3  ;;  %v5655_v51 = vmul.f32 %v6492_v63, %v5639_v12  ;;  %v1801_v2 = vmul.f32 %v5642_v23, %v5577_v40  ;;  %v5672_v42 = vpop.eup %4078 }
 0x41c   :  { %v1785_v22 = vmul.f32 %v5594_v27, %v1784_v37  ;;  %v1791_v37 = vand.u32 2147483647, %v5552_v20  ;;  %v1819_v25 = vmul.f32 %v5672_v42, %v5634_v28  ;;  %vm1806_vm13 = vweird.f32 %v5642_v23 }
 0x41d   :  { %3003 = vperm.xlu1 %3787, %v3649_v59   ;;  %2063 = vperm.xlu2 %3786, %v5599_v10   ;;  %v1802_v47 = vsub.f32 1.0, %v1801_v2  ;;  %vm1807_vm14 = vmor %vm1805_vm9, %vm1806_vm13 }
 0x41e   :  { %2084 = vperm.xlu0 %3788, %v5605_v41   ;;  %v1786_v39 = vadd.f32 %v5594_v27, %v1785_v22  ;;  %v1794_v22 = vor.u32 1.1754944e-38, %v1793_v14  ;;  %vm1792_vm12 = vcmp.eq.f32.partialorder %v1791_v37, 8.507059e+37  ;;  %v1811_v14 = vand.u32 2147483648, %v5577_v40  ;;  %v6498_v37 = vld [vmem:[#allocation17_spill] sm:$0xff] }
 0x41f   :  { %v5628_v45 = vpop.permute.xlu2 %2180  ;;  %v2151_v36 = vpop.permute.xlu1 %2150  ;;  %v1803_v57 = vmul.f32 %v5642_v23, %v1802_v47  ;;  %v1820_v47 = vsub.f32 1.0, %v1819_v25 }
 0x420   :  { %v2297_v35 = vperm.slane %v2151_v36, %v4536_v56  ;;  %v2157_v30 = vpop.permute.xlu0 %2156  ;;  %v5677_v36 = vmul.f32 %v6493_v33, %v5586_v3 }
 0x421   :  { %v2300_v59 = vperm.slane %v2157_v30, %v4533_v55  ;;  %v6495_v30 = vld [vmem:[#allocation39_spill] sm:$0xff] }
 0x422   :  { %v2298_v34 = vsel %vm905_vm2, %v2297_v35, %v2296_v32  ;;  %v5681_v35 = vmul.f32 %v6494_v52, %v5631_v4  ;;  %v6497_v52 = vld [vmem:[#allocation27_spill] sm:$0xff] }
 0x423   :  { %v2301_v17 = vsel %vm897_vm0, %v2300_v59, %v2299_v44  ;;  %v5686_v44 = vmul.f32 %v6495_v30, %v5639_v12 }
 0x425   :  { %2081 = vperm.xlu2 %3786, %v5647_v11   ;;  %2045 = vperm.xlu1 %3787, %v5651_v50  }
 0x426   :  { %2093 = vperm.xlu0 %3788, %v5655_v51  }
 0x427   :  { %v5664_v32 = vpop.permute.xlu2 %2189  ;;  %v2160_v46 = vpop.permute.xlu1 %2159 }
 0x428   :  { %v2302_v60 = vperm.slane %v2160_v46, %v4530_v54  ;;  %v2166_v48 = vpop.permute.xlu0 %2165 }
 0x429   :  { %v2306_v20 = vperm.slane %v2166_v48, %v4523_v49 }
 0x42a   :  { %v2303_v62 = vsel %vm901_vm1, %v2302_v60, %v2301_v17  ;;  %v1790_v17 = vsel %vm1789_vm11, %v5594_v27, %v1786_v39  ;;  %v2309_v60 = vperm.slane %v5579_v16, %v4530_v54  ;;  %v1804_v39 = vadd.f32 %v5642_v23, %v1803_v57 }
 0x42b   :  { %v2305_v21 = vsel %vm905_vm2, %v2304_v19, %v2303_v62  ;;  %v5704_v19 = vsel %vm1792_vm12, %v1794_v22, %v1790_v17  ;;  %v5717_v16 = vmul.f32 %v6497_v52, %v5631_v4  ;;  %v1809_v57 = vand.u32 2147483647, %v5577_v40 }
 0x42c   :  { %v2355_v59 = vsel %vm1012_vm3, %v2305_v21, %v2298_v34  ;;  %v6496_v21 = vld [vmem:[#allocation49_spill] sm:$0xff]  ;;  %v5723_v17 = vmul.f32 %v6498_v37, %v5704_v19  ;;  %v1821_v22 = vmul.f32 %v5672_v42, %v1820_v47  ;;  %v2314_v40 = vperm.slane %v5628_v45, %v4533_v55  ;;  %v6499_v47 = vld [vmem:[#allocation51_spill] sm:$0xff]  ;;  %v6500_v45 = vld [vmem:[#allocation18_spill] sm:$0xff] }
 0x42d   :  { %2090 = vperm.xlu2 %3786, %v5677_v36   ;;  %2048 = vperm.xlu1 %3787, %v5681_v35   ;;  %v5713_v33 = vmul.f32 %v6496_v21, %v5639_v12  ;;  %vm1810_vm15 = vcmp.eq.f32.partialorder %v1809_v57, 8.507059e+37  ;;  %vm1824_vm11 = vweird.f32 %v5672_v42  ;;  %v5749_v21 = vmul.f32 %v6499_v47, %v5704_v19 }
 0x42e   :  { %2102 = vperm.xlu0 %3788, %v5686_v44   ;;  %v5753_v52 = vmul.f32 %v6500_v45, %v5631_v4  ;;  %vm1823_vm12 = vweird.f32 %v5634_v28  ;;  %v1827_v57 = vand.u32 2147483647, %v5634_v28  ;;  %v6503_v45 = vld [vmem:[#allocation20_spill] sm:$0xff] }
 0x42f   :  { %v5698_v63 = vpop.permute.xlu2 %2198  ;;  %v2169_v34 = vpop.permute.xlu1 %2168  ;;  %vm1825_vm13 = vmor %vm1823_vm12, %vm1824_vm11 }
 0x430   :  { %v2307_v2 = vperm.slane %v2169_v34, %v4533_v55  ;;  %v2175_v46 = vpop.permute.xlu0 %2174  ;;  %v1808_v34 = vsel %vm1807_vm14, %v5642_v23, %v1804_v39  ;;  %v1822_v23 = vadd.f32 %v5672_v42, %v1821_v22  ;;  %vm1828_vm9 = vcmp.eq.f32.partialorder %v1827_v57, 8.507059e+37 }
 0x431   :  { %v2311_v62 = vperm.slane %v2175_v46, %v4536_v56  ;;  %v1812_v46 = vor.u32 1.1754944e-38, %v1811_v14  ;;  %v1829_v14 = vand.u32 2147483648, %v5634_v28  ;;  %vm6524_vm14 = vcmask 1047559  }
 0x432   :  { %v2308_v27 = vsel %vm897_vm0, %v2307_v2, %v2306_v20  ;;  %v1826_v4 = vsel %vm1825_vm13, %v5672_v42, %v1822_v23  ;;  %v6502_v23 = vld [vmem:[#allocation54_spill] sm:$0xff] }
 0x433   :  { %v2310_v48 = vsel %vm901_vm1, %v2309_v60, %v2308_v27 }
 0x434   :  { %v2312_v30 = vsel %vm905_vm2, %v2311_v62, %v2310_v48  ;;  %v5741_v62 = vsel %vm1810_vm15, %v1812_v46, %v1808_v34  ;;  %vm6526_vm15 = vmmov %vm6524_vm14 }
 0x435   :  { %v2356_v25 = vsel %vm1014_vm5, %v2312_v30, %v2355_v59  ;;  %2099 = vperm.xlu2 %3786, %v5713_v33   ;;  %2051 = vperm.xlu1 %3787, %v5717_v16   ;;  %v6501_v30 = vld [vmem:[#allocation44_spill] sm:$0xff]  ;;  %v5777_v47 = vmul.f32 %v6502_v23, %v5741_v62 }
 0x436   :  { %2111 = vperm.xlu0 %3788, %v5723_v17   ;;  %v5758_v37 = vmul.f32 %v6501_v30, %v5741_v62  ;;  %v6508_v23 = vld [vmem:[#allocation52_spill] sm:$0xff] }
 0x437   :  { %v5735_v20 = vpop.permute.xlu2 %2207  ;;  %v2178_v2 = vpop.permute.xlu1 %2177 }
 0x438   :  { %v2313_v59 = vperm.slane %v2178_v2, %v4523_v49  ;;  %v2184_v60 = vpop.permute.xlu0 %2183  ;;  %v1830_v2 = vor.u32 1.1754944e-38, %v1829_v14  ;;  %v5781_v14 = vmul.f32 %v6503_v45, %v5521_v15 }
 0x439   :  { %v2316_v27 = vperm.slane %v2184_v60, %v4530_v54 }
 0x43a   :  { %v2315_v48 = vsel %vm897_vm0, %v2314_v40, %v2313_v59  ;;  %v2320_v59 = vperm.slane %v5664_v32, %v4523_v49  ;;  %v5770_v60 = vsel %vm1828_vm9, %v1830_v2, %v1826_v4  ;;  %v6504_v32 = vld [vmem:[#allocation16_spill] sm:$0xff] }
 0x43b   :  { %v2317_v39 = vsel %vm901_vm1, %v2316_v27, %v2315_v48  ;;  %v5785_v30 = vmul.f32 %v6504_v32, %v5770_v60  ;;  %v5805_v45 = vmul.f32 %v6508_v23, %v5770_v60 }
 0x43d   :  { %2108 = vperm.xlu2 %3786, %v5749_v21   ;;  %2054 = vperm.xlu1 %3787, %v5753_v52  }
 0x43e   :  { %2120 = vperm.xlu0 %3788, %v5758_v37  }
 0x43f   :  { %v2217_v34 = vpop.permute.xlu2 %2216  ;;  %v2187_v22 = vpop.permute.xlu1 %2186 }
 0x440   :  { %v2318_v46 = vperm.slane %v2187_v22, %v4536_v56  ;;  %v2193_v40 = vpop.permute.xlu0 %2192  ;;  %v2325_v22 = vperm.slane %v5698_v63, %v4536_v56  ;;  %v2368_v63 = vpack.c.bf16 %v5651_v50, %v5651_v50 }
 0x441   :  { %v2321_v28 = vperm.slane %v2193_v40, %v4533_v55  ;;  %v6506_v40 = vld [vmem:[#allocation56_spill] sm:$0xff] }
 0x442   :  { %v2319_v27 = vsel %vm905_vm2, %v2318_v46, %v2317_v39 }
 0x443   :  { %v2357_v48 = vsel %vm1016_vm4, %v2319_v27, %v2356_v25  ;;  %v2322_v42 = vsel %vm897_vm0, %v2321_v28, %v2320_v59  ;;  %v5799_v59 = vmul.f32 %v6506_v40, %v5741_v62  ;;  %v6507_v28 = vld [vmem:[#allocation31_spill] sm:$0xff] }
 0x444   :  { %v1725_v27 = vmul.f32 %v6507_v28, %v5521_v15  ;;  %v6509_v28 = vld [vmem:[#allocation58_spill] sm:$0xff] }
 0x445   :  { %2117 = vperm.xlu2 %3786, %v5777_v47   ;;  %2057 = vperm.xlu1 %3787, %v5781_v14   ;;  %v5821_v23 = vmul.f32 %v6509_v28, %v5770_v60 }
 0x446   :  { %2129 = vperm.xlu0 %3788, %v5785_v30   ;;  %v2373_v24 = vpack.c.bf16 %v1725_v27, %v1725_v27 }
 0x447   :  { %v2196_v25 = vpop.permute.xlu1 %2195  ;;  %v5790_v39 = vpop.permute.xlu2 %2225 }
 0x448   :  { %6505 = vst [vmem:[#allocation30_spill] sm:$0xff] %v5790_v39  ;;  %v2323_v57 = vperm.slane %v2196_v25, %v4530_v54  ;;  %v2202_v4 = vpop.permute.xlu0 %2201 }
 0x449   :  { %v2327_v25 = vperm.slane %v2202_v4, %v4523_v49  ;;  %v6510_v4 = vld [vmem:[#allocation36_spill] sm:$0xff] }
 0x44a   :  { %v2324_v2 = vsel %vm901_vm1, %v2323_v57, %v2322_v42  ;;  %v5825_v39 = vmul.f32 %v6510_v4, %v5554_v18 }
 0x44b   :  { %v2326_v46 = vsel %vm905_vm2, %v2325_v22, %v2324_v2  ;;  %v2436_v22 = vunpack.c.l.b16 %v2368_v63  ;;  %v2330_v2 = vperm.slane %v5735_v20, %v4530_v54  ;;  %v2370_v63 = vpack.c.bf16 %v5717_v16, %v5717_v16 }
 0x44c   :  { %v2358_v32 = vsel %vm1018_vm6, %v2326_v46, %v2357_v48 }
 0x44d   :  { %2126 = vperm.xlu2 %3786, %v5799_v59   ;;  %2060 = vperm.xlu1 %3787, %v1725_v27  }
 0x44e   :  { %2138 = vperm.xlu0 %3788, %v5805_v45  }
 0x44f   :  { %v2205_v42 = vpop.permute.xlu1 %2204  ;;  %v2851_v40 = vpop.permute.xlu2 %2850 }
 0x450   :  { %v2328_v57 = vperm.slane %v2205_v42, %v4533_v55  ;;  %v2211_v15 = vpop.permute.xlu0 %2210  ;;  %v3592_v42 = vunpack.i.l.s16 %v2436_v22 }
 0x451   :  { %v2332_v50 = vperm.slane %v2211_v15, %v4536_v56 }
 0x452   :  { %v2329_v48 = vsel %vm897_vm0, %v2328_v57, %v2327_v25  ;;  %v2371_v25 = vpack.c.bf16 %v5753_v52, %v5753_v52 }
 0x453   :  { %v2331_v46 = vsel %vm901_vm1, %v2330_v2, %v2329_v48  ;;  %v2438_v2 = vunpack.c.l.b16 %v2370_v63  ;;  %v2335_v48 = vperm.slane %v2217_v34, %v4533_v55  ;;  %v2374_v34 = vpack.c.bf16 %v5599_v10, %v5599_v10 }
 0x454   :  { %v2333_v20 = vsel %vm905_vm2, %v2332_v50, %v2331_v46  ;;  %v2439_v4 = vunpack.c.l.b16 %v2371_v25  ;;  %v6511_v46 = vld [vmem:[#allocation47_spill] sm:$0xff]  ;;  %v2487_v25 = vunpack.c.l.b16 %v2373_v24 }
 0x455   :  { %v2359_v57 = vsel %vm1020_vm7, %v2333_v20, %v2358_v32  ;;  %2135 = vperm.xlu2 %3786, %v5821_v23   ;;  %2069 = vperm.xlu1 %3787, %v5825_v39   ;;  %v3594_v32 = vunpack.i.l.s16 %v2438_v2  ;;  %v1743_v20 = vmul.f32 %v6511_v46, %v5554_v18 }
 0x456   :  { %2447 = vperm.xlu0 %3788, %v3592_v42   ;;  %v3595_v8 = vunpack.i.l.s16 %v2439_v4  ;;  %v3598_v27 = vunpack.i.l.s16 %v2487_v25  ;;  %v6512_v4 = vld [vmem:[#allocation41_spill] sm:$0xff] }
 0x457   :  { %v2214_v15 = vpop.permute.xlu1 %2213  ;;  %v2857_v42 = vpop.permute.xlu2 %2856 }
 0x458   :  { %v2334_v28 = vperm.slane %v2214_v15, %v4523_v49  ;;  %v2220_v16 = vpop.permute.xlu0 %2219 }
 0x459   :  { %v2337_v22 = vperm.slane %v2220_v16, %v4530_v54 }
 0x45a   :  { %v2336_v50 = vsel %vm897_vm0, %v2335_v48, %v2334_v28  ;;  %v2488_v28 = vunpack.c.l.b16 %v2374_v34 }
 0x45b   :  { %v2338_v52 = vsel %vm901_vm1, %v2337_v22, %v2336_v50  ;;  %v1745_v22 = vmul.f32 %v6512_v4, %v5554_v18  ;;  %v2377_v50 = vpack.c.bf16 %v1743_v20, %v1743_v20 }
 0x45c   :  { %v3599_v10 = vunpack.i.l.s16 %v2488_v28 }
 0x45d   :  { %2453 = vperm.xlu2 %3786, %v3594_v32   ;;  %2072 = vperm.xlu1 %3787, %v1743_v20   ;;  %v2537_v46 = vunpack.c.l.b16 %v2377_v50  ;;  %v6513_v20 = vld [vmem:[#allocation42_spill] sm:$0xff]  ;;  %v2379_v28 = vpack.c.bf16 %v1745_v22, %v1745_v22 }
 0x45e   :  { %2456 = vperm.xlu0 %3788, %v3595_v8   ;;  %v2375_v8 = vpack.c.bf16 %v5536_v7, %v5536_v7 }
 0x45f   :  { %v2223_v63 = vpop.permute.xlu1 %2222  ;;  %v2904_v24 = vpop.permute.xlu2 %2903  ;;  %v3603_v18 = vunpack.i.l.s16 %v2537_v46 }
 0x460   :  { %v2339_v15 = vperm.slane %v2223_v63, %v4536_v56  ;;  %v2898_v48 = vpop.permute.xlu0 %2897  ;;  %v2489_v63 = vunpack.c.l.b16 %v2375_v8 }
 0x462   :  { %v2340_v2 = vsel %vm905_vm2, %v2339_v15, %v2338_v52  ;;  %v2859_v52 = vperm.slane %v2851_v40, %v4533_v55  ;;  %v1762_v15 = vmul.f32 %v6513_v20, %v5586_v3  ;;  %v3600_v7 = vunpack.i.l.s16 %v2489_v63 }
 0x463   :  { %v5847_v16 = vsel %vm1022_vm8, %v2340_v2, %v2359_v57  ;;  %v2380_v2 = vpack.c.bf16 %v5647_v11, %v5647_v11  ;;  %v2539_v40 = vunpack.c.l.b16 %v2379_v28  ;;  %v6514_v11 = vld [vmem:[#allocation45_spill] sm:$0xff] }
 0x465   :  { %2500 = vperm.xlu2 %3786, %v3598_v27   ;;  %2078 = vperm.xlu1 %3787, %v1745_v22   ;;  %v2586_v8 = vunpack.c.l.b16 %v2380_v2  ;;  %v3605_v22 = vunpack.i.l.s16 %v2539_v40 }
 0x466   :  { %2503 = vperm.xlu0 %3788, %v3599_v10  }
 0x467   :  { %v2848_v32 = vpop.permute.xlu1 %2847  ;;  %v2951_v4 = vpop.permute.xlu2 %2950  ;;  %v3607_v63 = vunpack.i.l.s16 %v2586_v8  ;;  %v6515_v8 = vld [vmem:[#allocation50_spill] sm:$0xff] }
 0x468   :  { %v2858_v57 = vperm.slane %v2848_v32, %v4523_v49  ;;  %v2907_v34 = vpop.permute.xlu0 %2906  ;;  %v2863_v32 = vperm.slane %v2857_v42, %v4536_v56  ;;  %v2908_v42 = vperm.slane %v2898_v48, %v4523_v49 }
 0x46a   :  { %v2860_v25 = vsel %vm897_vm0, %v2859_v52, %v2858_v57  ;;  %v1779_v52 = vmul.f32 %v6514_v11, %v5639_v12  ;;  %v2382_v57 = vpack.c.bf16 %v1762_v15, %v1762_v15  ;;  %v2913_v12 = vperm.slane %v2907_v34, %v4536_v56 }
 0x46c   :  { %v2588_v28 = vunpack.c.l.b16 %v2382_v57  ;;  %v2959_v57 = vperm.slane %v2951_v4, %v4533_v55  ;;  %v2389_v4 = vpack.c.bf16 %v5749_v21, %v5749_v21 }
 0x46d   :  { %2550 = vperm.xlu2 %3786, %v3603_v18   ;;  %2087 = vperm.xlu1 %3787, %v1762_v15   ;;  %v2383_v18 = vpack.c.bf16 %v5677_v36, %v5677_v36 }
 0x46e   :  { %2506 = vperm.xlu0 %3788, %v3600_v7  }
 0x46f   :  { %v2854_v27 = vpop.permute.xlu1 %2853  ;;  %v2589_v2 = vunpack.c.l.b16 %v2383_v18  ;;  %v3001_v15 = vpop.permute.xlu2 %3000 }
 0x470   :  { %v2861_v50 = vperm.slane %v2854_v27, %v4530_v54  ;;  %v2954_v10 = vpop.permute.xlu0 %2953  ;;  %v2911_v27 = vperm.slane %v2904_v24, %v4530_v54  ;;  %v2386_v24 = vpack.c.bf16 %v5713_v33, %v5713_v33 }
 0x472   :  { %v2862_v46 = vsel %vm901_vm1, %v2861_v50, %v2860_v25  ;;  %v3609_v50 = vunpack.i.l.s16 %v2588_v28 }
 0x473   :  { %v5864_v3 = vsel %vm905_vm2, %v2863_v32, %v2862_v46  ;;  %v5878_v32 = vmul.f32 %v6515_v8, %v5704_v19  ;;  %v2385_v46 = vpack.c.bf16 %v1779_v52, %v1779_v52  ;;  %v3009_v8 = vperm.slane %v3001_v15, %v4533_v55 }
 0x475   :  { %2556 = vperm.xlu2 %3786, %v3605_v22   ;;  %2096 = vperm.xlu1 %3787, %v1779_v52   ;;  %v3610_v22 = vunpack.i.l.s16 %v2589_v2  ;;  %v2637_v11 = vunpack.c.l.b16 %v2385_v46  ;;  %v2638_v52 = vunpack.c.l.b16 %v2386_v24  ;;  %v6516_v2 = vld [vmem:[#allocation53_spill] sm:$0xff] }
 0x476   :  { %2597 = vperm.xlu0 %3788, %v3607_v63  }
 0x477   :  { %v2901_v20 = vpop.permute.xlu1 %2900 }
 0x478   :  { %v2909_v25 = vperm.slane %v2901_v20, %v4533_v55  ;;  %v2957_v7 = vpop.permute.xlu0 %2956  ;;  %v2961_v20 = vperm.slane %v2954_v10, %v4530_v54  ;;  %v2387_v10 = vpack.c.bf16 %v5686_v44, %v5686_v44 }
 0x479   :  { %v2963_v28 = vperm.slane %v2957_v7, %v4536_v56 }
 0x47a   :  { %v2910_v40 = vsel %vm897_vm0, %v2909_v25, %v2908_v42  ;;  %v3613_v25 = vunpack.i.l.s16 %v2637_v11  ;;  %v2639_v21 = vunpack.c.l.b16 %v2387_v10 }
 0x47b   :  { %v2912_v36 = vsel %vm901_vm1, %v2911_v27, %v2910_v40  ;;  %v1799_v27 = vmul.f32 %v6516_v2, %v5704_v19 }
 0x47c   :  { %v5881_v48 = vsel %vm905_vm2, %v2913_v12, %v2912_v36  ;;  %v5898_v12 = vpop.permute.xlu2 %2063  ;;  %v3614_v36 = vunpack.i.l.s16 %v2638_v52  ;;  %v3615_v44 = vunpack.i.l.s16 %v2639_v21 }
 0x47d   :  { %2603 = vperm.xlu2 %3786, %v3609_v50   ;;  %2105 = vperm.xlu1 %3787, %v5878_v32   ;;  %v2687_v50 = vunpack.c.l.b16 %v2389_v4 }
 0x47e   :  { %2606 = vperm.xlu0 %3788, %v3610_v22  }
 0x47f   :  { %v2948_v34 = vpop.permute.xlu1 %2947  ;;  %v3618_v24 = vunpack.i.l.s16 %v2687_v50 }
 0x480   :  { %v2958_v63 = vperm.slane %v2948_v34, %v4523_v49  ;;  %v5888_v18 = vpop.permute.xlu0 %2066  ;;  %v6517_v34 = vld [vmem:[#allocation55_spill] sm:$0xff] }
 0x481   :  { %v1816_v11 = vmul.f32 %v6517_v34, %v5741_v62 }
 0x482   :  { %v2960_v42 = vsel %vm897_vm0, %v2959_v57, %v2958_v63  ;;  %v2391_v57 = vpack.c.bf16 %v1799_v27, %v1799_v27  ;;  %v2392_v63 = vpack.c.bf16 %v5777_v47, %v5777_v47 }
 0x483   :  { %v2962_v33 = vsel %vm901_vm1, %v2961_v20, %v2960_v42  ;;  %v2394_v10 = vpack.c.bf16 %v1816_v11, %v1816_v11 }
 0x484   :  { %v5901_v40 = vsel %vm905_vm2, %v2963_v28, %v2962_v33  ;;  %v2082_v52 = vpop.permute.xlu2 %2081  ;;  %v2689_v20 = vunpack.c.l.b16 %v2391_v57  ;;  %v2736_v33 = vunpack.c.l.b16 %v2392_v63  ;;  %v2416_v63 = vpack.c.bf16 %v5381_v9, %v5381_v9 }
 0x485   :  { %2650 = vperm.xlu2 %3786, %v3613_v25   ;;  %2114 = vperm.xlu1 %3787, %v1799_v27   ;;  %v2257_v25 = vperm.slane %v2082_v52, %v4523_v49  ;;  %v6518_v27 = vld [vmem:[#allocation57_spill] sm:$0xff]  ;;  %v2738_v21 = vunpack.c.l.b16 %v2394_v10  ;;  %v2415_v9 = vpack.c.bf16 %v5384_v43, %v5384_v43 }
 0x486   :  { %2653 = vperm.xlu0 %3788, %v3614_v36   ;;  %v1833_v47 = vmul.f32 %v6518_v27, %v5770_v60  ;;  %v3620_v36 = vunpack.i.l.s16 %v2689_v20  ;;  %v3622_v50 = vunpack.i.l.s16 %v2736_v33  ;;  %v2376_v27 = vpack.c.bf16 %v5825_v39, %v5825_v39 }
 0x487   :  { %v2998_v7 = vpop.permute.xlu1 %2997  ;;  %v3624_v34 = vunpack.i.l.s16 %v2738_v21 }
 0x488   :  { %v3008_v19 = vperm.slane %v2998_v7, %v4523_v49  ;;  %v5907_v46 = vpop.permute.xlu0 %2075  ;;  %v2369_v7 = vpack.c.bf16 %v5681_v35, %v5681_v35 }
 0x48a   :  { %v3010_v22 = vsel %vm897_vm0, %v3009_v8, %v3008_v19  ;;  %v2395_v8 = vpack.c.bf16 %v5799_v59, %v5799_v59 }
 0x48c   :  { %v2739_v60 = vunpack.c.l.b16 %v2395_v8  ;;  %v5947_v21 = vpop.permute.xlu2 %2090 }
 0x48d   :  { %2700 = vperm.xlu2 %3786, %v3618_v24   ;;  %2123 = vperm.xlu1 %3787, %v1816_v11   ;;  %v2372_v11 = vpack.c.bf16 %v5781_v14, %v5781_v14 }
 0x48e   :  { %2656 = vperm.xlu0 %3788, %v3615_v44   ;;  %v2397_v44 = vpack.c.bf16 %v1833_v47, %v1833_v47  ;;  %v3625_v35 = vunpack.i.l.s16 %v2739_v60 }
 0x48f   :  { %v3004_v15 = vpop.permute.xlu1 %3003 }
 0x490   :  { %v3011_v28 = vperm.slane %v3004_v15, %v4530_v54  ;;  %v2085_v42 = vpop.permute.xlu0 %2084  ;;  %v2787_v52 = vunpack.c.l.b16 %v2397_v44  ;;  %v2486_v15 = vunpack.c.l.b16 %v2372_v11  ;;  %v2399_v44 = vpack.c.bf16 %v5805_v45, %v5805_v45 }
 0x491   :  { %v2258_v2 = vperm.slane %v2085_v42, %v4533_v55  ;;  %v3036_v42 = vunpack.c.l.b16 %v2416_v63 }
 0x492   :  { %v5918_v62 = vsel %vm901_vm1, %v3011_v28, %v3010_v22  ;;  %v2437_v22 = vunpack.c.l.b16 %v2369_v7  ;;  %v3628_v14 = vunpack.i.l.s16 %v2787_v52  ;;  %v2989_v7 = vunpack.c.l.b16 %v2415_v9 }
 0x493   :  { %v5923_v4 = vsel %vm897_vm0, %v2258_v2, %v2257_v25  ;;  %v3597_v2 = vunpack.i.l.s16 %v2486_v15  ;;  %v2789_v52 = vunpack.c.l.b16 %v2399_v44 }
 0x494   :  { %v3593_v57 = vunpack.i.l.s16 %v2437_v22  ;;  %v3650_v39 = vunpack.i.l.s16 %v2989_v7  ;;  %v5964_v45 = vpop.permute.xlu2 %2099 }
 0x495   :  { %2706 = vperm.xlu2 %3786, %v3620_v36   ;;  %2132 = vperm.xlu1 %3787, %v1833_v47   ;;  %v3652_v47 = vunpack.i.l.s16 %v3036_v42  ;;  %v2398_v36 = vpack.c.bf16 %v5821_v23, %v5821_v23  ;;  %v2418_v23 = vpack.c.bf16 %v5401_v26, %v5401_v26  ;;  %v3630_v42 = vunpack.i.l.s16 %v2789_v52 }
 0x496   :  { %2747 = vperm.xlu0 %3788, %v3622_v50   ;;  %v2536_v50 = vunpack.c.l.b16 %v2376_v27 }
 0x497   :  { %v2046_v19 = vpop.permute.xlu1 %2045 }
 0x498   :  { %v5929_v24 = vpop.permute.xlu0 %2093  ;;  %v2236_v20 = vperm.slane %v2046_v19, %v4523_v49  ;;  %v2788_v19 = vunpack.c.l.b16 %v2398_v36  ;;  %v3602_v60 = vunpack.i.l.s16 %v2536_v50 }
 0x49c   :  { %v5976_v50 = vpop.permute.xlu2 %2108 }
 0x49d   :  { %2753 = vperm.xlu2 %3786, %v3624_v34   ;;  %2450 = vperm.xlu1 %3787, %v3593_v57   ;;  %v2378_v34 = vpack.c.bf16 %v5561_v29, %v5561_v29  ;;  %v3629_v57 = vunpack.i.l.s16 %v2788_v19  ;;  %v2421_v29 = vpack.c.bf16 %v5415_v31, %v5415_v31 }
 0x49e   :  { %2756 = vperm.xlu0 %3788, %v3625_v35   ;;  %v3038_v35 = vunpack.c.l.b16 %v2418_v23 }
 0x49f   :  { %v2049_v59 = vpop.permute.xlu1 %2048  ;;  %v2538_v63 = vunpack.c.l.b16 %v2378_v34  ;;  %v3087_v9 = vunpack.c.l.b16 %v2421_v29  ;;  %v6519_v29 = vld [vmem:[#allocation22_spill] sm:$0xff] }
 0x4a0   :  { %v2237_v28 = vperm.slane %v2049_v59, %v4533_v55  ;;  %v5937_v33 = vpop.permute.xlu0 %2102 }
 0x4a1   :  { %v3604_v26 = vunpack.i.l.s16 %v2538_v63  ;;  %v3658_v36 = vunpack.i.l.s16 %v3087_v9  ;;  %v2388_v63 = vpack.c.bf16 %v5878_v32, %v5878_v32 }
 0x4a2   :  { %v2238_v25 = vsel %vm897_vm0, %v2237_v28, %v2236_v20  ;;  %v3654_v20 = vunpack.i.l.s16 %v3038_v35  ;;  %v2381_v28 = vpack.c.bf16 %v5605_v41, %v5605_v41  ;;  %v2425_v41 = vpack.c.bf16 %v5427_v53, %v5427_v53 }
 0x4a4   :  { %v2587_v27 = vunpack.c.l.b16 %v2381_v28  ;;  %v1978_v28 = vmul.f32 %v6519_v29, %v5444_v58 }
 0x4a5   :  { %2800 = vperm.xlu2 %3786, %v3628_v14   ;;  %2497 = vperm.xlu1 %3787, %v3597_v2  }
 0x4a6   :  { %3047 = vperm.xlu0 %3788, %v3652_v47   ;;  %v3608_v31 = vunpack.i.l.s16 %v2587_v27  ;;  %v2430_v27 = vpack.c.bf16 %v1978_v28, %v1978_v28 }
 0x4a7   :  { %v2052_v10 = vpop.permute.xlu1 %2051 }
 0x4a8   :  { %v2239_v8 = vperm.slane %v2052_v10, %v4530_v54  ;;  %v5950_v22 = vpop.permute.xlu0 %2111  ;;  %v2384_v10 = vpack.c.bf16 %v5655_v51, %v5655_v51  ;;  %v2246_v51 = vperm.slane %v5898_v12, %v4530_v54  ;;  %v2423_v12 = vpack.c.bf16 %v5420_v6, %v5420_v6 }
 0x4a9   :  { %v2390_v6 = vpack.c.bf16 %v5723_v17, %v5723_v17  ;;  %v2253_v17 = vperm.slane %v5907_v46, %v4530_v54 }
 0x4aa   :  { %v2240_v43 = vsel %vm901_vm1, %v2239_v8, %v2238_v25  ;;  %v2419_v25 = vpack.c.bf16 %v5398_v1, %v5398_v1  ;;  %v2422_v1 = vpack.c.bf16 %v5412_v5, %v5412_v5  ;;  %v2248_v5 = vperm.slane %v5888_v18, %v4536_v56 }
 0x4ab   :  { %v3089_v32 = vunpack.c.l.b16 %v2423_v12  ;;  %v2396_v12 = vpack.c.bf16 %v5785_v30, %v5785_v30  ;;  %v2417_v30 = vpack.c.bf16 %v5389_v13, %v5389_v13  ;;  %v2267_v13 = vperm.slane %v5964_v45, %v4530_v54 }
 0x4ac   :  { %v3039_v47 = vunpack.c.l.b16 %v2419_v25  ;;  %v3088_v23 = vunpack.c.l.b16 %v2422_v1 }
 0x4ad   :  { %3006 = vperm.xlu2 %3786, %v3650_v39   ;;  %2547 = vperm.xlu1 %3787, %v3602_v60   ;;  %v2636_v39 = vunpack.c.l.b16 %v2384_v10  ;;  %v2786_v29 = vunpack.c.l.b16 %v2396_v12 }
 0x4ae   :  { %2803 = vperm.xlu0 %3788, %v3629_v57   ;;  %v3655_v7 = vunpack.i.l.s16 %v3039_v47  ;;  %v2427_v57 = vpack.c.bf16 %v5458_v61, %v5458_v61  ;;  %v3659_v52 = vunpack.i.l.s16 %v3088_v23  ;;  %v3660_v47 = vunpack.i.l.s16 %v3089_v32 }
 0x4af   :  { %v2055_v11 = vpop.permute.xlu1 %2054  ;;  %v3612_v35 = vunpack.i.l.s16 %v2636_v39 }
 0x4b0   :  { %v2241_v59 = vperm.slane %v2055_v11, %v4536_v56  ;;  %v5968_v14 = vpop.permute.xlu0 %2120  ;;  %v3139_v61 = vunpack.c.l.b16 %v2427_v57 }
 0x4b2   :  { %v2242_v15 = vsel %vm905_vm2, %v2241_v59, %v2240_v43  ;;  %v3137_v43 = vunpack.c.l.b16 %v2425_v41  ;;  %v2688_v41 = vunpack.c.l.b16 %v2390_v6 }
 0x4b4   :  { %v3663_v11 = vunpack.i.l.s16 %v3137_v43  ;;  %v3619_v23 = vunpack.i.l.s16 %v2688_v41 }
 0x4b5   :  { %3053 = vperm.xlu2 %3786, %v3654_v20   ;;  %2553 = vperm.xlu1 %3787, %v3604_v26   ;;  %v2686_v26 = vunpack.c.l.b16 %v2388_v63 }
 0x4b6   :  { %2806 = vperm.xlu0 %3788, %v3630_v42   ;;  %v5998_v42 = vpop.permute.xlu2 %2117 }
 0x4b7   :  { %v2058_v2 = vpop.permute.xlu1 %2057  ;;  %v3617_v9 = vunpack.i.l.s16 %v2686_v26 }
 0x4b8   :  { %v5978_v8 = vpop.permute.xlu0 %2129  ;;  %v2243_v60 = vperm.slane %v2058_v2, %v4523_v49  ;;  %v3665_v2 = vunpack.i.l.s16 %v3139_v61 }
 0x4bd   :  { %3100 = vperm.xlu2 %3786, %v3658_v36   ;;  %2600 = vperm.xlu1 %3787, %v3608_v31   ;;  %v3188_v31 = vunpack.c.l.b16 %v2430_v27  ;;  %v3627_v27 = vunpack.i.l.s16 %v2786_v29 }
 0x4be   :  { %3056 = vperm.xlu0 %3788, %v3655_v7   ;;  %v6012_v39 = vpop.permute.xlu2 %2126 }
 0x4bf   :  { %v2061_v19 = vpop.permute.xlu1 %2060 }
 0x4c0   :  { %v2244_v53 = vperm.slane %v2061_v19, %v4533_v55  ;;  %v6000_v25 = vpop.permute.xlu0 %2138  ;;  %v6520_v19 = vld [vmem:[#allocation25_spill] sm:$0xff] }
 0x4c1   :  { %v1979_v43 = vmul.f32 %v6520_v19, %v5444_v58 }
 0x4c2   :  { %v2245_v34 = vsel %vm897_vm0, %v2244_v53, %v2243_v60  ;;  %v3669_v53 = vunpack.i.l.s16 %v3188_v31  ;;  %v2269_v31 = vperm.slane %v5937_v33, %v4536_v56 }
 0x4c3   :  { %v2247_v44 = vsel %vm901_vm1, %v2246_v51, %v2245_v34  ;;  %v2431_v57 = vpack.c.bf16 %v1979_v43, %v1979_v43 }
 0x4c4   :  { %v2249_v59 = vsel %vm905_vm2, %v2248_v5, %v2247_v44  ;;  %v2393_v5 = vpack.c.bf16 %v5758_v37, %v5758_v37 }
 0x4c5   :  { %3150 = vperm.xlu2 %3786, %v3663_v11   ;;  %2647 = vperm.xlu1 %3787, %v3612_v35   ;;  %v2348_v18 = vsel %vm1012_vm3, %v2249_v59, %v2242_v15  ;;  %v2428_v15 = vpack.c.bf16 %v5455_v0, %v5455_v0  ;;  %v3189_v35 = vunpack.c.l.b16 %v2431_v57 }
 0x4c6   :  { %3103 = vperm.xlu0 %3788, %v3659_v52   ;;  %v2737_v46 = vunpack.c.l.b16 %v2393_v5 }
 0x4c7   :  { %v2070_v20 = vpop.permute.xlu1 %2069  ;;  %v3186_v1 = vunpack.c.l.b16 %v2428_v15  ;;  %v3670_v37 = vunpack.i.l.s16 %v3189_v35 }
 0x4c8   :  { %v2250_v10 = vperm.slane %v2070_v20, %v4523_v49  ;;  %v6015_v60 = vpop.permute.xlu0 %2447  ;;  %v3623_v52 = vunpack.i.l.s16 %v2737_v46  ;;  %v6025_v20 = vpop.permute.xlu2 %2135 }
 0x4c9   :  { %v3667_v34 = vunpack.i.l.s16 %v3186_v1  ;;  %v2420_v1 = vpack.c.bf16 %v5404_v38, %v5404_v38 }
 0x4cd   :  { %3156 = vperm.xlu2 %3786, %v3665_v2   ;;  %2697 = vperm.xlu1 %3787, %v3617_v9   ;;  %v2262_v2 = vperm.slane %v5947_v21, %v4536_v56  ;;  %v2264_v21 = vperm.slane %v5929_v24, %v4523_v49 }
 0x4ce   :  { %3106 = vperm.xlu0 %3788, %v3660_v47   ;;  %v3037_v47 = vunpack.c.l.b16 %v2417_v30 }
 0x4cf   :  { %v2073_v36 = vpop.permute.xlu1 %2072 }
 0x4d0   :  { %v2251_v7 = vperm.slane %v2073_v36, %v4533_v55  ;;  %v6027_v61 = vpop.permute.xlu0 %2456  ;;  %v6038_v6 = vpop.permute.xlu2 %2453 }
 0x4d2   :  { %v2252_v0 = vsel %vm897_vm0, %v2251_v7, %v2250_v10  ;;  %v3653_v10 = vunpack.i.l.s16 %v3037_v47 }
 0x4d3   :  { %v2254_v51 = vsel %vm901_vm1, %v2253_v17, %v2252_v0  ;;  %v3086_v17 = vunpack.c.l.b16 %v2420_v1 }
 0x4d5   :  { %3203 = vperm.xlu2 %3786, %v3669_v53   ;;  %2703 = vperm.xlu1 %3787, %v3619_v23   ;;  %v3657_v33 = vunpack.i.l.s16 %v3086_v17  ;;  %v6521_v53 = vld [vmem:[#allocation35_spill] sm:$0xff] }
 0x4d6   :  { %3197 = vperm.xlu0 %3788, %v3667_v34   ;;  %v2424_v23 = vpack.c.bf16 %v6521_v53, %v6521_v53 }
 0x4d7   :  { %v2079_v44 = vpop.permute.xlu1 %2078 }
 0x4d8   :  { %v2255_v11 = vperm.slane %v2079_v44, %v4536_v56  ;;  %v6040_v15 = vpop.permute.xlu0 %2503  ;;  %v6055_v0 = vpop.permute.xlu2 %2500  ;;  %v3136_v5 = vunpack.c.l.b16 %v2424_v23  ;;  %v6522_v44 = vld [vmem:[#allocation28_spill] sm:$0xff] }
 0x4d9   :  { %v2426_v46 = vpack.c.bf16 %v6522_v44, %v6522_v44 }
 0x4da   :  { %v2256_v63 = vsel %vm905_vm2, %v2255_v11, %v2254_v51  ;;  %v3662_v57 = vunpack.i.l.s16 %v3136_v5 }
 0x4db   :  { %v2349_v59 = vsel %vm1014_vm5, %v2256_v63, %v2348_v18  ;;  %v3138_v35 = vunpack.c.l.b16 %v2426_v46  ;;  %v6523_v63 = vld [vmem:[#allocation23_spill] sm:$0xff] }
 0x4dd   :  { %2231 = vperm.xlu2 %3786, %v1978_v28   ;;  %2750 = vperm.xlu1 %3787, %v3623_v52   ;;  %v3664_v52 = vunpack.i.l.s16 %v3138_v35  ;;  %v2511_v35 = vperm.slane %v6040_v15, %v4530_v54  ;;  %v4082_v15 = vld [vmem:[#allocation2 + $0x78] sm:$0xff] }
 0x4de   :  { %3206 = vperm.xlu0 %3788, %v3670_v37  }
 0x4df   :  { %v2088_v26 = vpop.permute.xlu1 %2087 }
 0x4e0   :  { %v2260_v32 = vperm.slane %v2088_v26, %v4530_v54  ;;  %v6057_v45 = vpop.permute.xlu0 %2506  ;;  %v6061_v34 = vpop.permute.xlu2 %2550 }
 0x4e2   :  { %v2261_v18 = vsel %vm901_vm1, %v2260_v32, %v5923_v4 }
 0x4e3   :  { %v2263_v9 = vsel %vm905_vm2, %v2262_v2, %v2261_v18 }
 0x4e4   :  { %v2350_v28 = vsel %vm1016_vm4, %v2263_v9, %v2349_v59  ;;  %v1977_v59 = vmul.f32 %v6523_v63, %v5444_v58  ;;  %v2279_v9 = vperm.slane %v5968_v14, %v4533_v55  ;;  %v2272_v58 = vperm.slane %v5976_v50, %v4533_v55 }
 0x4e5   :  { %2797 = vperm.xlu1 %3787, %v3627_v27   ;;  %v2285_v27 = vperm.slane %v5978_v8, %v4523_v49 }
 0x4e6   :  { %2234 = vperm.xlu0 %3788, %v1979_v43   ;;  %v2429_v12 = vpack.c.bf16 %v1977_v59, %v1977_v59 }
 0x4e7   :  { %v2097_v36 = vpop.permute.xlu1 %2096 }
 0x4e8   :  { %v2265_v4 = vperm.slane %v2097_v36, %v4533_v55  ;;  %v6063_v38 = vpop.permute.xlu0 %2597  ;;  %v6069_v37 = vpop.permute.xlu2 %2556  ;;  %v3187_v32 = vunpack.c.l.b16 %v2429_v12  ;;  %v2278_v36 = vperm.slane %v5998_v42, %v4523_v49  ;;  %v2288_v42 = vperm.slane %v6025_v20, %v4530_v54 }
 0x4ea   :  { %v2266_v41 = vsel %vm897_vm0, %v2265_v4, %v2264_v21  ;;  %v3668_v2 = vunpack.i.l.s16 %v3187_v32  ;;  %v2458_v21 = vperm.slane %v6015_v60, %v4523_v49  ;;  %v2461_v60 = vperm.slane %v6038_v6, %v4530_v54 }
 0x4eb   :  { %v2268_v7 = vsel %vm901_vm1, %v2267_v13, %v2266_v41  ;;  %v2274_v41 = vperm.slane %v5950_v22, %v4530_v54 }
 0x4ec   :  { %v2270_v19 = vsel %vm905_vm2, %v2269_v31, %v2268_v7  ;;  %v2463_v7 = vperm.slane %v6027_v61, %v4536_v56 }
 0x4ed   :  { %3050 = vperm.xlu1 %3787, %v3653_v10   ;;  %v2351_v24 = vsel %vm1018_vm6, %v2270_v19, %v2350_v28  ;;  %v2280_v10 = vsel %vm897_vm0, %v2279_v9, %v2278_v36 }
 0x4ef   :  { %v2106_v43 = vpop.permute.xlu1 %2105 }
 0x4f0   :  { %v6071_v26 = vpop.permute.xlu0 %2606  ;;  %v2271_v18 = vperm.slane %v2106_v43, %v4523_v49  ;;  %v6081_v28 = vpop.permute.xlu2 %2603  ;;  %v2283_v43 = vperm.slane %v6012_v39, %v4536_v56 }
 0x4f2   :  { %v2273_v13 = vsel %vm897_vm0, %v2272_v58, %v2271_v18 }
 0x4f3   :  { %v2275_v22 = vsel %vm901_vm1, %v2274_v41, %v2273_v13 }
 0x4f5   :  { %3097 = vperm.xlu1 %3787, %v3657_v33   ;;  %v2290_v33 = vperm.slane %v6000_v25, %v4536_v56 }
 0x4f7   :  { %v2115_v51 = vpop.permute.xlu1 %2114 }
 0x4f8   :  { %v6088_v4 = vpop.permute.xlu0 %2653  ;;  %v2276_v50 = vperm.slane %v2115_v51, %v4536_v56  ;;  %v2651_v44 = vpop.permute.xlu2 %2650 }
 0x4fa   :  { %v2277_v6 = vsel %vm905_vm2, %v2276_v50, %v2275_v22 }
 0x4fb   :  { %v2352_v39 = vsel %vm1020_vm7, %v2277_v6, %v2351_v24  ;;  %v2513_v24 = vperm.slane %v6057_v45, %v4536_v56  ;;  %v4083_v45 = vld [vmem:[#allocation2 + $0x70] sm:$0xff] }
 0x4fd   :  { %3147 = vperm.xlu1 %3787, %v3662_v57   ;;  %v2509_v57 = vperm.slane %v6055_v0, %v4533_v55 }
 0x4ff   :  { %v2124_v11 = vpop.permute.xlu1 %2123 }
 0x500   :  { %v2281_v47 = vperm.slane %v2124_v11, %v4530_v54  ;;  %v4080_v11 = vld [vmem:[#allocation2 + $0x68] sm:$0xff]  ;;  %v2657_v63 = vpop.permute.xlu0 %2656 }
 0x502   :  { %v2282_v1 = vsel %vm901_vm1, %v2281_v47, %v2280_v10  ;;  %v2608_v10 = vperm.slane %v6063_v38, %v4523_v49 }
 0x503   :  { %v2284_v53 = vsel %vm905_vm2, %v2283_v43, %v2282_v1  ;;  %v4085_v43 = vld [vmem:[#allocation2 + $0x80] sm:$0xff] }
 0x504   :  { %v2353_v25 = vsel %vm1022_vm8, %v2284_v53, %v2352_v39  ;;  %v2663_v53 = vperm.slane %v2657_v63, %v4536_v56 }
 0x505   :  { %3153 = vperm.xlu1 %3787, %v3664_v52  }
 0x507   :  { %v2133_v29 = vpop.permute.xlu1 %2132 }
 0x508   :  { %v2286_v30 = vperm.slane %v2133_v29, %v4533_v55  ;;  %v4081_v29 = vld [vmem:[#allocation2 + $0x60] sm:$0xff]  ;;  %v6132_v9 = vpop.permute.xlu0 %2747 }
 0x50a   :  { %v2287_v31 = vsel %vm897_vm0, %v2286_v30, %v2285_v27  ;;  %v2701_v30 = vpop.permute.xlu2 %2700  ;;  %v2559_v27 = vperm.slane %v6061_v34, %v4533_v55  ;;  %v4084_v34 = vld [vmem:[#allocation2 + $0x88] sm:$0xff] }
 0x50b   :  { %v2289_v17 = vsel %vm901_vm1, %v2288_v42, %v2287_v31  ;;  %v2709_v63 = vperm.slane %v2701_v30, %v4533_v55  ;;  %v2758_v30 = vperm.slane %v6132_v9, %v4523_v49 }
 0x50c   :  { %v2291_v51 = vsel %vm905_vm2, %v2290_v33, %v2289_v17 }
 0x50d   :  { %3200 = vperm.xlu1 %3787, %v3668_v2  }
 0x50f   :  { %v2451_v14 = vpop.permute.xlu1 %2450 }
 0x510   :  { %v2459_v8 = vperm.slane %v2451_v14, %v4533_v55  ;;  %v6143_v41 = vpop.permute.xlu0 %2756 }
 0x512   :  { %v2460_v19 = vsel %vm897_vm0, %v2459_v8, %v2458_v21  ;;  %v2563_v21 = vperm.slane %v6069_v37, %v4536_v56  ;;  %v2707_v31 = vpop.permute.xlu2 %2706 }
 0x513   :  { %v2462_v20 = vsel %vm901_vm1, %v2461_v60, %v2460_v19  ;;  %v2611_v60 = vperm.slane %v6081_v28, %v4530_v54  ;;  %v2659_v28 = vperm.slane %v2651_v44, %v4533_v55 }
 0x514   :  { %v2464_v61 = vsel %vm905_vm2, %v2463_v7, %v2462_v20  ;;  %v2613_v7 = vperm.slane %v6071_v26, %v4536_v56  ;;  %v4086_v26 = vld [vmem:[#allocation2 + $0x98] sm:$0xff] }
 0x515   :  { %2228 = vperm.xlu1 %3787, %v1977_v59   ;;  %v2465_v23 = vpack.c.b16 %v2464_v61, %v2464_v61  ;;  %v2354_v59 = vsel %vm6524_vm14, %v2291_v51, %v2353_v25  ;;  %v2661_v61 = vperm.slane %v6088_v4, %v4530_v54 }
 0x516   :  { %v2364_v32 = vsel %vm1035_vm10, %v2354_v59, 0.0 }
 0x517   :  { %v2498_v5 = vpop.permute.xlu1 %2497  ;;  %3596 = vmatmul.msk.bf16.vlgmr.msrb.gmra.mxu1 %vm1035_vm10, %v2465_v23  ;;  %2366 = vst [vmem:[#allocation9] sm:$0xff] %v2364_v32 }
 0x518   :  { %v2508_v46 = vperm.slane %v2498_v5, %v4523_v49  ;;  %2775 = vmatpush.bf16.msrb.mxu1 %v4080_v11  ;;  %v6156_v33 = vpop.permute.xlu0 %3047  ;;  %v4087_v5 = vld [vmem:[#allocation2 + $0x90] sm:$0xff] }
 0x51a   :  { %v2510_v52 = vsel %vm897_vm0, %v2509_v57, %v2508_v46  ;;  %v2754_v20 = vpop.permute.xlu2 %2753  ;;  %v4088_v46 = vld [vmem:[#allocation2 + $0xa8] sm:$0xff] }
 0x51b   :  { %v2512_v0 = vsel %vm901_vm1, %v2511_v35, %v2510_v52  ;;  %v4089_v35 = vld [vmem:[#allocation2 + $0xa0] sm:$0xff]  ;;  %v2713_v52 = vperm.slane %v2707_v31, %v4536_v56 }
 0x51c   :  { %v2514_v12 = vsel %vm905_vm2, %v2513_v24, %v2512_v0  ;;  %2776 = vmatpush.bf16.msrb.mxu1 %v4081_v29 }
 0x51d   :  { %v2515_v2 = vpack.c.b16 %v2514_v12, %v2514_v12 }
 0x51f   :  { %v2548_v18 = vpop.permute.xlu1 %2547  ;;  %3601 = vmatmul.msk.bf16.vlgmr.msrb.gmra.mxu2 %vm1035_vm10, %v2515_v2 }
 0x520   :  { %2825 = vmatpush.bf16.msrb.mxu2 %v4082_v15  ;;  %v2558_v58 = vperm.slane %v2548_v18, %v4523_v49  ;;  %v2804_v11 = vpop.permute.xlu0 %2803 }
 0x522   :  { %v2560_v14 = vsel %vm897_vm0, %v2559_v27, %v2558_v58  ;;  %v2801_v44 = vpop.permute.xlu2 %2800  ;;  %v2761_v27 = vperm.slane %v2754_v20, %v4530_v54 }
 0x523   :  { %v2809_v9 = vperm.slane %v2801_v44, %v4533_v55  ;;  %v3058_v44 = vperm.slane %v6156_v33, %v4523_v49 }
 0x524   :  { %2826 = vmatpush.bf16.msrb.mxu2 %v4083_v45  ;;  %v4090_v45 = vld [vmem:[#allocation2 + $0xb8] sm:$0xff] }
 0x527   :  { %v2554_v47 = vpop.permute.xlu1 %2553 }
 0x528   :  { %v2561_v36 = vperm.slane %v2554_v47, %v4530_v54  ;;  %v2807_v32 = vpop.permute.xlu0 %2806  ;;  %v2763_v47 = vperm.slane %v6143_v41, %v4536_v56  ;;  %v2811_v41 = vperm.slane %v2804_v11, %v4530_v54  ;;  %v4099_v11 = vld [vmem:[#allocation2 + $0xf0] sm:$0xff] }
 0x52a   :  { %v2562_v13 = vsel %vm901_vm1, %v2561_v36, %v2560_v14  ;;  %v3007_v12 = vpop.permute.xlu2 %3006  ;;  %v4091_v14 = vld [vmem:[#allocation2 + $0xb0] sm:$0xff] }
 0x52b   :  { %v2564_v50 = vsel %vm905_vm2, %v2563_v21, %v2562_v13 }
 0x52c   :  { %v2565_v8 = vpack.c.b16 %v2564_v50, %v2564_v50 }
 0x52e   :  { %3606 = vmatmul.msk.bf16.vlgmr.msrb.gmra.mxu3 %vm1035_vm10, %v2565_v8 }
 0x52f   :  { %v2601_v42 = vpop.permute.xlu1 %2600  ;;  %2875 = vmatpush.bf16.msrb.mxu3 %v4084_v34 }
 0x530   :  { %v2609_v37 = vperm.slane %v2601_v42, %v4533_v55  ;;  %v3057_v31 = vpop.permute.xlu0 %3056 }
 0x532   :  { %v2610_v1 = vsel %vm897_vm0, %v2609_v37, %v2608_v10  ;;  %v3054_v13 = vpop.permute.xlu2 %3053  ;;  %v4092_v10 = vld [vmem:[#allocation2 + $0xc8] sm:$0xff]  ;;  %v2813_v37 = vperm.slane %v2807_v32, %v4536_v56 }
 0x533   :  { %v2612_v19 = vsel %vm901_vm1, %v2611_v60, %v2610_v1  ;;  %2876 = vmatpush.bf16.msrb.mxu3 %v4085_v43  ;;  %v2865_v1 = vpack.c.b16 %v5864_v3, %v5864_v3  ;;  %v4093_v43 = vld [vmem:[#allocation2 + $0xc0] sm:$0xff]  ;;  %v2915_v3 = vpack.c.b16 %v5881_v48, %v5881_v48 }
 0x534   :  { %v2614_v22 = vsel %vm905_vm2, %v2613_v7, %v2612_v19 }
 0x535   :  { %v2615_v17 = vpack.c.b16 %v2614_v22, %v2614_v22 }
 0x537   :  { %v2648_v38 = vpop.permute.xlu1 %2647  ;;  %3611 = vmatmul.msk.bf16.vlgmr.msra.gmra.mxu1 %vm1035_vm10, %v2615_v17 }
 0x538   :  { %v2658_v6 = vperm.slane %v2648_v38, %v4523_v49  ;;  %2925 = vmatpush.bf16.msra.mxu1 %v4086_v26  ;;  %v3104_v20 = vpop.permute.xlu0 %3103  ;;  %v4096_v26 = vld [vmem:[#allocation2 + $0xe0] sm:$0xff] }
 0x53a   :  { %v2660_v23 = vsel %vm897_vm0, %v2659_v28, %v2658_v6  ;;  %v3101_v17 = vpop.permute.xlu2 %3100  ;;  %v4094_v28 = vld [vmem:[#allocation2 + $0xe8] sm:$0xff]  ;;  %v4095_v6 = vld [vmem:[#allocation2 + $0xd8] sm:$0xff] }
 0x53b   :  { %v2662_v51 = vsel %vm901_vm1, %v2661_v61, %v2660_v23  ;;  %v4097_v61 = vld [vmem:[#allocation2 + $0xd0] sm:$0xff] }
 0x53c   :  { %v2664_v39 = vsel %vm905_vm2, %v2663_v53, %v2662_v51  ;;  %2926 = vmatpush.bf16.msra.mxu1 %v4087_v5  ;;  %v3013_v53 = vperm.slane %v3007_v12, %v4536_v56  ;;  %v4098_v5 = vld [vmem:[#allocation2 + $0xf8] sm:$0xff] }
 0x53d   :  { %v2665_v57 = vpack.c.b16 %v2664_v39, %v2664_v39 }
 0x53f   :  { %v2698_v25 = vpop.permute.xlu1 %2697  ;;  %3616 = vmatmul.msk.bf16.vlgmr.msra.gmra.mxu2 %vm1035_vm10, %v2665_v57  ;;  %v3014_v57 = vsel %vm905_vm2, %v3013_v53, %v5918_v62  ;;  %v3063_v62 = vperm.slane %v3057_v31, %v4536_v56 }
 0x540   :  { %2975 = vmatpush.bf16.msra.mxu2 %v4088_v46  ;;  %v2708_v4 = vperm.slane %v2698_v25, %v4523_v49  ;;  %v3107_v25 = vpop.permute.xlu0 %3106  ;;  %v3015_v46 = vpack.c.b16 %v3014_v57, %v3014_v57 }
 0x542   :  { %v2710_v0 = vsel %vm897_vm0, %v2709_v63, %v2708_v4  ;;  %v3151_v51 = vpop.permute.xlu2 %3150  ;;  %v3061_v4 = vperm.slane %v3054_v13, %v4530_v54 }
 0x544   :  { %2976 = vmatpush.bf16.msra.mxu2 %v4089_v35  ;;  %v2965_v35 = vpack.c.b16 %v5901_v40, %v5901_v40 }
 0x547   :  { %v2704_v59 = vpop.permute.xlu1 %2703 }
 0x548   :  { %v2711_v24 = vperm.slane %v2704_v59, %v4530_v54  ;;  %v3198_v12 = vpop.permute.xlu0 %3197 }
 0x54a   :  { %v2712_v29 = vsel %vm901_vm1, %v2711_v24, %v2710_v0  ;;  %v3109_v24 = vperm.slane %v3101_v17, %v4533_v55  ;;  %v6525_v17 = vld [vmem:[#allocation30_spill] sm:$0xff] }
 0x54b   :  { %v2714_v2 = vsel %vm905_vm2, %v2713_v52, %v2712_v29  ;;  %v3157_v52 = vpop.permute.xlu2 %3156  ;;  %v3111_v29 = vperm.slane %v3104_v20, %v4530_v54  ;;  %v2341_v20 = vperm.slane %v6525_v17, %v4523_v49 }
 0x54c   :  { %v2715_v18 = vpack.c.b16 %v2714_v2, %v2714_v2 }
 0x54e   :  { %3621 = vmatmul.msk.bf16.vlgmr.msra.gmra.mxu3 %vm1035_vm10, %v2715_v18  ;;  %v3159_v18 = vperm.slane %v3151_v51, %v4533_v55 }
 0x54f   :  { %v2751_v15 = vpop.permute.xlu1 %2750  ;;  %3025 = vmatpush.bf16.msra.mxu3 %v4090_v45 }
 0x550   :  { %v2759_v58 = vperm.slane %v2751_v15, %v4533_v55  ;;  %v3207_v31 = vpop.permute.xlu0 %3206 }
 0x552   :  { %v2760_v36 = vsel %vm897_vm0, %v2759_v58, %v2758_v30  ;;  %v3113_v30 = vperm.slane %v3107_v25, %v4536_v56 }
 0x553   :  { %v2762_v21 = vsel %vm901_vm1, %v2761_v27, %v2760_v36  ;;  %3026 = vmatpush.bf16.msra.mxu3 %v4091_v14  ;;  %v3163_v27 = vperm.slane %v3157_v52, %v4536_v56  ;;  %v3204_v13 = vpop.permute.xlu2 %3203 }
 0x554   :  { %v2764_v50 = vsel %vm905_vm2, %v2763_v47, %v2762_v21 }
 0x555   :  { %v2765_v8 = vpack.c.b16 %v2764_v50, %v2764_v50 }
 0x557   :  { %v2798_v42 = vpop.permute.xlu1 %2797  ;;  %3626 = vmatmul.msk.bf16.vlgmr.msrb.gmra.mxu1 %vm1035_vm10, %v2765_v8 }
 0x558   :  { %v2808_v34 = vperm.slane %v2798_v42, %v4523_v49  ;;  %3075 = vmatpush.bf16.msrb.mxu1 %v4092_v10  ;;  %v3211_v10 = vperm.slane %v3204_v13, %v4530_v54 }
 0x55a   :  { %v2810_v60 = vsel %vm897_vm0, %v2809_v9, %v2808_v34  ;;  %v3208_v9 = vperm.slane %v3198_v12, %v4523_v49 }
 0x55b   :  { %v2812_v7 = vsel %vm901_vm1, %v2811_v41, %v2810_v60  ;;  %v3213_v41 = vperm.slane %v3207_v31, %v4536_v56  ;;  %v3745_v31 = vld [vmem:[#allocation7 + $0x8] sm:$0xff] }
 0x55c   :  { %v2814_v19 = vsel %vm905_vm2, %v2813_v37, %v2812_v7  ;;  %3076 = vmatpush.bf16.msrb.mxu1 %v4093_v43  ;;  %v2235_v43 = vpop.permute.xlu0 %2234 }
 0x55d   :  { %v2815_v22 = vpack.c.b16 %v2814_v19, %v2814_v19  ;;  %v2232_v19 = vpop.permute.xlu2 %2231 }
 0x55e   :  { %3636 = vmatmul.msk.bf16.vlgmr.msrb.gmra.mxu3 %vm1035_vm10, %v2865_v1 }
 0x55f   :  { %v3051_v38 = vpop.permute.xlu1 %3050  ;;  %3631 = vmatmul.msk.bf16.vlgmr.msrb.gmra.mxu2 %vm1035_vm10, %v2815_v22  ;;  %3175 = vmatpush.bf16.msrb.mxu3 %v4094_v28  ;;  %v2344_v28 = vperm.slane %v2232_v19, %v4530_v54 }
 0x560   :  { %3125 = vmatpush.bf16.msrb.mxu2 %v4095_v6  ;;  %v3059_v39 = vperm.slane %v3051_v38, %v4533_v55  ;;  %v2346_v6 = vperm.slane %v2235_v43, %v4536_v56 }
 0x562   :  { %v3060_v48 = vsel %vm897_vm0, %v3059_v39, %v3058_v44 }
 0x563   :  { %3176 = vmatpush.bf16.msrb.mxu3 %v4096_v26  ;;  %v3062_v63 = vsel %vm901_vm1, %v3061_v4, %v3060_v48 }
 0x564   :  { %3126 = vmatpush.bf16.msrb.mxu2 %v4097_v61  ;;  %v3064_v0 = vsel %vm905_vm2, %v3063_v62, %v3062_v63 }
 0x565   :  { %v3065_v32 = vpack.c.b16 %v3064_v0, %v3064_v0 }
 0x567   :  { %v3098_v23 = vpop.permute.xlu1 %3097  ;;  %3641 = vmatmul.msk.bf16.vlgmr.msra.gmra.mxu1 %vm1035_vm10, %v2915_v3 }
 0x568   :  { %3225 = vmatpush.bf16.msra.mxu1 %v4098_v5  ;;  %v3108_v33 = vperm.slane %v3098_v23, %v4523_v49 }
 0x56a   :  { %v3110_v40 = vsel %vm897_vm0, %v3109_v24, %v3108_v33 }
 0x56b   :  { %v3112_v15 = vsel %vm901_vm1, %v3111_v29, %v3110_v40  ;;  %v3751_v40 = vld [vmem:[#allocation7 + $0x38] sm:$0xff] }
 0x56c   :  { %3226 = vmatpush.bf16.msra.mxu1 %v4099_v11  ;;  %v3114_v36 = vsel %vm905_vm2, %v3113_v30, %v3112_v15  ;;  %v3749_v15 = vld [vmem:[#allocation7 + $0x28] sm:$0xff]  ;;  %v3748_v30 = vld [vmem:[#allocation7 + $0x20] sm:$0xff] }
 0x56d   :  { %v3115_v8 = vpack.c.b16 %v3114_v36, %v3114_v36 }
 0x56e   :  { %3651 = vmatmul.msk.bf16.vlgmr.msra.gmra.mxu3 %vm1035_vm10, %v3015_v46 }
 0x56f   :  { %v3148_v59 = vpop.permute.xlu1 %3147  ;;  %3646 = vmatmul.msk.bf16.vlgmr.msra.gmra.mxu2 %vm1035_vm10, %v2965_v35 }
 0x570   :  { %v3158_v2 = vperm.slane %v3148_v59, %v4523_v49  ;;  %3378 = vmatpush.bf16.msra.mxu2 %v3751_v40 }
 0x572   :  { %v3160_v47 = vsel %vm897_vm0, %v3159_v18, %v3158_v2  ;;  %v3750_v18 = vld [vmem:[#allocation7 + $0x30] sm:$0xff] }
 0x574   :  { %3379 = vmatpush.bf16.msra.mxu2 %v3750_v18 }
 0x577   :  { %v3154_v45 = vpop.permute.xlu1 %3153  ;;  %3656 = vmatmul.msk.bf16.vlgmr.msrb.gmra.mxu1 %vm1035_vm10, %v3065_v32 }
 0x578   :  { %v3161_v58 = vperm.slane %v3154_v45, %v4530_v54  ;;  %3380 = vmatpush.bf16.msra.mxu2 %v3749_v15 }
 0x57a   :  { %v3162_v21 = vsel %vm901_vm1, %v3161_v58, %v3160_v47  ;;  %v3747_v47 = vld [vmem:[#allocation7 + $0x18] sm:$0xff] }
 0x57b   :  { %v3164_v14 = vsel %vm905_vm2, %v3163_v27, %v3162_v21 }
 0x57c   :  { %v3165_v50 = vpack.c.b16 %v3164_v14, %v3164_v14  ;;  %3381 = vmatpush.bf16.msra.mxu2 %v3748_v30  ;;  %v3746_v14 = vld [vmem:[#allocation7 + $0x10] sm:$0xff] }
 0x57e   :  { %3666 = vmatmul.msk.bf16.vlgmr.msrb.gmra.mxu3 %vm1035_vm10, %v3165_v50 }
 0x57f   :  { %v3201_v42 = vpop.permute.xlu1 %3200  ;;  %3661 = vmatmul.msk.bf16.vlgmr.msrb.gmra.mxu2 %vm1035_vm10, %v3115_v8  ;;  %v3744_v8 = vld [vmem:[#allocation7] sm:$0xff] }
 0x580   :  { %v3209_v34 = vperm.slane %v3201_v42, %v4533_v55  ;;  %3382 = vmatpush.bf16.msra.mxu2 %v3747_v47 }
 0x582   :  { %v3210_v37 = vsel %vm897_vm0, %v3209_v34, %v3208_v9 }
 0x583   :  { %v3212_v60 = vsel %vm901_vm1, %v3211_v10, %v3210_v37 }
 0x584   :  { %v3214_v7 = vsel %vm905_vm2, %v3213_v41, %v3212_v60  ;;  %3383 = vmatpush.bf16.msra.mxu2 %v3746_v14  ;;  %v3791_v14 = vld [vmem:[%s6282_s5] ss:$0 sm:$0xff] }
 0x585   :  { %v3215_v1 = vpack.c.b16 %v3214_v7, %v3214_v7 }
 0x587   :  { %v2229_v22 = vpop.permute.xlu1 %2228  ;;  %3671 = vmatmul.msk.bf16.vlgmr.msra.gmra.mxu1 %vm1035_vm10, %v3215_v1 }
 0x588   :  { %v2342_v38 = vperm.slane %v2229_v22, %v4533_v55  ;;  %3384 = vmatpush.bf16.msra.mxu2 %v3745_v31 }
 0x58a   :  { %v2343_v26 = vsel %vm897_vm0, %v2342_v38, %v2341_v20  ;;  %vm6527_vm0 = vmmov %vm6524_vm14 }
 0x58b   :  { %v2345_v61 = vsel %vm901_vm1, %v2344_v28, %v2343_v26  ;;  %vm6528_vm1 = vmmov %vm6527_vm0 }
 0x58c   :  { %v2347_v3 = vsel %vm905_vm2, %v2346_v6, %v2345_v61  ;;  %3385 = vmatpush.bf16.msra.mxu2 %v3744_v8 }
 0x58d   :  { %v2361_v53 = vsel %vm6526_vm15, %v2347_v3, %v5847_v16 }
 0x58e   :  { %v2365_v39 = vsel %vm1035_vm10, %v2361_v53, 0.0 }
 0x58f   :  { %2367 = vst [vmem:[#allocation9 + $0x8] sm:$0xff] %v2365_v39 }
 0x590   :  { %3419 = dma.vmem_to_hbm [thread:$0]  %s3412_s3, 256, %s3414_s21, [#allocation10], %s4235_s22, %s4235_s22, %s4236_s23  }
 0x594   :  { %v2478_v23 = vpop.f32.mrf.mxu1 }
 0x595   :  { %v3232_v55 = vpack.c.bf16 %v2478_v23, %v2478_v23 }
 0x597   :  { %v3284_v57 = vunpack.c.l.b16 %v3232_v55 }
 0x59c   :  { %v2480_v51 = vpop.f32.mrf.mxu1 }
 0x5a2   :  { %v2528_v49 = vpop.f32.mrf.mxu2 }
 0x5a3   :  { %v3233_v5 = vpack.c.bf16 %v2528_v49, %v2528_v49 }
 0x5a5   :  { %v3285_v54 = vunpack.c.l.b16 %v3233_v5 }
 0x5a7   :  { %v3300_v56 = vrot.slane %v3285_v54, 7 }
 0x5a9   :  { %v3301_v25 = vsel %vm1012_vm3, %v3300_v56, %v3284_v57 }
 0x5aa   :  { %v2530_v44 = vpop.f32.mrf.mxu2 }
 0x5b1   :  { %v2578_v46 = vpop.f32.mrf.mxu3 }
 0x5b2   :  { %v3234_v48 = vpack.c.bf16 %v2578_v46, %v2578_v46 }
 0x5b4   :  { %v3286_v11 = vunpack.c.l.b16 %v3234_v48  ;;  %v2628_v35 = vpop.f32.mrf.mxu1 }
 0x5b5   :  { %v3235_v4 = vpack.c.bf16 %v2628_v35, %v2628_v35 }
 0x5b6   :  { %v3302_v16 = vrot.slane %v3286_v11, 6 }
 0x5b7   :  { %v3287_v63 = vunpack.c.l.b16 %v3235_v4 }
 0x5b8   :  { %v3303_v59 = vsel %vm1014_vm5, %v3302_v16, %v3301_v25 }
 0x5b9   :  { %v3304_v62 = vrot.slane %v3287_v63, 5  ;;  %v2580_v33 = vpop.f32.mrf.mxu3 }
 0x5bb   :  { %v6254_v24 = vsel %vm1016_vm4, %v3304_v62, %v3303_v59 }
 0x5bc   :  { %v2630_v52 = vpop.f32.mrf.mxu1 }
 0x5c2   :  { %v2678_v0 = vpop.f32.mrf.mxu2 }
 0x5c3   :  { %v3236_v22 = vpack.c.bf16 %v2678_v0, %v2678_v0 }
 0x5c5   :  { %v3288_v23 = vunpack.c.l.b16 %v3236_v22 }
 0x5c7   :  { %v3306_v48 = vrot.slane %v3288_v23, 4 }
 0x5c9   :  { %v3307_v40 = vsel %vm1018_vm6, %v3306_v48, %v6254_v24 }
 0x5ca   :  { %v2680_v12 = vpop.f32.mrf.mxu2 }
 0x5d1   :  { %v2728_v29 = vpop.f32.mrf.mxu3 }
 0x5d2   :  { %v3237_v38 = vpack.c.bf16 %v2728_v29, %v2728_v29 }
 0x5d4   :  { %v2778_v32 = vpop.f32.mrf.mxu1  ;;  %v3289_v39 = vunpack.c.l.b16 %v3237_v38 }
 0x5d5   :  { %v3238_v6 = vpack.c.bf16 %v2778_v32, %v2778_v32 }
 0x5d6   :  { %v3308_v16 = vrot.slane %v3289_v39, 3 }
 0x5d7   :  { %v3290_v5 = vunpack.c.l.b16 %v3238_v6 }
 0x5d9   :  { %v2730_v2 = vpop.f32.mrf.mxu3  ;;  %v3310_v33 = vrot.slane %v3290_v5, 2 }
 0x5da   :  { %v3309_v2 = vsel %vm1020_vm7, %v3308_v16, %v3307_v40 }
 0x5db   :  { %v3311_v30 = vsel %vm1022_vm8, %v3310_v33, %v3309_v2 }
 0x5dc   :  { %v2780_v45 = vpop.f32.mrf.mxu1 }
 0x5e1   :  { %v2878_v58 = vpop.f32.mrf.mxu3 }
 0x5e2   :  { %v2828_v27 = vpop.f32.mrf.mxu2  ;;  %v3240_v19 = vpack.c.bf16 %v2878_v58, %v2878_v58 }
 0x5e3   :  { %v3239_v3 = vpack.c.bf16 %v2828_v27, %v2828_v27 }
 0x5e4   :  { %v2928_v36 = vpop.f32.mrf.mxu1  ;;  %v3292_v61 = vunpack.c.l.b16 %v3240_v19 }
 0x5e5   :  { %v3241_v10 = vpack.c.bf16 %v2928_v36, %v2928_v36  ;;  %v3291_v25 = vunpack.c.l.b16 %v3239_v3 }
 0x5e7   :  { %v3293_v37 = vunpack.c.l.b16 %v3241_v10  ;;  %v3312_v52 = vrot.slane %v3291_v25, 1 }
 0x5e9   :  { %v2880_v21 = vpop.f32.mrf.mxu3  ;;  %v3314_v28 = vrot.slane %v3293_v37, 7  ;;  %v3313_v47 = vsel %vm6527_vm0, %v3312_v52, %v3311_v30 }
 0x5ea   :  { %v2830_v13 = vpop.f32.mrf.mxu2 }
 0x5eb   :  { %v3315_v49 = vsel %vm1012_vm3, %v3314_v28, %v3292_v61 }
 0x5ec   :  { %v2930_v50 = vpop.f32.mrf.mxu1 }
 0x5f1   :  { %v3028_v42 = vpop.f32.mrf.mxu3 }
 0x5f2   :  { %v2978_v9 = vpop.f32.mrf.mxu2  ;;  %v3243_v43 = vpack.c.bf16 %v3028_v42, %v3028_v42 }
 0x5f3   :  { %v3242_v41 = vpack.c.bf16 %v2978_v9, %v2978_v9 }
 0x5f4   :  { %v3078_v34 = vpop.f32.mrf.mxu1  ;;  %v3295_v53 = vunpack.c.l.b16 %v3243_v43 }
 0x5f5   :  { %v3294_v7 = vunpack.c.l.b16 %v3242_v41  ;;  %v3244_v17 = vpack.c.bf16 %v3078_v34, %v3078_v34 }
 0x5f6   :  { %v3318_v44 = vrot.slane %v3295_v53, 5 }
 0x5f7   :  { %v3316_v26 = vrot.slane %v3294_v7, 6  ;;  %v3296_v51 = vunpack.c.l.b16 %v3244_v17 }
 0x5f9   :  { %v3030_v60 = vpop.f32.mrf.mxu3  ;;  %v3317_v54 = vsel %vm1014_vm5, %v3316_v26, %v3315_v49  ;;  %v3320_v11 = vrot.slane %v3296_v51, 4 }
 0x5fa   :  { %v2980_v1 = vpop.f32.mrf.mxu2  ;;  %v3319_v63 = vsel %vm1016_vm4, %v3318_v44, %v3317_v54 }
 0x5fb   :  { %v3321_v29 = vsel %vm1018_vm6, %v3320_v11, %v3319_v63 }
 0x5fc   :  { %v3080_v20 = vpop.f32.mrf.mxu1 }
 0x601   :  { %v3178_v55 = vpop.f32.mrf.mxu3 }
 0x602   :  { %v3246_v57 = vpack.c.bf16 %v3178_v55, %v3178_v55  ;;  %v3128_v56 = vpop.f32.mrf.mxu2 }
 0x603   :  { %v3245_v46 = vpack.c.bf16 %v3128_v56, %v3128_v56 }
 0x604   :  { %v3298_v35 = vunpack.c.l.b16 %v3246_v57  ;;  %v3228_v4 = vpop.f32.mrf.mxu1 }
 0x605   :  { %v3297_v59 = vunpack.c.l.b16 %v3245_v46  ;;  %v3247_v62 = vpack.c.bf16 %v3228_v4, %v3228_v4 }
 0x606   :  { %v3324_v32 = vrot.slane %v3298_v35, 2 }
 0x607   :  { %v3322_v0 = vrot.slane %v3297_v59, 3  ;;  %v3299_v12 = vunpack.c.l.b16 %v3247_v62 }
 0x609   :  { %v3323_v18 = vsel %vm1020_vm7, %v3322_v0, %v3321_v29  ;;  %v3326_v15 = vrot.slane %v3299_v12, 1  ;;  %v3180_v45 = vpop.f32.mrf.mxu3 }
 0x60a   :  { %v3325_v58 = vsel %vm1022_vm8, %v3324_v32, %v3323_v18  ;;  %v3130_v27 = vpop.f32.mrf.mxu2 }
 0x60b   :  { %v3327_v36 = vsel %vm6528_vm1, %v3326_v15, %v3325_v58 }
 0x60c   :  { %v3328_v21 = vpack.c.b16 %v3327_v36, %v3313_v47  ;;  %v3230_v24 = vpop.f32.mrf.mxu1 }
 0x60e   :  { %3386 = vmatmul.bf16.vlgmr.msra.gmra.mxu2 %v3328_v21 }
 0x691   :  { %v3387_v13 = vpop.f32.mrf.mxu2 }
 0x692   :  { %v3388_v50 = vadd.f32 %v3791_v14, %v3387_v13 }
 0x694   :  { %3392 = vst [vmem:[#allocation8] sm:$0xff] %v3388_v50 }
 0x699   :  { %v3389_v31 = vpop.f32.mrf.mxu2 }
 0x69a   :  { %v3390_v8 = vadd.f32 %v3791_v14, %v3389_v31 }
 0x69c   :  { %3393 = vst [vmem:[#allocation8 + $0x8] sm:$0xff] %v3390_v8 }
 0x69d   :  { %3406 = dma.vmem_to_hbm [thread:$0]  %s3399_s27, 256, %s3401_s30, [#allocation4], %s4235_s22, %s4235_s22, %s4236_s23  }
 0x69e   :  { %4224 = dma.done.wait [#allocation4], 256  }
 0x69f   :  { %4225 = vsyncadd [#allocation4], 4294967040 }
 0x6a0   :  { %4226 = dma.done.wait [#allocation10], 256  }
 0x6a1   :  { %4227 = vsyncadd [#allocation10], 4294967040 }
 0x6a2   :  { %3428 = vsyncpa [#allocation3], 1 }
 0x6a3   :  { %3429 = vsyncpa [#allocation6], 1 }
 0x6a4   :  { %3430 = vsyncpa [#allocation4], 1 }
 0x6a5   :  { %3431 = vsyncpa [#allocation10], 1 }

</bundles_post_ra>
